<compile_context>
chip_gen: v7x
topology: tpu7x:2x2x1
jax: 0.10.0
libtpu: 0.0.40
codegen_flags: <defaults>
</compile_context>

<pallas_src>
import functools
import math

import numpy as np
import jax
import jax.numpy as jnp
from jax import lax
from jax.experimental import pallas as pl
from jax.experimental.pallas import tpu as pltpu

# rows of the stacked per-channel parameter array (11, C)
LN1_W, LN1_B, LN2_W, LN2_B, GAMMA1, GAMMA2, SP_DECAY, SP_FIRST, MIX_K, MIX_V, MIX_R = range(11)
# slices of the attention weight stack (4, C, C); all stored as (in, out)
W_ATT_K, W_ATT_V, W_ATT_R, W_ATT_O = range(4)


def _layernorm(z, w, b, eps=1e-5):
    mu = jnp.mean(z, axis=-1, keepdims=True)
    var = jnp.mean(jnp.square(z - mu), axis=-1, keepdims=True)
    return (z - mu) * lax.rsqrt(var + eps) * w + b


def block_kernel(x_ref, vecs_ref, watt_ref, wfk_ref, wfv_ref, wfr_ref, o_ref,
                 pad_ref, *, H, W, shift_pixel, channel_gamma):
    f32 = jnp.float32
    T = H * W
    x = x_ref[0]                      # (T, C) f32
    C = x.shape[-1]
    vecs = vecs_ref[...]              # (11, C) f32

    def vec(i):                       # (1, C) for broadcasting against (T, C)
        return vecs[i][None, :]

    # ----- constants shared by both q_shift calls (built once, reused) -----
    s = shift_pixel
    PAD = s * W                       # halo rows on each side of the token axis
    g = int(C * channel_gamma)
    chan = lax.broadcasted_iota(jnp.int32, (1, C), 1)
    ch_r = (chan < g).astype(f32)                       # shift right along W
    ch_l = ((chan >= g) & (chan < 2 * g)).astype(f32)   # shift left  along W
    ch_d = ((chan >= 2 * g) & (chan < 3 * g)).astype(f32)  # shift down along H
    ch_u = ((chan >= 3 * g) & (chan < 4 * g)).astype(f32)  # shift up   along H
    ch_keep = (chan >= 4 * g).astype(f32)               # untouched channels
    col = lax.broadcasted_iota(jnp.int32, (T, 1), 0) % W
    m_r = (col >= s).astype(f32)          # zero the left image border
    m_l = (col < (W - s)).astype(f32)     # zero the right image border

    pad_ref[...] = jnp.zeros_like(pad_ref)   # keep halo rows at zero

    def q_shift(z):
        # zero-padded token-axis shifts via the VMEM halo buffer (replaces the
        # old (T, T) permutation-matrix matmuls). H-direction borders are
        # handled by the zero halo; W-direction row borders by m_r / m_l.
        pad_ref[pl.ds(PAD, T), :] = z
        s_r = pad_ref[pl.ds(PAD - s, T), :]        # z[t - s]
        s_l = pad_ref[pl.ds(PAD + s, T), :]        # z[t + s]
        s_d = pad_ref[pl.ds(PAD - s * W, T), :]    # z[t - s*W] (top rows -> 0)
        s_u = pad_ref[pl.ds(PAD + s * W, T), :]    # z[t + s*W] (bottom rows -> 0)
        return (ch_r * (m_r * s_r) + ch_l * (m_l * s_l)
                + ch_d * s_d + ch_u * s_u + ch_keep * z)

    def matmul_bf16(a, w_bf16):
        # bf16 operands, f32 MXU accumulation.
        return jnp.dot(a.astype(jnp.bfloat16), w_bf16, preferred_element_type=f32)

    # ---------------- attention branch (VRWKV_SpatialMix) ----------------
    xn = _layernorm(x, vec(LN1_W), vec(LN1_B))
    xx = q_shift(xn)
    mk, mv, mr = vec(MIX_K), vec(MIX_V), vec(MIX_R)
    xk = xn * mk + xx * (1.0 - mk)
    xv = xn * mv + xx * (1.0 - mv)
    xr = xn * mr + xx * (1.0 - mr)

    k = matmul_bf16(xk, watt_ref[W_ATT_K])           # (T, C)
    v = matmul_bf16(xv, watt_ref[W_ATT_V])
    sr = jax.nn.sigmoid(matmul_bf16(xr, watt_ref[W_ATT_R]))

    # Bi-WKV (RUN_CUDA equivalent), factorized:
    #   e^{-(|t-i|-1)w + k_i} = e^{-(t-1)w} · e^{+i w + k_i}   (i < t)
    #                         = e^{+(t+1)w} · e^{-i w + k_i}   (i > t)
    # so num/den are exclusive prefix/suffix sums over tokens, computed with
    # strict-triangular matmuls on the MXU.  k is shifted by its per-channel
    # max; |i·w| < |spatial_decay| <= 5, so all exponentials are f32-safe.
    w_dec = (vecs[SP_DECAY] / float(T))[None, :]     # (1, C)
    u_first = (vecs[SP_FIRST] / float(T))[None, :]
    kb = k - jnp.max(k, axis=0, keepdims=True)       # <= 0
    tpos = lax.broadcasted_iota(jnp.int32, (T, 1), 0).astype(f32)
    tw = tpos * w_dec                                # (T, C): t * w
    ef = jnp.exp(tw + kb)                            # e^{+i w + kb_i}
    eb = jnp.exp(-tw + kb)                           # e^{-i w + kb_i}
    ti = lax.broadcasted_iota(jnp.int32, (T, T), 0)
    ii = lax.broadcasted_iota(jnp.int32, (T, T), 1)
    ltri = (ii < ti).astype(f32)                     # strictly lower triangular
    utri = (ii > ti).astype(f32)                     # strictly upper triangular
    fcat = jnp.concatenate([ef * v, ef], axis=-1)    # (T, 2C): [num | den]
    bcat = jnp.concatenate([eb * v, eb], axis=-1)
    pf = jnp.dot(ltri, fcat, preferred_element_type=f32)   # exclusive prefix sums
    pb = jnp.dot(utri, bcat, preferred_element_type=f32)   # exclusive suffix sums
    scale_f = jnp.exp(-(tpos - 1.0) * w_dec)         # e^{-(t-1) w}
    scale_b = jnp.exp((tpos + 1.0) * w_dec)          # e^{+(t+1) w}
    diag = jnp.exp(u_first + kb)                     # e^{u + kb_t}
    num = scale_f * pf[:, :C] + scale_b * pb[:, :C] + diag * v
    den = scale_f * pf[:, C:] + scale_b * pb[:, C:] + diag
    wkv = num / den

    att_out = matmul_bf16(sr * wkv, watt_ref[W_ATT_O])
    x = x + vec(GAMMA1) * att_out

    # ---------------- ffn branch (VRWKV_ChannelMix) ----------------
    xn2 = _layernorm(x, vec(LN2_W), vec(LN2_B))
    xs = q_shift(xn2)
    kf = matmul_bf16(xs, wfk_ref[...])               # (T, hidden)
    kf = jnp.square(jnp.maximum(kf, 0.0))
    kv = matmul_bf16(kf, wfv_ref[...])               # (T, C)
    rf = jax.nn.sigmoid(matmul_bf16(xs, wfr_ref[...]))
    x = x + vec(GAMMA2) * (rf * kv)

    o_ref[0] = x


def make_block_params(n_embd, n_layer, layer_id, hidden_rate=4, seed=0):
    C = n_embd
    hidden_sz = int(hidden_rate * n_embd)

    key = jax.random.PRNGKey(seed)
    ks = jax.random.split(key, 7)

    def lin(k, fan_in, shape):
        # deterministic stand-in for nn.Linear default init, stored as (in, out)
        bound = 1.0 / math.sqrt(fan_in)
        return jax.random.uniform(k, shape, jnp.float32, -bound, bound)

    w_att = jnp.stack([
        lin(ks[0], C, (C, C)),   # att key
        lin(ks[1], C, (C, C)),   # att value
        lin(ks[2], C, (C, C)),   # att receptance
        lin(ks[3], C, (C, C)),   # att output
    ])
    w_ffn_k = lin(ks[4], C, (C, hidden_sz))
    w_ffn_v = lin(ks[5], hidden_sz, (hidden_sz, C))
    w_ffn_r = lin(ks[6], C, (C, C))

    ratio_0_to_1 = layer_id / (n_layer - 1) if n_layer > 1 else 0.0
    ratio_1_to_almost0 = 1.0 - layer_id / n_layer

    h = np.arange(C, dtype=np.float64)
    decay = -5.0 + 8.0 * (h / (C - 1)) ** (0.7 + 1.3 * ratio_0_to_1)
    zigzag = ((np.arange(C) + 1) % 3 - 1).astype(np.float64) * 0.5
    first = np.ones(C) * math.log(0.3) + zigzag
    xi = np.arange(C, dtype=np.float64) / C
    mix_k = xi ** ratio_1_to_almost0
    mix_v = xi ** ratio_1_to_almost0 + 0.3 * ratio_0_to_1
    mix_r = xi ** (0.5 * ratio_1_to_almost0)

    ones, zeros = np.ones(C), np.zeros(C)
    vecs = jnp.asarray(np.stack([ones, zeros,        # ln1 w/b (torch default init)
                                 ones, zeros,        # ln2 w/b
                                 ones, ones,         # gamma1, gamma2
                                 decay, first,
                                 mix_k, mix_v, mix_r]), dtype=jnp.float32)
    return vecs, w_att, w_ffn_k, w_ffn_v, w_ffn_r


def vrwkv_block_forward(x_nchw, vecs, w_att, w_ffn_k, w_ffn_v, w_ffn_r,
                        shift_pixel=1, channel_gamma=0.25):
    B, C, H, W = x_nchw.shape
    T = H * W
    hidden = w_ffn_k.shape[1]
    x = jnp.transpose(x_nchw, (0, 2, 3, 1)).reshape(B, T, C)   # b c h w -> b (h w) c

    # bf16 weights for the MXU (f32 accumulation in-kernel); halves weight VMEM.
    watt_b = w_att.astype(jnp.bfloat16)
    wfk_b = w_ffn_k.astype(jnp.bfloat16)
    wfv_b = w_ffn_v.astype(jnp.bfloat16)
    wfr_b = w_ffn_r.astype(jnp.bfloat16)

    kern = functools.partial(block_kernel, H=H, W=W,
                             shift_pixel=shift_pixel, channel_gamma=channel_gamma)
    out = pl.pallas_call(
        kern,
        out_shape=jax.ShapeDtypeStruct((B, T, C), jnp.float32),
        grid_spec=pltpu.PrefetchScalarGridSpec(
            num_scalar_prefetch=0,
            grid=(B,),
            in_specs=[
                pl.BlockSpec((1, T, C), lambda b: (b, 0, 0)),      # x
                pl.BlockSpec((11, C), lambda b: (0, 0)),           # per-channel params
                pl.BlockSpec((4, C, C), lambda b: (0, 0, 0)),      # attention linears
                pl.BlockSpec((C, hidden), lambda b: (0, 0)),       # ffn key
                pl.BlockSpec((hidden, C), lambda b: (0, 0)),       # ffn value
                pl.BlockSpec((C, C), lambda b: (0, 0)),            # ffn receptance
            ],
            out_specs=pl.BlockSpec((1, T, C), lambda b: (b, 0, 0)),
            scratch_shapes=[
                # zero-padded token-axis halo buffer used by q_shift
                pltpu.VMEM((T + 2 * shift_pixel * W, C), jnp.float32),
            ],
        ),
        # no vmem_limit_bytes: per-step footprint is small; default scoped
        # limit is safe on v5e/v6e (128 MiB) and v7x (64 MiB) alike.
        compiler_params=pltpu.CompilerParams(
            dimension_semantics=("parallel",)),
    )(x, vecs, watt_b, wfk_b, wfv_b, wfr_b)
    return jnp.transpose(out.reshape(B, H, W, C), (0, 3, 1, 2))   # back to NCHW


def reference_forward(x_nchw, vecs, w_att, w_ffn_k, w_ffn_v, w_ffn_r,
                      shift_pixel=1, channel_gamma=0.25):
    """Pure-JAX reference mirroring the PyTorch Block semantics (dense O(T^2 C) WKV)."""
    B, C, H, W = x_nchw.shape
    T = H * W
    x = jnp.transpose(x_nchw, (0, 2, 3, 1)).reshape(B, T, C)
    vec = lambda i: vecs[i]

    def ln(z, wv, bv):
        mu = z.mean(-1, keepdims=True)
        var = ((z - mu) ** 2).mean(-1, keepdims=True)
        return (z - mu) * lax.rsqrt(var + 1e-5) * wv + bv

    def q_shift(z):
        z4 = jnp.transpose(z, (0, 2, 1)).reshape(B, C, H, W)
        out = jnp.zeros_like(z4)
        g = int(C * channel_gamma)
        s = shift_pixel
        out = out.at[:, 0:g, :, s:].set(z4[:, 0:g, :, :W - s])
        out = out.at[:, g:2 * g, :, :W - s].set(z4[:, g:2 * g, :, s:])
        out = out.at[:, 2 * g:3 * g, s:, :].set(z4[:, 2 * g:3 * g, :H - s, :])
        out = out.at[:, 3 * g:4 * g, :H - s, :].set(z4[:, 3 * g:4 * g, s:, :])
        out = out.at[:, 4 * g:].set(z4[:, 4 * g:])
        return jnp.transpose(out.reshape(B, C, T), (0, 2, 1))

    xn = ln(x, vec(LN1_W), vec(LN1_B))
    xx = q_shift(xn)
    mk, mv, mr = vec(MIX_K), vec(MIX_V), vec(MIX_R)
    xk = xn * mk + xx * (1 - mk)
    xv = xn * mv + xx * (1 - mv)
    xr = xn * mr + xx * (1 - mr)
    k = xk @ w_att[W_ATT_K]
    v = xv @ w_att[W_ATT_V]
    sr = jax.nn.sigmoid(xr @ w_att[W_ATT_R])

    w_dec = vec(SP_DECAY) / T
    u_first = vec(SP_FIRST) / T
    ti = jnp.arange(T)[:, None]
    ii = jnp.arange(T)[None, :]
    dist = jnp.abs(ti - ii).astype(jnp.float32)
    dec = -(dist - 1.0)[None, :, :, None] * w_dec
    dec = jnp.where((ti == ii)[None, :, :, None], u_first, dec)
    e = k[:, None, :, :] + dec
    m = e.max(axis=2, keepdims=True)
    p = jnp.exp(e - m)
    wkv = (p * v[:, None, :, :]).sum(2) / p.sum(2)
    x = x + vec(GAMMA1) * ((sr * wkv) @ w_att[W_ATT_O])

    xn2 = ln(x, vec(LN2_W), vec(LN2_B))
    xs = q_shift(xn2)
    kf = jnp.maximum(xs @ w_ffn_k, 0.0) ** 2
    kv = kf @ w_ffn_v
    rf = jax.nn.sigmoid(xs @ w_ffn_r)
    x = x + vec(GAMMA2) * (rf * kv)
    return jnp.transpose(x.reshape(B, H, W, C), (0, 3, 1, 2))


if __name__ == "__main__":
    # n_embd=128 (lane-dense), 8x8 patch grid, real VRWKV hidden_rate=4
    B, C, H, W = 2, 128, 8, 8
    n_layer, layer_id, hidden_rate = 4, 1, 4

    x = jax.random.normal(jax.random.PRNGKey(0), (B, C, H, W), jnp.float32)
    vecs, w_att, w_ffn_k, w_ffn_v, w_ffn_r = make_block_params(
        C, n_layer, layer_id, hidden_rate=hidden_rate)

    y = vrwkv_block_forward(x, vecs, w_att, w_ffn_k, w_ffn_v, w_ffn_r)
    y = jax.block_until_ready(y)

    y_ref = reference_forward(x, vecs, w_att, w_ffn_k, w_ffn_v, w_ffn_r)
    assert y.shape == x.shape and y.dtype == jnp.float32
    np.testing.assert_allclose(np.asarray(y), np.asarray(y_ref), rtol=5e-2, atol=5e-2)

    print("KERNEL_OK")
</pallas_src>

<mosaic_0001>
module attributes {stable_mosaic.version = 11 : i64} {
  func.func @block_kernel(%arg0: i32, %arg1: memref<1x64x128xf32, #tpu.memory_space<vmem>>, %arg2: memref<11x128xf32, #tpu.memory_space<vmem>>, %arg3: memref<4x128x128xbf16, #tpu.memory_space<vmem>>, %arg4: memref<128x512xbf16, #tpu.memory_space<vmem>>, %arg5: memref<512x128xbf16, #tpu.memory_space<vmem>>, %arg6: memref<128x128xbf16, #tpu.memory_space<vmem>>, %arg7: memref<1x64x128xf32, #tpu.memory_space<vmem>>, %arg8: memref<80x128xf32, #tpu.memory_space<vmem>>) attributes {dimension_semantics = [#tpu.dimension_semantics<parallel>], iteration_bounds = array<i64: 2>, scalar_prefetch = 0 : i64, scratch_operands = 1 : i64, tpu.core_type = #tpu.core_type<tc>, window_params = [{transform_indices = @transform_0, window_bounds = array<i64: 1, 64, 128>}, {pipeline_mode = #tpu.pipeline_mode<synchronous>, transform_indices = @transform_1, window_bounds = array<i64: 11, 128>}, {pipeline_mode = #tpu.pipeline_mode<synchronous>, transform_indices = @transform_2, window_bounds = array<i64: 4, 128, 128>}, {pipeline_mode = #tpu.pipeline_mode<synchronous>, transform_indices = @transform_3, window_bounds = array<i64: 128, 512>}, {pipeline_mode = #tpu.pipeline_mode<synchronous>, transform_indices = @transform_4, window_bounds = array<i64: 512, 128>}, {pipeline_mode = #tpu.pipeline_mode<synchronous>, transform_indices = @transform_5, window_bounds = array<i64: 128, 128>}, {transform_indices = @transform_6, window_bounds = array<i64: 1, 64, 128>}]} {
    %c0 = arith.constant 0 : index
    %c0_0 = arith.constant 0 : index
    %c0_1 = arith.constant 0 : index
    %0 = vector.load %arg1[%c0, %c0_0, %c0_1] : memref<1x64x128xf32, #tpu.memory_space<vmem>>, vector<1x64x128xf32>
    %1 = vector.shape_cast %0 : vector<1x64x128xf32> to vector<64x128xf32>
    %c0_2 = arith.constant 0 : index
    %c0_3 = arith.constant 0 : index
    %2 = vector.load %arg2[%c0_2, %c0_3] : memref<11x128xf32, #tpu.memory_space<vmem>>, vector<11x128xf32>
    %3 = tpu.iota {dimensions = array<i32: 1>} : vector<1x128xi32>
    %c32_i32 = arith.constant 32 : i32
    %4 = vector.broadcast %c32_i32 : i32 to vector<1x128xi32>
    %5 = arith.cmpi slt, %3, %4 : vector<1x128xi32>
    %6 = arith.extui %5 : vector<1x128xi1> to vector<1x128xi32>
    %7 = arith.sitofp %6 : vector<1x128xi32> to vector<1x128xf32>
    %c32_i32_4 = arith.constant 32 : i32
    %8 = vector.broadcast %c32_i32_4 : i32 to vector<1x128xi32>
    %9 = arith.cmpi sge, %3, %8 : vector<1x128xi32>
    %c64_i32 = arith.constant 64 : i32
    %10 = vector.broadcast %c64_i32 : i32 to vector<1x128xi32>
    %11 = arith.cmpi slt, %3, %10 : vector<1x128xi32>
    %12 = arith.andi %9, %11 : vector<1x128xi1>
    %13 = arith.extui %12 : vector<1x128xi1> to vector<1x128xi32>
    %14 = arith.sitofp %13 : vector<1x128xi32> to vector<1x128xf32>
    %c64_i32_5 = arith.constant 64 : i32
    %15 = vector.broadcast %c64_i32_5 : i32 to vector<1x128xi32>
    %16 = arith.cmpi sge, %3, %15 : vector<1x128xi32>
    %c96_i32 = arith.constant 96 : i32
    %17 = vector.broadcast %c96_i32 : i32 to vector<1x128xi32>
    %18 = arith.cmpi slt, %3, %17 : vector<1x128xi32>
    %19 = arith.andi %16, %18 : vector<1x128xi1>
    %20 = arith.extui %19 : vector<1x128xi1> to vector<1x128xi32>
    %21 = arith.sitofp %20 : vector<1x128xi32> to vector<1x128xf32>
    %c96_i32_6 = arith.constant 96 : i32
    %22 = vector.broadcast %c96_i32_6 : i32 to vector<1x128xi32>
    %23 = arith.cmpi sge, %3, %22 : vector<1x128xi32>
    %c128_i32 = arith.constant 128 : i32
    %24 = vector.broadcast %c128_i32 : i32 to vector<1x128xi32>
    %25 = arith.cmpi slt, %3, %24 : vector<1x128xi32>
    %26 = arith.andi %23, %25 : vector<1x128xi1>
    %27 = arith.extui %26 : vector<1x128xi1> to vector<1x128xi32>
    %28 = arith.sitofp %27 : vector<1x128xi32> to vector<1x128xf32>
    %c128_i32_7 = arith.constant 128 : i32
    %29 = vector.broadcast %c128_i32_7 : i32 to vector<1x128xi32>
    %30 = arith.cmpi sge, %3, %29 : vector<1x128xi32>
    %31 = arith.extui %30 : vector<1x128xi1> to vector<1x128xi32>
    %32 = arith.sitofp %31 : vector<1x128xi32> to vector<1x128xf32>
    %33 = tpu.iota {dimensions = array<i32: 0>} : vector<64x1xi32>
    %c8_i32 = arith.constant 8 : i32
    %c0_i32 = arith.constant 0 : i32
    %34 = arith.cmpi eq, %c8_i32, %c0_i32 : i32
    %c1_i32 = arith.constant 1 : i32
    %35 = arith.select %34, %c1_i32, %c8_i32 : i32
    %36 = vector.broadcast %35 : i32 to vector<64x1xi32>
    %37 = arith.remsi %33, %36 : vector<64x1xi32>
    %c0_i32_8 = arith.constant 0 : i32
    %38 = vector.broadcast %c0_i32_8 : i32 to vector<64x1xi32>
    %39 = arith.cmpi ne, %37, %38 : vector<64x1xi32>
    %c0_i32_9 = arith.constant 0 : i32
    %40 = vector.broadcast %c0_i32_9 : i32 to vector<64x1xi32>
    %41 = arith.cmpi slt, %37, %40 : vector<64x1xi32>
    %c0_i32_10 = arith.constant 0 : i32
    %42 = arith.cmpi slt, %35, %c0_i32_10 : i32
    %43 = vector.broadcast %42 : i1 to vector<64x1xi1>
    %44 = vector.broadcast %43 : vector<64x1xi1> to vector<64x1xi1>
    %45 = arith.xori %41, %44 : vector<64x1xi1>
    %46 = arith.andi %45, %39 : vector<64x1xi1>
    %47 = vector.broadcast %35 : i32 to vector<64x1xi32>
    %48 = arith.addi %37, %47 : vector<64x1xi32>
    %49 = arith.select %46, %48, %37 : vector<64x1xi1>, vector<64x1xi32>
    %c1_i32_11 = arith.constant 1 : i32
    %50 = vector.broadcast %c1_i32_11 : i32 to vector<64x1xi32>
    %51 = arith.cmpi sge, %49, %50 : vector<64x1xi32>
    %52 = arith.extui %51 : vector<64x1xi1> to vector<64x1xi32>
    %53 = arith.sitofp %52 : vector<64x1xi32> to vector<64x1xf32>
    %c7_i32 = arith.constant 7 : i32
    %54 = vector.broadcast %c7_i32 : i32 to vector<64x1xi32>
    %55 = arith.cmpi slt, %49, %54 : vector<64x1xi32>
    %56 = arith.extui %55 : vector<64x1xi1> to vector<64x1xi32>
    %57 = arith.sitofp %56 : vector<64x1xi32> to vector<64x1xf32>
    %cst = arith.constant 0.000000e+00 : f32
    %58 = vector.broadcast %cst : f32 to vector<80x128xf32>
    %c0_12 = arith.constant 0 : index
    %c0_13 = arith.constant 0 : index
    %59 = vector.load %arg8[%c0_12, %c0_13] : memref<80x128xf32, #tpu.memory_space<vmem>>, vector<80x128xf32>
    tpu.vector_store %arg8[%c0_12, %c0_13], %58 {strides = array<i32>} : memref<80x128xf32, #tpu.memory_space<vmem>>, vector<80x128xf32>,
    %60 = vector.extract_strided_slice %2 {offsets = [0, 0], sizes = [1, 128], strides = [1, 1]} : vector<11x128xf32> to vector<1x128xf32>
    %61 = vector.shape_cast %60 : vector<1x128xf32> to vector<128xf32>
    %62 = vector.shape_cast %61 : vector<128xf32> to vector<1x128xf32>
    %63 = vector.extract_strided_slice %2 {offsets = [1, 0], sizes = [1, 128], strides = [1, 1]} : vector<11x128xf32> to vector<1x128xf32>
    %64 = vector.shape_cast %63 : vector<1x128xf32> to vector<128xf32>
    %65 = vector.shape_cast %64 : vector<128xf32> to vector<1x128xf32>
    %cst_14 = arith.constant dense<0.000000e+00> : vector<64xf32>
    %66 = vector.multi_reduction <add>, %1, %cst_14 [1] : vector<64x128xf32> to vector<64xf32>
    %67 = vector.shape_cast %66 : vector<64xf32> to vector<64x1xf32>
    %cst_15 = arith.constant 1.280000e+02 : f32
    %68 = vector.broadcast %cst_15 : f32 to vector<64x1xf32>
    %69 = arith.divf %67, %68 : vector<64x1xf32>
    %70 = vector.broadcast %69 : vector<64x1xf32> to vector<64x128xf32>
    %71 = arith.subf %1, %70 : vector<64x128xf32>
    %72 = arith.mulf %71, %71 : vector<64x128xf32>
    %cst_16 = arith.constant dense<0.000000e+00> : vector<64xf32>
    %73 = vector.multi_reduction <add>, %72, %cst_16 [1] : vector<64x128xf32> to vector<64xf32>
    %74 = vector.shape_cast %73 : vector<64xf32> to vector<64x1xf32>
    %cst_17 = arith.constant 1.280000e+02 : f32
    %75 = vector.broadcast %cst_17 : f32 to vector<64x1xf32>
    %76 = arith.divf %74, %75 : vector<64x1xf32>
    %77 = vector.broadcast %69 : vector<64x1xf32> to vector<64x128xf32>
    %78 = arith.subf %1, %77 : vector<64x128xf32>
    %cst_18 = arith.constant 9.99999974E-6 : f32
    %79 = vector.broadcast %cst_18 : f32 to vector<64x1xf32>
    %80 = arith.addf %76, %79 : vector<64x1xf32>
    %81 = math.rsqrt %80 : vector<64x1xf32>
    %82 = vector.broadcast %81 : vector<64x1xf32> to vector<64x128xf32>
    %83 = arith.mulf %78, %82 : vector<64x128xf32>
    %84 = vector.broadcast %62 : vector<1x128xf32> to vector<64x128xf32>
    %85 = arith.mulf %83, %84 : vector<64x128xf32>
    %86 = vector.broadcast %65 : vector<1x128xf32> to vector<64x128xf32>
    %87 = arith.addf %85, %86 : vector<64x128xf32>
    %c8 = arith.constant 8 : index
    %c0_19 = arith.constant 0 : index
    %88 = vector.load %arg8[%c8, %c0_19] : memref<80x128xf32, #tpu.memory_space<vmem>>, vector<64x128xf32>
    tpu.vector_store %arg8[%c8, %c0_19], %87 {strides = array<i32>} : memref<80x128xf32, #tpu.memory_space<vmem>>, vector<64x128xf32>,
    %c7 = arith.constant 7 : index
    %c0_20 = arith.constant 0 : index
    %89 = vector.load %arg8[%c7, %c0_20] : memref<80x128xf32, #tpu.memory_space<vmem>>, vector<64x128xf32>
    %c9 = arith.constant 9 : index
    %c0_21 = arith.constant 0 : index
    %90 = vector.load %arg8[%c9, %c0_21] : memref<80x128xf32, #tpu.memory_space<vmem>>, vector<64x128xf32>
    %c0_22 = arith.constant 0 : index
    %c0_23 = arith.constant 0 : index
    %91 = vector.load %arg8[%c0_22, %c0_23] : memref<80x128xf32, #tpu.memory_space<vmem>>, vector<64x128xf32>
    %c16 = arith.constant 16 : index
    %c0_24 = arith.constant 0 : index
    %92 = vector.load %arg8[%c16, %c0_24] : memref<80x128xf32, #tpu.memory_space<vmem>>, vector<64x128xf32>
    %93 = vector.broadcast %53 : vector<64x1xf32> to vector<64x128xf32>
    %94 = arith.mulf %93, %89 : vector<64x128xf32>
    %95 = vector.broadcast %7 : vector<1x128xf32> to vector<64x128xf32>
    %96 = arith.mulf %95, %94 : vector<64x128xf32>
    %97 = vector.broadcast %57 : vector<64x1xf32> to vector<64x128xf32>
    %98 = arith.mulf %97, %90 : vector<64x128xf32>
    %99 = vector.broadcast %14 : vector<1x128xf32> to vector<64x128xf32>
    %100 = arith.mulf %99, %98 : vector<64x128xf32>
    %101 = arith.addf %96, %100 : vector<64x128xf32>
    %102 = vector.broadcast %21 : vector<1x128xf32> to vector<64x128xf32>
    %103 = arith.mulf %102, %91 : vector<64x128xf32>
    %104 = arith.addf %101, %103 : vector<64x128xf32>
    %105 = vector.broadcast %28 : vector<1x128xf32> to vector<64x128xf32>
    %106 = arith.mulf %105, %92 : vector<64x128xf32>
    %107 = arith.addf %104, %106 : vector<64x128xf32>
    %108 = vector.broadcast %32 : vector<1x128xf32> to vector<64x128xf32>
    %109 = arith.mulf %108, %87 : vector<64x128xf32>
    %110 = arith.addf %107, %109 : vector<64x128xf32>
    %111 = vector.extract_strided_slice %2 {offsets = [8, 0], sizes = [1, 128], strides = [1, 1]} : vector<11x128xf32> to vector<1x128xf32>
    %112 = vector.shape_cast %111 : vector<1x128xf32> to vector<128xf32>
    %113 = vector.shape_cast %112 : vector<128xf32> to vector<1x128xf32>
    %114 = vector.extract_strided_slice %2 {offsets = [9, 0], sizes = [1, 128], strides = [1, 1]} : vector<11x128xf32> to vector<1x128xf32>
    %115 = vector.shape_cast %114 : vector<1x128xf32> to vector<128xf32>
    %116 = vector.shape_cast %115 : vector<128xf32> to vector<1x128xf32>
    %117 = vector.extract_strided_slice %2 {offsets = [10, 0], sizes = [1, 128], strides = [1, 1]} : vector<11x128xf32> to vector<1x128xf32>
    %118 = vector.shape_cast %117 : vector<1x128xf32> to vector<128xf32>
    %119 = vector.shape_cast %118 : vector<128xf32> to vector<1x128xf32>
    %120 = vector.broadcast %113 : vector<1x128xf32> to vector<64x128xf32>
    %121 = arith.mulf %87, %120 : vector<64x128xf32>
    %cst_25 = arith.constant 1.000000e+00 : f32
    %122 = vector.broadcast %cst_25 : f32 to vector<1x128xf32>
    %123 = arith.subf %122, %113 : vector<1x128xf32>
    %124 = vector.broadcast %123 : vector<1x128xf32> to vector<64x128xf32>
    %125 = arith.mulf %110, %124 : vector<64x128xf32>
    %126 = arith.addf %121, %125 : vector<64x128xf32>
    %127 = vector.broadcast %116 : vector<1x128xf32> to vector<64x128xf32>
    %128 = arith.mulf %87, %127 : vector<64x128xf32>
    %cst_26 = arith.constant 1.000000e+00 : f32
    %129 = vector.broadcast %cst_26 : f32 to vector<1x128xf32>
    %130 = arith.subf %129, %116 : vector<1x128xf32>
    %131 = vector.broadcast %130 : vector<1x128xf32> to vector<64x128xf32>
    %132 = arith.mulf %110, %131 : vector<64x128xf32>
    %133 = arith.addf %128, %132 : vector<64x128xf32>
    %134 = vector.broadcast %119 : vector<1x128xf32> to vector<64x128xf32>
    %135 = arith.mulf %87, %134 : vector<64x128xf32>
    %cst_27 = arith.constant 1.000000e+00 : f32
    %136 = vector.broadcast %cst_27 : f32 to vector<1x128xf32>
    %137 = arith.subf %136, %119 : vector<1x128xf32>
    %138 = vector.broadcast %137 : vector<1x128xf32> to vector<64x128xf32>
    %139 = arith.mulf %110, %138 : vector<64x128xf32>
    %140 = arith.addf %135, %139 : vector<64x128xf32>
    %c0_28 = arith.constant 0 : index
    %c0_29 = arith.constant 0 : index
    %c0_30 = arith.constant 0 : index
    %141 = vector.load %arg3[%c0_28, %c0_29, %c0_30] : memref<4x128x128xbf16, #tpu.memory_space<vmem>>, vector<1x128x128xbf16>
    %142 = vector.shape_cast %141 : vector<1x128x128xbf16> to vector<128x128xbf16>
    %143 = arith.truncf %126 : vector<64x128xf32> to vector<64x128xbf16>
    %cst_31 = arith.constant dense<0.000000e+00> : vector<64x128xf32>
    %144 = tpu.matmul %143, %142, %cst_31 {dimension_numbers = #tpu.dot_dimension_numbers<[1], [0], [0], [1], [0, 0, 1, 1], [], []>} : vector<64x128xbf16>, vector<128x128xbf16>, vector<64x128xf32> -> vector<64x128xf32>
    %c1 = arith.constant 1 : index
    %c0_32 = arith.constant 0 : index
    %c0_33 = arith.constant 0 : index
    %145 = vector.load %arg3[%c1, %c0_32, %c0_33] : memref<4x128x128xbf16, #tpu.memory_space<vmem>>, vector<1x128x128xbf16>
    %146 = vector.shape_cast %145 : vector<1x128x128xbf16> to vector<128x128xbf16>
    %147 = arith.truncf %133 : vector<64x128xf32> to vector<64x128xbf16>
    %cst_34 = arith.constant dense<0.000000e+00> : vector<64x128xf32>
    %148 = tpu.matmul %147, %146, %cst_34 {dimension_numbers = #tpu.dot_dimension_numbers<[1], [0], [0], [1], [0, 0, 1, 1], [], []>} : vector<64x128xbf16>, vector<128x128xbf16>, vector<64x128xf32> -> vector<64x128xf32>
    %c2 = arith.constant 2 : index
    %c0_35 = arith.constant 0 : index
    %c0_36 = arith.constant 0 : index
    %149 = vector.load %arg3[%c2, %c0_35, %c0_36] : memref<4x128x128xbf16, #tpu.memory_space<vmem>>, vector<1x128x128xbf16>
    %150 = vector.shape_cast %149 : vector<1x128x128xbf16> to vector<128x128xbf16>
    %151 = arith.truncf %140 : vector<64x128xf32> to vector<64x128xbf16>
    %cst_37 = arith.constant dense<0.000000e+00> : vector<64x128xf32>
    %152 = tpu.matmul %151, %150, %cst_37 {dimension_numbers = #tpu.dot_dimension_numbers<[1], [0], [0], [1], [0, 0, 1, 1], [], []>} : vector<64x128xbf16>, vector<128x128xbf16>, vector<64x128xf32> -> vector<64x128xf32>
    %153 = arith.negf %152 : vector<64x128xf32>
    %154 = math.exp %153 : vector<64x128xf32>
    %cst_38 = arith.constant 1.000000e+00 : f32
    %155 = vector.broadcast %cst_38 : f32 to vector<64x128xf32>
    %156 = arith.addf %155, %154 : vector<64x128xf32>
    %157 = arith.divf %155, %156 : vector<64x128xf32>
    %158 = vector.extract_strided_slice %2 {offsets = [6, 0], sizes = [1, 128], strides = [1, 1]} : vector<11x128xf32> to vector<1x128xf32>
    %159 = vector.shape_cast %158 : vector<1x128xf32> to vector<128xf32>
    %cst_39 = arith.constant 6.400000e+01 : f32
    %160 = vector.broadcast %cst_39 : f32 to vector<128xf32>
    %161 = arith.divf %159, %160 : vector<128xf32>
    %162 = vector.shape_cast %161 : vector<128xf32> to vector<1x128xf32>
    %163 = vector.extract_strided_slice %2 {offsets = [7, 0], sizes = [1, 128], strides = [1, 1]} : vector<11x128xf32> to vector<1x128xf32>
    %164 = vector.shape_cast %163 : vector<1x128xf32> to vector<128xf32>
    %cst_40 = arith.constant 6.400000e+01 : f32
    %165 = vector.broadcast %cst_40 : f32 to vector<128xf32>
    %166 = arith.divf %164, %165 : vector<128xf32>
    %167 = vector.shape_cast %166 : vector<128xf32> to vector<1x128xf32>
    %cst_41 = arith.constant dense<0xFF800000> : vector<128xf32>
    %168 = vector.multi_reduction <maximumf>, %144, %cst_41 [0] : vector<64x128xf32> to vector<128xf32>
    %169 = vector.shape_cast %168 : vector<128xf32> to vector<1x128xf32>
    %170 = vector.broadcast %169 : vector<1x128xf32> to vector<64x128xf32>
    %171 = arith.subf %144, %170 : vector<64x128xf32>
    %172 = tpu.iota {dimensions = array<i32: 0>} : vector<64x1xi32>
    %173 = arith.sitofp %172 : vector<64x1xi32> to vector<64x1xf32>
    %174 = vector.broadcast %173 : vector<64x1xf32> to vector<64x128xf32>
    %175 = vector.broadcast %162 : vector<1x128xf32> to vector<64x128xf32>
    %176 = arith.mulf %174, %175 : vector<64x128xf32>
    %177 = arith.addf %176, %171 : vector<64x128xf32>
    %178 = math.exp %177 : vector<64x128xf32>
    %cst_42 = arith.constant 0.000000e+00 : f32
    %179 = vector.broadcast %cst_42 : f32 to vector<64x128xf32>
    %180 = arith.subf %179, %176 : vector<64x128xf32>
    %181 = arith.addf %180, %171 : vector<64x128xf32>
    %182 = math.exp %181 : vector<64x128xf32>
    %183 = tpu.iota {dimensions = array<i32: 0>} : vector<64x64xi32>
    %184 = tpu.iota {dimensions = array<i32: 1>} : vector<64x64xi32>
    %185 = arith.cmpi slt, %184, %183 : vector<64x64xi32>
    %186 = arith.extui %185 : vector<64x64xi1> to vector<64x64xi32>
    %187 = arith.sitofp %186 : vector<64x64xi32> to vector<64x64xf32>
    %188 = arith.cmpi sgt, %184, %183 : vector<64x64xi32>
    %189 = arith.extui %188 : vector<64x64xi1> to vector<64x64xi32>
    %190 = arith.sitofp %189 : vector<64x64xi32> to vector<64x64xf32>
    %191 = arith.mulf %178, %148 : vector<64x128xf32>
    %192 = tpu.concatenate %191, %178 in 1 : vector<64x128xf32>, vector<64x128xf32> -> vector<64x256xf32>
    %193 = arith.mulf %182, %148 : vector<64x128xf32>
    %194 = tpu.concatenate %193, %182 in 1 : vector<64x128xf32>, vector<64x128xf32> -> vector<64x256xf32>
    %cst_43 = arith.constant dense<0.000000e+00> : vector<64x256xf32>
    %195 = tpu.matmul %187, %192, %cst_43 {dimension_numbers = #tpu.dot_dimension_numbers<[1], [0], [0], [1], [0, 0, 1, 1], [], []>} : vector<64x64xf32>, vector<64x256xf32>, vector<64x256xf32> -> vector<64x256xf32>
    %cst_44 = arith.constant dense<0.000000e+00> : vector<64x256xf32>
    %196 = tpu.matmul %190, %194, %cst_44 {dimension_numbers = #tpu.dot_dimension_numbers<[1], [0], [0], [1], [0, 0, 1, 1], [], []>} : vector<64x64xf32>, vector<64x256xf32>, vector<64x256xf32> -> vector<64x256xf32>
    %cst_45 = arith.constant 1.000000e+00 : f32
    %197 = vector.broadcast %cst_45 : f32 to vector<64x1xf32>
    %198 = arith.subf %173, %197 : vector<64x1xf32>
    %cst_46 = arith.constant 0.000000e+00 : f32
    %199 = vector.broadcast %cst_46 : f32 to vector<64x1xf32>
    %200 = arith.subf %199, %198 : vector<64x1xf32>
    %201 = vector.broadcast %200 : vector<64x1xf32> to vector<64x128xf32>
    %202 = vector.broadcast %162 : vector<1x128xf32> to vector<64x128xf32>
    %203 = arith.mulf %201, %202 : vector<64x128xf32>
    %204 = math.exp %203 : vector<64x128xf32>
    %cst_47 = arith.constant 1.000000e+00 : f32
    %205 = vector.broadcast %cst_47 : f32 to vector<64x1xf32>
    %206 = arith.addf %173, %205 : vector<64x1xf32>
    %207 = vector.broadcast %206 : vector<64x1xf32> to vector<64x128xf32>
    %208 = vector.broadcast %162 : vector<1x128xf32> to vector<64x128xf32>
    %209 = arith.mulf %207, %208 : vector<64x128xf32>
    %210 = math.exp %209 : vector<64x128xf32>
    %211 = vector.broadcast %167 : vector<1x128xf32> to vector<64x128xf32>
    %212 = arith.addf %211, %171 : vector<64x128xf32>
    %213 = math.exp %212 : vector<64x128xf32>
    %214 = vector.extract_strided_slice %195 {offsets = [0, 0], sizes = [64, 128], strides = [1, 1]} : vector<64x256xf32> to vector<64x128xf32>
    %215 = arith.mulf %204, %214 : vector<64x128xf32>
    %216 = vector.extract_strided_slice %196 {offsets = [0, 0], sizes = [64, 128], strides = [1, 1]} : vector<64x256xf32> to vector<64x128xf32>
    %217 = arith.mulf %210, %216 : vector<64x128xf32>
    %218 = arith.addf %215, %217 : vector<64x128xf32>
    %219 = arith.mulf %213, %148 : vector<64x128xf32>
    %220 = arith.addf %218, %219 : vector<64x128xf32>
    %221 = vector.extract_strided_slice %195 {offsets = [0, 128], sizes = [64, 128], strides = [1, 1]} : vector<64x256xf32> to vector<64x128xf32>
    %222 = arith.mulf %204, %221 : vector<64x128xf32>
    %223 = vector.extract_strided_slice %196 {offsets = [0, 128], sizes = [64, 128], strides = [1, 1]} : vector<64x256xf32> to vector<64x128xf32>
    %224 = arith.mulf %210, %223 : vector<64x128xf32>
    %225 = arith.addf %222, %224 : vector<64x128xf32>
    %226 = arith.addf %225, %213 : vector<64x128xf32>
    %227 = arith.divf %220, %226 : vector<64x128xf32>
    %228 = arith.mulf %157, %227 : vector<64x128xf32>
    %c3 = arith.constant 3 : index
    %c0_48 = arith.constant 0 : index
    %c0_49 = arith.constant 0 : index
    %229 = vector.load %arg3[%c3, %c0_48, %c0_49] : memref<4x128x128xbf16, #tpu.memory_space<vmem>>, vector<1x128x128xbf16>
    %230 = vector.shape_cast %229 : vector<1x128x128xbf16> to vector<128x128xbf16>
    %231 = arith.truncf %228 : vector<64x128xf32> to vector<64x128xbf16>
    %cst_50 = arith.constant dense<0.000000e+00> : vector<64x128xf32>
    %232 = tpu.matmul %231, %230, %cst_50 {dimension_numbers = #tpu.dot_dimension_numbers<[1], [0], [0], [1], [0, 0, 1, 1], [], []>} : vector<64x128xbf16>, vector<128x128xbf16>, vector<64x128xf32> -> vector<64x128xf32>
    %233 = vector.extract_strided_slice %2 {offsets = [4, 0], sizes = [1, 128], strides = [1, 1]} : vector<11x128xf32> to vector<1x128xf32>
    %234 = vector.shape_cast %233 : vector<1x128xf32> to vector<128xf32>
    %235 = vector.shape_cast %234 : vector<128xf32> to vector<1x128xf32>
    %236 = vector.broadcast %235 : vector<1x128xf32> to vector<64x128xf32>
    %237 = arith.mulf %236, %232 : vector<64x128xf32>
    %238 = arith.addf %1, %237 : vector<64x128xf32>
    %239 = vector.extract_strided_slice %2 {offsets = [2, 0], sizes = [1, 128], strides = [1, 1]} : vector<11x128xf32> to vector<1x128xf32>
    %240 = vector.shape_cast %239 : vector<1x128xf32> to vector<128xf32>
    %241 = vector.shape_cast %240 : vector<128xf32> to vector<1x128xf32>
    %242 = vector.extract_strided_slice %2 {offsets = [3, 0], sizes = [1, 128], strides = [1, 1]} : vector<11x128xf32> to vector<1x128xf32>
    %243 = vector.shape_cast %242 : vector<1x128xf32> to vector<128xf32>
    %244 = vector.shape_cast %243 : vector<128xf32> to vector<1x128xf32>
    %cst_51 = arith.constant dense<0.000000e+00> : vector<64xf32>
    %245 = vector.multi_reduction <add>, %238, %cst_51 [1] : vector<64x128xf32> to vector<64xf32>
    %246 = vector.shape_cast %245 : vector<64xf32> to vector<64x1xf32>
    %cst_52 = arith.constant 1.280000e+02 : f32
    %247 = vector.broadcast %cst_52 : f32 to vector<64x1xf32>
    %248 = arith.divf %246, %247 : vector<64x1xf32>
    %249 = vector.broadcast %248 : vector<64x1xf32> to vector<64x128xf32>
    %250 = arith.subf %238, %249 : vector<64x128xf32>
    %251 = arith.mulf %250, %250 : vector<64x128xf32>
    %cst_53 = arith.constant dense<0.000000e+00> : vector<64xf32>
    %252 = vector.multi_reduction <add>, %251, %cst_53 [1] : vector<64x128xf32> to vector<64xf32>
    %253 = vector.shape_cast %252 : vector<64xf32> to vector<64x1xf32>
    %cst_54 = arith.constant 1.280000e+02 : f32
    %254 = vector.broadcast %cst_54 : f32 to vector<64x1xf32>
    %255 = arith.divf %253, %254 : vector<64x1xf32>
    %256 = vector.broadcast %248 : vector<64x1xf32> to vector<64x128xf32>
    %257 = arith.subf %238, %256 : vector<64x128xf32>
    %cst_55 = arith.constant 9.99999974E-6 : f32
    %258 = vector.broadcast %cst_55 : f32 to vector<64x1xf32>
    %259 = arith.addf %255, %258 : vector<64x1xf32>
    %260 = math.rsqrt %259 : vector<64x1xf32>
    %261 = vector.broadcast %260 : vector<64x1xf32> to vector<64x128xf32>
    %262 = arith.mulf %257, %261 : vector<64x128xf32>
    %263 = vector.broadcast %241 : vector<1x128xf32> to vector<64x128xf32>
    %264 = arith.mulf %262, %263 : vector<64x128xf32>
    %265 = vector.broadcast %244 : vector<1x128xf32> to vector<64x128xf32>
    %266 = arith.addf %264, %265 : vector<64x128xf32>
    %c8_56 = arith.constant 8 : index
    %c0_57 = arith.constant 0 : index
    %267 = vector.load %arg8[%c8_56, %c0_57] : memref<80x128xf32, #tpu.memory_space<vmem>>, vector<64x128xf32>
    tpu.vector_store %arg8[%c8_56, %c0_57], %266 {strides = array<i32>} : memref<80x128xf32, #tpu.memory_space<vmem>>, vector<64x128xf32>,
    %c7_58 = arith.constant 7 : index
    %c0_59 = arith.constant 0 : index
    %268 = vector.load %arg8[%c7_58, %c0_59] : memref<80x128xf32, #tpu.memory_space<vmem>>, vector<64x128xf32>
    %c9_60 = arith.constant 9 : index
    %c0_61 = arith.constant 0 : index
    %269 = vector.load %arg8[%c9_60, %c0_61] : memref<80x128xf32, #tpu.memory_space<vmem>>, vector<64x128xf32>
    %c0_62 = arith.constant 0 : index
    %c0_63 = arith.constant 0 : index
    %270 = vector.load %arg8[%c0_62, %c0_63] : memref<80x128xf32, #tpu.memory_space<vmem>>, vector<64x128xf32>
    %c16_64 = arith.constant 16 : index
    %c0_65 = arith.constant 0 : index
    %271 = vector.load %arg8[%c16_64, %c0_65] : memref<80x128xf32, #tpu.memory_space<vmem>>, vector<64x128xf32>
    %272 = vector.broadcast %53 : vector<64x1xf32> to vector<64x128xf32>
    %273 = arith.mulf %272, %268 : vector<64x128xf32>
    %274 = vector.broadcast %7 : vector<1x128xf32> to vector<64x128xf32>
    %275 = arith.mulf %274, %273 : vector<64x128xf32>
    %276 = vector.broadcast %57 : vector<64x1xf32> to vector<64x128xf32>
    %277 = arith.mulf %276, %269 : vector<64x128xf32>
    %278 = vector.broadcast %14 : vector<1x128xf32> to vector<64x128xf32>
    %279 = arith.mulf %278, %277 : vector<64x128xf32>
    %280 = arith.addf %275, %279 : vector<64x128xf32>
    %281 = vector.broadcast %21 : vector<1x128xf32> to vector<64x128xf32>
    %282 = arith.mulf %281, %270 : vector<64x128xf32>
    %283 = arith.addf %280, %282 : vector<64x128xf32>
    %284 = vector.broadcast %28 : vector<1x128xf32> to vector<64x128xf32>
    %285 = arith.mulf %284, %271 : vector<64x128xf32>
    %286 = arith.addf %283, %285 : vector<64x128xf32>
    %287 = vector.broadcast %32 : vector<1x128xf32> to vector<64x128xf32>
    %288 = arith.mulf %287, %266 : vector<64x128xf32>
    %289 = arith.addf %286, %288 : vector<64x128xf32>
    %c0_66 = arith.constant 0 : index
    %c0_67 = arith.constant 0 : index
    %290 = vector.load %arg4[%c0_66, %c0_67] : memref<128x512xbf16, #tpu.memory_space<vmem>>, vector<128x512xbf16>
    %291 = arith.truncf %289 : vector<64x128xf32> to vector<64x128xbf16>
    %cst_68 = arith.constant dense<0.000000e+00> : vector<64x512xf32>
    %292 = tpu.matmul %291, %290, %cst_68 {dimension_numbers = #tpu.dot_dimension_numbers<[1], [0], [0], [1], [0, 0, 1, 1], [], []>} : vector<64x128xbf16>, vector<128x512xbf16>, vector<64x512xf32> -> vector<64x512xf32>
    %cst_69 = arith.constant 0.000000e+00 : f32
    %293 = vector.broadcast %cst_69 : f32 to vector<64x512xf32>
    %294 = arith.maximumf %292, %293 : vector<64x512xf32>
    %295 = arith.mulf %294, %294 : vector<64x512xf32>
    %c0_70 = arith.constant 0 : index
    %c0_71 = arith.constant 0 : index
    %296 = vector.load %arg5[%c0_70, %c0_71] : memref<512x128xbf16, #tpu.memory_space<vmem>>, vector<512x128xbf16>
    %297 = arith.truncf %295 : vector<64x512xf32> to vector<64x512xbf16>
    %cst_72 = arith.constant dense<0.000000e+00> : vector<64x128xf32>
    %298 = tpu.matmul %297, %296, %cst_72 {dimension_numbers = #tpu.dot_dimension_numbers<[1], [0], [0], [1], [0, 0, 1, 1], [], []>} : vector<64x512xbf16>, vector<512x128xbf16>, vector<64x128xf32> -> vector<64x128xf32>
    %c0_73 = arith.constant 0 : index
    %c0_74 = arith.constant 0 : index
    %299 = vector.load %arg6[%c0_73, %c0_74] : memref<128x128xbf16, #tpu.memory_space<vmem>>, vector<128x128xbf16>
    %300 = arith.truncf %289 : vector<64x128xf32> to vector<64x128xbf16>
    %cst_75 = arith.constant dense<0.000000e+00> : vector<64x128xf32>
    %301 = tpu.matmul %300, %299, %cst_75 {dimension_numbers = #tpu.dot_dimension_numbers<[1], [0], [0], [1], [0, 0, 1, 1], [], []>} : vector<64x128xbf16>, vector<128x128xbf16>, vector<64x128xf32> -> vector<64x128xf32>
    %302 = arith.negf %301 : vector<64x128xf32>
    %303 = math.exp %302 : vector<64x128xf32>
    %cst_76 = arith.constant 1.000000e+00 : f32
    %304 = vector.broadcast %cst_76 : f32 to vector<64x128xf32>
    %305 = arith.addf %304, %303 : vector<64x128xf32>
    %306 = arith.divf %304, %305 : vector<64x128xf32>
    %307 = vector.extract_strided_slice %2 {offsets = [5, 0], sizes = [1, 128], strides = [1, 1]} : vector<11x128xf32> to vector<1x128xf32>
    %308 = vector.shape_cast %307 : vector<1x128xf32> to vector<128xf32>
    %309 = vector.shape_cast %308 : vector<128xf32> to vector<1x128xf32>
    %310 = arith.mulf %306, %298 : vector<64x128xf32>
    %311 = vector.broadcast %309 : vector<1x128xf32> to vector<64x128xf32>
    %312 = arith.mulf %311, %310 : vector<64x128xf32>
    %313 = arith.addf %238, %312 : vector<64x128xf32>
    %c0_77 = arith.constant 0 : index
    %c0_78 = arith.constant 0 : index
    %c0_79 = arith.constant 0 : index
    %314 = vector.load %arg7[%c0_77, %c0_78, %c0_79] : memref<1x64x128xf32, #tpu.memory_space<vmem>>, vector<1x64x128xf32>
    %315 = vector.shape_cast %314 : vector<1x64x128xf32> to vector<64x128xf32>
    %316 = vector.shape_cast %313 : vector<64x128xf32> to vector<1x64x128xf32>
    tpu.vector_store %arg7[%c0_77, %c0_78, %c0_79], %316 {strides = array<i32>} : memref<1x64x128xf32, #tpu.memory_space<vmem>>, vector<1x64x128xf32>,
    return
  }
  func.func @transform_0(%arg0: i32) -> (i32, i32, i32) {
    %c0_i32 = arith.constant 0 : i32
    %c0_i32_0 = arith.constant 0 : i32
    %c0_i32_1 = arith.constant 0 : i32
    return %arg0, %c0_i32, %c0_i32_0 : i32, i32, i32
  }
  func.func @transform_1(%arg0: i32) -> (i32, i32) {
    %c0_i32 = arith.constant 0 : i32
    %c0_i32_0 = arith.constant 0 : i32
    %c0_i32_1 = arith.constant 0 : i32
    return %c0_i32, %c0_i32_0 : i32, i32
  }
  func.func @transform_2(%arg0: i32) -> (i32, i32, i32) {
    %c0_i32 = arith.constant 0 : i32
    %c0_i32_0 = arith.constant 0 : i32
    %c0_i32_1 = arith.constant 0 : i32
    %c0_i32_2 = arith.constant 0 : i32
    return %c0_i32, %c0_i32_0, %c0_i32_1 : i32, i32, i32
  }
  func.func @transform_3(%arg0: i32) -> (i32, i32) {
    %c0_i32 = arith.constant 0 : i32
    %c0_i32_0 = arith.constant 0 : i32
    %c0_i32_1 = arith.constant 0 : i32
    return %c0_i32, %c0_i32_0 : i32, i32
  }
  func.func @transform_4(%arg0: i32) -> (i32, i32) {
    %c0_i32 = arith.constant 0 : i32
    %c0_i32_0 = arith.constant 0 : i32
    %c0_i32_1 = arith.constant 0 : i32
    return %c0_i32, %c0_i32_0 : i32, i32
  }
  func.func @transform_5(%arg0: i32) -> (i32, i32) {
    %c0_i32 = arith.constant 0 : i32
    %c0_i32_0 = arith.constant 0 : i32
    %c0_i32_1 = arith.constant 0 : i32
    return %c0_i32, %c0_i32_0 : i32, i32
  }
  func.func @transform_6(%arg0: i32) -> (i32, i32, i32) {
    %c0_i32 = arith.constant 0 : i32
    %c0_i32_0 = arith.constant 0 : i32
    %c0_i32_1 = arith.constant 0 : i32
    return %arg0, %c0_i32, %c0_i32_0 : i32, i32, i32
  }
}

</mosaic_0001>

<bundles_post_ra>
// kernel: tpu_custom_call.1
= control target key start
LH: loop header
LB: loop body
LE: loop exit
PB: predicated region body
PF: predicated region fallthrough
CT: control target
= control target key end

     0   :  { %11 = vsyncpa [#allocation4], 0  ;;  %s6267_s0 = inlined_call_operand.hbm [shape: f32[2,64,128], index: 0, kind: input, shape index: {}]   ;;  %s6268_s1 = inlined_call_operand.hbm [shape: f32[11,128], index: 1, kind: input, shape index: {}]   ;;  %s6269_s2 = inlined_call_operand.hbm [shape: bf16[4,128,128], index: 2, kind: input, shape index: {}]   ;;  %s6270_s3 = inlined_call_operand.hbm [shape: bf16[128,512], index: 3, kind: input, shape index: {}]   ;;  %s6271_s4 = inlined_call_operand.hbm [shape: bf16[512,128], index: 4, kind: input, shape index: {}]   ;;  %s6272_s5 = inlined_call_operand.hbm [shape: bf16[128,128], index: 5, kind: input, shape index: {}]   ;;  %s6273_s6 = inlined_call_operand.hbm [shape: f32[2,64,128], index: 6, kind: output, shape index: {}]  }
   0x1   :  { %13 = vsyncpa [#allocation4 + $0x1], 0 }
   0x2   :  { %14 = vsyncpa [#allocation7], 0 }
   0x3   :  { %15 = vsyncpa [#allocation10], 0 }
   0x4   :  { %16 = vsyncpa [#allocation13], 0 }
   0x5   :  { %17 = vsyncpa [#allocation5], 0 }
   0x6   :  { %19 = vsyncpa [#allocation5 + $0x1], 0  ;;  %s4758_s21 = smov 0   ;;  %s4760_s22 = smov 0  }
   0x7   :  { %s4762_s23 = smov 0   ;;  %s4764_s24 = smov 0  }
   0x8 LB: > { %s4706_s25 = smov [#allocation6]   ;;  %s4779_s27 = sadd.s32 4294967295, %s4704_s24   ;;  %s4704_s24 = sphi %s4764_s24, %s6485_s24   ;;  %s4700_s23 = sphi %s4762_s23, %s6484_s23   ;;  %s4696_s22 = sphi %s4760_s22, %s6483_s22   ;;  %s4692_s21 = sphi %s4758_s21, %s6482_s21  }
   0x9   : > { %s199_s26 = sshll.u32 %s4706_s25, 4  ;;  %p3512_p0 = scmp.ge.s32.totalorder %s4704_s24, 1  ;;  %s4784_s26 = int_to_ptr.vmem [resolvable:$true] %s199_s26 }
   0xa   : > { %p6274_p1 = scmp.eq.s32.totalorder %s4779_s27, 0  ;;  %p187_p2 = scmp.lt.s32.totalorder %s4704_s24, 3 }
   0xb   : > { %s4707_s29 = smov [#allocation9]   ;;  %s4708_s8 = smov [#allocation8]  }
   0xc   : > { %p4786_p3 = pnand %p3512_p0, %p187_p2  ;;  %s225_s30 = sshll.u32 %s4707_s29, 4  ;;  %s4799_s30 = int_to_ptr.vmem [resolvable:$true] %s225_s30 }
   0xd   : > { %s4801_s9 = sshll.u32 %s4708_s8, 4  ;;  %s4456_s12 = scalar_lea.hbm %s6268_s1, 256  ;;  %s213_s9 = int_to_ptr.vmem [resolvable:$true] %s4801_s9 }
   0xe   : > { %s6340_s28 = scalar_select %p4786_p3, 1, 0 }
   0xf   : > { %p4049_p5 = pneg %p4786_p3  ;;  %p4457_p7 = scmp.ne.s32.totalorder %s6268_s1, %s4456_s12 }
  0x10   : > { %p4463_p11 = scmp.lt.u32.totalorder %s4456_s12, %s6268_s1 }
  0x11   : > { %p4795_p6 = pnand %p4049_p5, %p6274_p1 }
  0x13   : > { %p4811_p8 = pneg %p4795_p6 }
  0x15   : > { %p4459_p9 = pnand %p4811_p8, %p4457_p7 }
  0x17   : > { %p4460_p10 = pneg %p4459_p9 }
  0x19   : > { %p4465_p12 = pnand %p4463_p11, %p4460_p10 }
  0x1b   : > { %4468 = shalt.err (!%p4465_p12)
}
  0x1c   : > { %s4469_s18 = scalar_lea.vmem %s4784_s26, 256  ;;  %p4477_p5 = scmp.lt.s32.totalorder %s4784_s26, %s4784_s26 }
  0x1d   : > { %p4470_p13 = scmp.ne.s32.totalorder %s4784_s26, %s4469_s18  ;;  %p4478_p4 = scmp.lt.s32.totalorder %s4469_s18, %s4469_s18 }
  0x1f   : > { %p4472_p0 = pnand %p4470_p13, %p4811_p8  ;;  %p4479_p7 = por %p4478_p4, %p4477_p5 }
  0x21   : > { %p4473_p2 = pneg %p4472_p0 }
  0x23   : > { %p4480_p9 = pnand %p4479_p7, %p4473_p2 }
  0x25   : > { %4483 = shalt.err (!%p4480_p9)
}
  0x26   : > { %s6276_s19 = smov 128   ;;  %s6277_s20 = smov 8  }
  0x27   : > { %4052 = dma.hbm_to_vmem [thread:$0]  (!%p4795_p6), %s6268_s1, 256, %s4784_s26, [#allocation7], %s6276_s19, %s6276_s19, %s6277_s20  }
  0x28   : > { %s4484_s11 = scalar_lea.hbm %s6270_s3, 4096 }
  0x29   : > { %p4485_p4 = scmp.ne.s32.totalorder %s6270_s3, %s4484_s11  ;;  %p4491_p12 = scmp.lt.u32.totalorder %s4484_s11, %s6270_s3 }
  0x2b   : > { %p4487_p10 = pnand %p4485_p4, %p4811_p8 }
  0x2d   : > { %p4488_p11 = pneg %p4487_p10 }
  0x2f   : > { %p4493_p13 = pnand %p4491_p12, %p4488_p11 }
  0x31   : > { %4496 = shalt.err (!%p4493_p13)
}
  0x32   : > { %s4497_s26 = scalar_lea.vmem %s4799_s30, 4096  ;;  %p4505_p7 = scmp.lt.s32.totalorder %s4799_s30, %s4799_s30 }
  0x33   : > { %p4498_p0 = scmp.ne.s32.totalorder %s4799_s30, %s4497_s26  ;;  %p4506_p9 = scmp.lt.s32.totalorder %s4497_s26, %s4497_s26 }
  0x35   : > { %p4500_p2 = pnand %p4498_p0, %p4811_p8  ;;  %p4507_p4 = por %p4506_p9, %p4505_p7 }
  0x37   : > { %p4501_p5 = pneg %p4500_p2 }
  0x39   : > { %p4508_p10 = pnand %p4507_p4, %p4501_p5 }
  0x3b   : > { %4511 = shalt.err (!%p4508_p10)
}
  0x3c   : > { %s4711_s17 = smov 256   ;;  %s4712_s18 = smov 16  }
  0x3d   : > { %4058 = dma.hbm_to_vmem [thread:$0]  (!%p4795_p6), %s6270_s3, 4096, %s4799_s30, [#allocation10], %s4711_s17, %s4711_s17, %s4712_s18  }
  0x3e   : > { %s4512_s11 = scalar_lea.hbm %s6269_s2, 4096 }
  0x3f   : > { %p4513_p11 = scmp.ne.s32.totalorder %s6269_s2, %s4512_s11  ;;  %p4519_p0 = scmp.lt.u32.totalorder %s4512_s11, %s6269_s2 }
  0x41   : > { %p4515_p12 = pnand %p4513_p11, %p4811_p8 }
  0x43   : > { %p4516_p13 = pneg %p4515_p12 }
  0x45   : > { %p4521_p2 = pnand %p4519_p0, %p4516_p13 }
  0x47   : > { %4524 = shalt.err (!%p4521_p2)
}
  0x48   : > { %s4525_s26 = scalar_lea.vmem %s213_s9, 4096  ;;  %p4533_p4 = scmp.lt.s32.totalorder %s213_s9, %s213_s9 }
  0x49   : > { %p4526_p5 = scmp.ne.s32.totalorder %s213_s9, %s4525_s26  ;;  %p4534_p10 = scmp.lt.s32.totalorder %s4525_s26, %s4525_s26 }
  0x4b   : > { %p4528_p7 = pnand %p4526_p5, %p4811_p8  ;;  %p4535_p1 = por %p4534_p10, %p4533_p4 }
  0x4d   : > { %p4529_p9 = pneg %p4528_p7 }
  0x4f   : > { %p4536_p3 = pnand %p4535_p1, %p4529_p9 }
  0x51   : > { %4539 = shalt.err (!%p4536_p3)
}
  0x52   : > { %s4713_s30 = smov 64   ;;  %s4714_s17 = smov 4  }
  0x53   : > { %4055 = dma.hbm_to_vmem [thread:$0]  (!%p4795_p6), %s6269_s2, 4096, %s213_s9, [#allocation7], %s4713_s30, %s4713_s30, %s4714_s17  }
  0x54   : > { %s4715_s29 = smov [#allocation11]   ;;  %s4716_s10 = smov [#allocation12]  }
  0x55   : > { %s238_s8 = sshll.u32 %s4715_s29, 4  ;;  %s251_s11 = sshll.u32 %s4716_s10, 4  ;;  %s239_s8 = int_to_ptr.vmem [resolvable:$true] %s238_s8  ;;  %s252_s11 = int_to_ptr.vmem [resolvable:$true] %s251_s11 }
  0x56   : > { %s4540_s14 = scalar_lea.hbm %s6271_s4, 4096 }
  0x57   : > { %p4541_p1 = scmp.ne.s32.totalorder %s6271_s4, %s4540_s14  ;;  %p4547_p12 = scmp.lt.u32.totalorder %s4540_s14, %s6271_s4 }
  0x59   : > { %p4543_p3 = pnand %p4541_p1, %p4811_p8 }
  0x5b   : > { %p4544_p11 = pneg %p4543_p3 }
  0x5d   : > { %p4549_p13 = pnand %p4547_p12, %p4544_p11 }
  0x5f   : > { %4552 = shalt.err (!%p4549_p13)
}
  0x60   : > { %s4553_s9 = scalar_lea.vmem %s239_s8, 4096  ;;  %p4561_p7 = scmp.lt.s32.totalorder %s239_s8, %s239_s8 }
  0x61   : > { %p4554_p0 = scmp.ne.s32.totalorder %s239_s8, %s4553_s9  ;;  %p4562_p9 = scmp.lt.s32.totalorder %s4553_s9, %s4553_s9 }
  0x63   : > { %p4556_p2 = pnand %p4554_p0, %p4811_p8  ;;  %p4563_p4 = por %p4562_p9, %p4561_p7 }
  0x65   : > { %p4557_p5 = pneg %p4556_p2 }
  0x67   : > { %p4564_p10 = pnand %p4563_p4, %p4557_p5 }
  0x69   : > { %4567 = shalt.err (!%p4564_p10)
}
  0x6a   : > { %4061 = dma.hbm_to_vmem [thread:$0]  (!%p4795_p6), %s6271_s4, 4096, %s239_s8, [#allocation10], %s4713_s30, %s4713_s30, %s4714_s17  }
  0x6b   : > { %s4568_s29 = scalar_lea.hbm %s6272_s5, 1024 }
  0x6c   : > { %p4569_p1 = scmp.ne.s32.totalorder %s6272_s5, %s4568_s29  ;;  %p4575_p12 = scmp.lt.u32.totalorder %s4568_s29, %s6272_s5 }
  0x6e   : > { %p4571_p3 = pnand %p4569_p1, %p4811_p8 }
  0x70   : > { %p4572_p11 = pneg %p4571_p3 }
  0x72   : > { %p4577_p13 = pnand %p4575_p12, %p4572_p11 }
  0x74   : > { %4580 = shalt.err (!%p4577_p13)
}
  0x75   : > { %s4581_s16 = scalar_lea.vmem %s252_s11, 1024  ;;  %p4589_p7 = scmp.lt.s32.totalorder %s252_s11, %s252_s11 }
  0x76   : > { %p4582_p0 = scmp.ne.s32.totalorder %s252_s11, %s4581_s16  ;;  %p4590_p9 = scmp.lt.s32.totalorder %s4581_s16, %s4581_s16 }
  0x78   : > { %p4584_p2 = pnand %p4582_p0, %p4811_p8  ;;  %p4591_p4 = por %p4590_p9, %p4589_p7 }
  0x7a   : > { %p4585_p5 = pneg %p4584_p2 }
  0x7c   : > { %p4592_p10 = pnand %p4591_p4, %p4585_p5 }
  0x7e   : > { %4595 = shalt.err (!%p4592_p10)
}
  0x7f   : > { %4064 = dma.hbm_to_vmem [thread:$0]  (!%p4795_p6), %s6272_s5, 1024, %s252_s11, [#allocation13], %s4713_s30, %s4713_s30, %s4714_s17  }
  0x80   : > { %s3511_s7 = sadd.s32 4294967294, %s4704_s24   ;;  %s4924_s15 = sadd.s32 1, %s4704_s24  }
  0x81   : > { %s32_s9 = sadd.s32 1, %s4700_s23  ;;  %s29_s19 = ssub.s32 %s4704_s24, %s4924_s15 }
  0x82   : > { %p39_p8 = scmp.ne.s32.totalorder %s4700_s23, %s4696_s22  ;;  %p30_p1 = scmp.eq.s32.totalorder %s29_s19, 0 }
  0x83   : > { %p40_p3 = scmp.eq.s32.totalorder %s4704_s24, 0  ;;  %p45_p11 = scmp.ne.s32.totalorder %s4696_s22, %s4692_s21 }
  0x84   : > { %p174_p12 = scmp.eq.s32.totalorder %s4779_s27, 1  ;;  %p6343_p0 = scmp.eq.s32.totalorder %s4779_s27, 0 }
  0x85   : > { %s4936_s20 = scalar_select %p30_p1, %s4700_s23, %s32_s9  }
  0x86   : > { %p41_p13 = por %p40_p3, %p39_p8  ;;  %p4940_p2 = por %p6343_p0, %p45_p11 }
  0x87   : > { %p4944_p6 = por %p174_p12, %p39_p8  ;;  %p180_p5 = scmp.eq.s32.totalorder %s3511_s7, 1 }
  0x88   : > { %p4078_p7 = scmp.lt.s32.totalorder %s4704_s24, 2  ;;  %s265_s17 = sand.u32 1, %s4700_s23  }
  0x89   : > { %s6345_s30 = scalar_select %p4944_p6, 1, 0 }
  0x8a   : > { %p4950_p9 = por %p180_p5, %p45_p11  ;;  %s3519_s25 = sshll.u32 %s265_s17, 6 }
  0x8b   : > { %s3715_s29 = sshll.u32 %s4704_s24, 10  ;;  %s269_s14 = scalar_lea.vmem [#allocation3], %s3519_s25 }
  0x8c   : > { %s6346_s11 = scalar_select %p4950_p9, 1, 0 }
  0x8d   : > { %s4958_s13 = scalar_lea.hbm %s6267_s0, %s3715_s29  ;;  %s276_s16 = sshll.u32 %s269_s14, 4  ;;  %s4964_s16 = int_to_ptr.vmem [resolvable:$true] %s276_s16 }
  0x8e   : > { %p4960_p4 = pnand %p4078_p7, %p41_p13  ;;  %s4966_s26 = scalar_lea.sflag [#allocation4], %s265_s17 }
  0x8f   : > { %s4596_s7 = scalar_lea.hbm %s4958_s13, 1024  ;;  %s4601_s25 = scalar_lea.hbm %s6267_s0, 2048 }
  0x90   : > { %p4597_p10 = scmp.ne.s32.totalorder %s4958_s13, %s4596_s7  ;;  %p4598_p8 = pneg %p4960_p4 }
  0x91   : > { %p4602_p11 = scmp.lt.u32.totalorder %s4958_s13, %s6267_s0  ;;  %p4603_p12 = scmp.lt.u32.totalorder %s4601_s25, %s4596_s7 }
  0x92   : > { %p4599_p1 = pnand %p4598_p8, %p4597_p10  ;;  %p4605_p0 = scmp.lt.u32.totalorder %s4596_s7, %s4958_s13 }
  0x93   : > { %p4604_p13 = por %p4603_p12, %p4602_p11 }
  0x94   : > { %p4600_p3 = pneg %p4599_p1 }
  0x95   : > { %p4606_p5 = por %p4605_p0, %p4604_p13 }
  0x97   : > { %p4607_p7 = pnand %p4606_p5, %p4600_p3 }
  0x99   : > { %4610 = shalt.err (!%p4607_p7)
}
  0x9a   : > { %s4611_s17 = scalar_lea.vmem %s4964_s16, 1024  ;;  %s4717_s12 = smov [#allocation3]  }
  0x9b   : > { %p4612_p10 = scmp.ne.s32.totalorder %s4964_s16, %s4611_s17  ;;  %s4616_s14 = sshll.u32 %s4717_s12, 4  ;;  %s4617_s14 = int_to_ptr.vmem [resolvable:$false] %s4616_s14 }
  0x9c   : > { %s4618_s9 = scalar_lea.vmem %s4617_s14, 2048  ;;  %p4619_p6 = scmp.lt.s32.totalorder %s4964_s16, %s4617_s14 }
  0x9d   : > { %p4614_p1 = pnand %p4612_p10, %p4598_p8  ;;  %p4620_p11 = scmp.lt.s32.totalorder %s4618_s9, %s4611_s17 }
  0x9f   : > { %p4615_p9 = pneg %p4614_p1  ;;  %p4621_p12 = por %p4620_p11, %p4619_p6 }
  0xa1   : > { %p4622_p13 = pnand %p4621_p12, %p4615_p9 }
  0xa3   : > { %4625 = shalt.err (!%p4622_p13)
}
  0xa4   : > { %s6348_s7 = smov 8   ;;  %s6349_s19 = smov 128  }
  0xa5   : > { %4068 = dma.hbm_to_vmem [thread:$0]  (!%p4960_p4), %s4958_s13, 1024, %s4964_s16, %s4966_s26, %s6349_s19, %s6349_s19, %s6348_s7  }
  0xa6   : > { %p6350_p8 = scmp.ne.s32.totalorder %s6340_s28, 0 }
  0xa8   : > { %288 = sbr.rel (%p6350_p8) target bundleno = 2159 (0x86f), region = 44 }
  0xaf   : > { %s5000_s25 = sand.u32 1, %s4696_s22  }
  0xb0   : > { %s3523_s29 = sshll.u32 %s5000_s25, 6  ;;  %s291_s10 = scalar_lea.sflag [#allocation4], %s5000_s25 }
  0xb1   : > { %s5006_s8 = scalar_lea.vmem [#allocation3], %s3523_s29 }
  0xb2   : > { %4671 = dma.done.wait (%p4940_p2), %s291_s10, 1024  }
  0xb3   : > { %4673 = vsyncadd (%p4940_p2), %s291_s10, 4294966272  ;;  %p6351_p6 = scmp.eq.s32.totalorder %s4779_s27, 0 }
  0xb5   : > { %4675 = dma.done.wait (%p6351_p6), [#allocation7], 4352   ;;  %p6352_p9 = pmov %p6351_p6 }
  0xb6   : > { %p6353_p4 = pmov %p6351_p6 }
  0xb7   : > { %4677 = vsyncadd (%p6352_p9), [#allocation7], 4294962944 }
  0xb8   : > { %4679 = dma.done.wait (%p6353_p4), [#allocation10], 8192   ;;  %p6354_p3 = pmov %p6353_p4 }
  0xba   : > { %4681 = vsyncadd (%p6354_p3), [#allocation10], 4294959104  ;;  %p6355_p0 = pmov %p6354_p3 }
  0xbc   : > { %4683 = dma.done.wait (%p6355_p0), [#allocation13], 1024   ;;  %p6356_p5 = pmov %p6355_p0 }
  0xbd   : > { %v344_v0 = vld [vmem:[%s5006_s8] sm:$0xff]  ;;  %v346_v1 = vld [vmem:[%s5006_s8 + $0x10] sm:$0xff]  ;;  %v345_v2 = vld [vmem:[%s5006_s8 + $0x8] sm:$0xff]  ;;  %v6279_v40 = vmov 0.0   ;;  %v354_v58 = vlaneseq  ;;  %s342_s28 = scalar_lea.vmem [#allocation14], %s3523_s29  ;;  %s3716_s18 = sshll.u32 %s4779_s27, 10 }
  0xbe   : > { %4685 = vsyncadd (%p6356_p5), [#allocation13], 4294966272  ;;  %540 = vadd.xlane.f32.xlu0 %v344_v0  ;;  %544 = vadd.xlane.f32.xlu1 %v346_v1  ;;  %v347_v3 = vld [vmem:[%s5006_s8 + $0x18] sm:$0xff]  ;;  %v348_v4 = vld [vmem:[%s5006_s8 + $0x20] sm:$0xff]  ;;  %530 = vst [vmem:[#allocation2] sm:$0xff] %v6279_v40  ;;  %s3390_s13 = sshll.u32 %s342_s28, 4  ;;  %s6220_s17 = scalar_lea.hbm %s6273_s6, %s3716_s18  ;;  %s6222_s13 = int_to_ptr.vmem [resolvable:$true] %s3390_s13 }
  0xbf   : > { %v349_v5 = vld [vmem:[%s5006_s8 + $0x28] sm:$0xff]  ;;  %v350_v6 = vld [vmem:[%s5006_s8 + $0x30] sm:$0xff]  ;;  %v351_v7 = vld [vmem:[%s5006_s8 + $0x38] sm:$0xff]  ;;  %539 = vst [vmem:[#allocation2 + $0x48] sm:$0xff] %v6279_v40  ;;  %v5069_v59 = vand.u32 127, %v354_v58  ;;  %v5071_v60 = vshrl.u32 %v354_v58, 7 }
  0xc0   : > { %v4132_v41 = vld [vmem:[#allocation8] sm:$0xff]   ;;  %v4134_v43 = vld [vmem:[#allocation8 + $0x8] sm:$0xff]   ;;  %v4136_v45 = vld [vmem:[#allocation8 + $0x10] sm:$0xff]   ;;  %s3377_s27 = scalar_lea.sflag [#allocation5], %s5000_s25  ;;  %s4626_s12 = scalar_lea.vmem %s6222_s13, 1024 }
  0xc1   : > { %v4133_v42 = vld [vmem:[#allocation8 + $0x40] sm:$0xff]   ;;  %3857 = vmatprep.subr.bf16.mxu0 %v4132_v41  ;;  %v4135_v44 = vld [vmem:[#allocation8 + $0x48] sm:$0xff]   ;;  %v4137_v46 = vld [vmem:[#allocation8 + $0x50] sm:$0xff]   ;;  %6358 = vst [vmem:[#allocation21_spill] sm:$0xff] %v5069_v59  ;;  %v5074_v61 = vsub.s32 0, %v5071_v60  ;;  %vm364_vm0 = vcmp.ge.s32.totalorder %v5069_v59, 64  ;;  %p4627_p2 = scmp.ne.s32.totalorder %s6222_s13, %s4626_s12 }
  0xc2   : > { %542 = vadd.xlane.f32.xlu0 %v345_v2  ;;  %546 = vadd.xlane.f32.xlu1 %v347_v3  ;;  %v4138_v47 = vld [vmem:[#allocation8 + $0x18] sm:$0xff]   ;;  %v4140_v49 = vld [vmem:[#allocation8 + $0x20] sm:$0xff]   ;;  %v4142_v51 = vld [vmem:[#allocation8 + $0x28] sm:$0xff]   ;;  %6359 = vst [vmem:[#allocation22_spill] sm:$0xff] %v5071_v60  ;;  %vm365_vm1 = vcmp.lt.s32.totalorder %v5069_v59, 96  ;;  %v5079_v62 = vadd.s32 8, %v5071_v60 }
  0xc3   : > { %3858 = vmatpush3.bf16.msra.mxu0 %v4132_v41  ;;  %3881 = vmatprep.subr.bf16.mxu1 %v4133_v42  ;;  %v4139_v48 = vld [vmem:[#allocation8 + $0x58] sm:$0xff]   ;;  %v4141_v50 = vld [vmem:[#allocation8 + $0x60] sm:$0xff]   ;;  %v4143_v52 = vld [vmem:[#allocation8 + $0x68] sm:$0xff]   ;;  %vm369_vm3 = vcmp.ge.s32.totalorder %v5069_v59, 96  ;;  %vm356_vm4 = vcmp.lt.s32.totalorder %v5069_v59, 32  ;;  %vm359_vm8 = vcmp.ge.s32.totalorder %v5069_v59, 32 }
  0xc4   : > { %3882 = vmatpush3.bf16.msra.mxu1 %v4133_v42  ;;  %3859 = vmatprep.subr.bf16.mxu0 %v4134_v43  ;;  %v4144_v53 = vld [vmem:[#allocation8 + $0x30] sm:$0xff]   ;;  %v4146_v55 = vld [vmem:[#allocation8 + $0x38] sm:$0xff]   ;;  %v5066_v57 = vld [vmem:[#allocation8 + $0x80] sm:$0xff]   ;;  %6360 = vst [vmem:[#allocation23_spill] sm:$0xff] %v5079_v62  ;;  %vm360_vm9 = vcmp.lt.s32.totalorder %v5069_v59, 64  ;;  %v5146_v41 = vadd.s32 40, %v5071_v60 }
  0xc5   : > { %3883 = vmatprep.subr.bf16.mxu1 %v4135_v44  ;;  %v4145_v54 = vld [vmem:[#allocation8 + $0x70] sm:$0xff]   ;;  %v4147_v56 = vld [vmem:[#allocation8 + $0x78] sm:$0xff]   ;;  %6357 = vst [vmem:[#allocation20_spill] sm:$0xff] %v5066_v57  ;;  %vm5088_vm2 = vmand %vm364_vm0, %vm365_vm1  ;;  %v5151_v42 = vsel %vm356_vm4, 1.0, %v6279_v40  ;;  %p6479_p7 = scmp.ne.s32.totalorder %s6345_s30, 0  ;;  %s4720_s14 = smov [#allocation14]  }
  0xc6   : > { %548 = vadd.xlane.f32.xlu0 %v348_v4  ;;  %550 = vadd.xlane.f32.xlu1 %v349_v5  ;;  %v5081_v63 = vld [vmem:[#allocation6] sm:$0xff]  ;;  %6376 = vst [vmem:[#allocation31_spill] sm:$0xff] %v5146_v41  ;;  %6377 = vst [vmem:[#allocation32_spill] sm:$0xff] %v5151_v42  ;;  %s4630_s9 = sshll.u32 %s4720_s14, 4  ;;  %s4631_s9 = int_to_ptr.vmem [resolvable:$false] %s4630_s9 }
  0xc7   : > { %3860 = vmatpush3.bf16.msra.mxu0 %v4134_v43  ;;  %6361 = vst [vmem:[#allocation24_spill] sm:$0xff] %v5081_v63  ;;  %vm5176_vm11 = vmand %vm359_vm8, %vm360_vm9  ;;  %p4628_p10 = pnand %p4627_p2, %p6479_p7  ;;  %s4632_s7 = scalar_lea.vmem %s4631_s9, 2048 }
  0xc8   : > { %3884 = vmatpush3.bf16.msra.mxu1 %v4135_v44  ;;  %3861 = vmatprep.subr.bf16.mxu0 %v4136_v45  ;;  %p4633_p11 = scmp.lt.s32.totalorder %s6222_s13, %s4631_s9  ;;  %p4634_p12 = scmp.lt.s32.totalorder %s4632_s7, %s4626_s12 }
  0xc9   : > { %3885 = vmatprep.subr.bf16.mxu1 %v4137_v46  ;;  %p4629_p1 = pneg %p4628_p10 }
  0xca   : > { %552 = vadd.xlane.f32.xlu0 %v350_v6  ;;  %554 = vadd.xlane.f32.xlu1 %v351_v7  ;;  %p4635_p13 = por %p4634_p12, %p4633_p11 }
  0xcb   : > { %3862 = vmatpush3.bf16.msra.mxu0 %v4136_v45 }
  0xcc   : > { %3886 = vmatpush3.bf16.msra.mxu1 %v4137_v46  ;;  %3863 = vmatprep.subr.bf16.mxu0 %v4138_v47  ;;  %p4636_p8 = pnand %p4635_p13, %p4629_p1 }
  0xcd   : > { %3887 = vmatprep.subr.bf16.mxu1 %v4139_v48 }
  0xcf   : > { %3864 = vmatpush3.bf16.msra.mxu0 %v4138_v47 }
  0xd0   : > { %3888 = vmatpush3.bf16.msra.mxu1 %v4139_v48  ;;  %3865 = vmatprep.subr.bf16.mxu0 %v4140_v49 }
  0xd1   : > { %3889 = vmatprep.subr.bf16.mxu1 %v4141_v50 }
  0xd3   : > { %3866 = vmatpush3.bf16.msra.mxu0 %v4140_v49 }
  0xd4   : > { %3890 = vmatpush3.bf16.msra.mxu1 %v4141_v50  ;;  %3867 = vmatprep.subr.bf16.mxu0 %v4142_v51 }
  0xd5   : > { %3891 = vmatprep.subr.bf16.mxu1 %v4143_v52 }
  0xd7   : > { %3868 = vmatpush3.bf16.msra.mxu0 %v4142_v51 }
  0xd8   : > { %3892 = vmatpush3.bf16.msra.mxu1 %v4143_v52  ;;  %3869 = vmatprep.subr.bf16.mxu0 %v4144_v53 }
  0xd9   : > { %3893 = vmatprep.subr.bf16.mxu1 %v4145_v54 }
  0xdb   : > { %3870 = vmatpush3.bf16.msra.mxu0 %v4144_v53 }
  0xdc   : > { %3894 = vmatpush3.bf16.msra.mxu1 %v4145_v54  ;;  %3871 = vmatprep.subr.bf16.mxu0 %v4146_v55 }
  0xdd   : > { %3895 = vmatprep.subr.bf16.mxu1 %v4147_v56 }
  0xdf   : > { %3872 = vmatpush3.bf16.msra.mxu0 %v4146_v55 }
  0xe0   : > { %3896 = vmatpush3.bf16.msra.mxu1 %v4147_v56  ;;  %3905 = vmatprep.subr.bf16.mxu0 %v5066_v57 }
 0x14b   : > { %v541_v8 = vpop.xlane.xlu0 %540  ;;  %v545_v9 = vpop.xlane.xlu1 %544 }
 0x14c   : > { %v557_v10 = vmul.f32 0.0078125, %v541_v8  ;;  %v559_v11 = vmul.f32 0.0078125, %v545_v9  ;;  %v397_v9 = vand.u32 7, %v5079_v62 }
 0x14e   : > { %v5032_v12 = vsub.f32 %v344_v0, %v557_v10  ;;  %v5034_v13 = vsub.f32 %v346_v1, %v559_v11  ;;  %v5084_v1 = vsub.s32 1, %v5071_v60  ;;  %vm5131_vm6 = vcmp.ge.s32.totalorder %v397_v9, 1 }
 0x14f   : > { %v543_v14 = vpop.xlane.xlu0 %542  ;;  %v547_v15 = vpop.xlane.xlu1 %546  ;;  %vm5158_vm10 = vcmp.lt.s32.totalorder %v397_v9, 7  ;;  %v5165_v47 = vsel %vm5131_vm6, 1.0, %v6279_v40 }
 0x150   : > { %v558_v16 = vmul.f32 0.0078125, %v543_v14  ;;  %v573_v17 = vmul.f32 %v5032_v12, %v5032_v12  ;;  %v560_v18 = vmul.f32 0.0078125, %v547_v15  ;;  %v575_v21 = vmul.f32 %v5034_v13, %v5034_v13  ;;  %6381 = vst [vmem:[#allocation34_spill] sm:$0xff] %v5165_v47 }
 0x151   : > { %v5104_v11 = vrot.slane %v5081_v63, %v5084_v1 }
 0x152   : > { %v5038_v19 = vsub.f32 %v345_v2, %v558_v16  ;;  %581 = vadd.xlane.f32.xlu0 %v573_v17  ;;  %v5040_v20 = vsub.f32 %v347_v3, %v560_v18  ;;  %v5086_v3 = vld [vmem:[#allocation6 + $0x8] sm:$0x7]  ;;  %v5115_v17 = vadd.s32 24, %v5071_v60 }
 0x153   : > { %v549_v22 = vpop.xlane.xlu0 %548  ;;  %v551_v23 = vpop.xlane.xlu1 %550  ;;  %6362 = vst [vmem:[#allocation25_spill] sm:$0xff] %v5086_v3  ;;  %v5108_v15 = vrot.slane %v5086_v3, %v5074_v61  ;;  %v5112_v16 = vrot.slane %v5086_v3, %v5084_v1 }
 0x154   : > { %v561_v24 = vmul.f32 0.0078125, %v549_v22  ;;  %v574_v25 = vmul.f32 %v5038_v19, %v5038_v19  ;;  %v562_v26 = vmul.f32 0.0078125, %v551_v23  ;;  %v576_v29 = vmul.f32 %v5040_v20, %v5040_v20  ;;  %6366 = vst [vmem:[#allocation27_spill] sm:$0xff] %v5115_v17 }
 0x155   : > { %v5120_v22 = vsel %vm5088_vm2, 1.0, %v6279_v40  ;;  %v5124_v23 = vsel %vm369_vm3, 1.0, %v6279_v40 }
 0x156   : > { %v5046_v27 = vsub.f32 %v348_v4, %v561_v24  ;;  %585 = vadd.xlane.f32.xlu0 %v575_v21  ;;  %583 = vadd.xlane.f32.xlu1 %v574_v25  ;;  %v5048_v28 = vsub.f32 %v349_v5, %v562_v26  ;;  %v390_v5 = vand.u32 7, %v5071_v60  ;;  %6367 = vst [vmem:[#allocation28_spill] sm:$0xff] %v5120_v22  ;;  %6368 = vst [vmem:[#allocation29_spill] sm:$0xff] %v5124_v23 }
 0x157   : > { %v553_v30 = vpop.xlane.xlu0 %552  ;;  %v555_v31 = vpop.xlane.xlu1 %554  ;;  %v5200_v4 = vadd.s32 48, %v5071_v60 }
 0x158   : > { %v563_v32 = vmul.f32 0.0078125, %v553_v30  ;;  %v577_v33 = vmul.f32 %v5046_v27, %v5046_v27  ;;  %v564_v34 = vmul.f32 0.0078125, %v555_v31  ;;  %v578_v37 = vmul.f32 %v5048_v28, %v5048_v28 }
 0x159   : > { %vm5126_vm5 = vcmp.ge.s32.totalorder %v390_v5, 1  ;;  %vm5135_vm7 = vcmp.lt.s32.totalorder %v390_v5, 7  ;;  %6392 = vst [vmem:[#allocation37_spill] sm:$0xff] %v5200_v4  ;;  %v5203_v5 = vadd.s32 56, %v5071_v60 }
 0x15a   : > { %v5054_v35 = vsub.f32 %v350_v6, %v563_v32  ;;  %587 = vadd.xlane.f32.xlu1 %v576_v29  ;;  %589 = vadd.xlane.f32.xlu0 %v577_v33  ;;  %v5056_v36 = vsub.f32 %v351_v7, %v564_v34  ;;  %v5094_v6 = vadd.s32 16, %v5071_v60  ;;  %v5098_v7 = vrot.slane %v5081_v63, %v5074_v61 }
 0x15b   : > { %v411_v34 = vand.u32 7, %v5115_v17  ;;  %v5156_v43 = vsel %vm5126_vm5, 1.0, %v6279_v40  ;;  %v5170_v48 = vsel %vm5135_vm7, 1.0, %v6279_v40  ;;  %6393 = vst [vmem:[#allocation38_spill] sm:$0xff] %v5203_v5 }
 0x15c   : > { %v579_v38 = vmul.f32 %v5054_v35, %v5054_v35  ;;  %v580_v39 = vmul.f32 %v5056_v36, %v5056_v36  ;;  %6365 = vst [vmem:[#allocation26_spill] sm:$0xff] %v5094_v6  ;;  %v404_v25 = vand.u32 7, %v5094_v6  ;;  %6378 = vst [vmem:[#allocation33_spill] sm:$0xff] %v5156_v43 }
 0x15d   : > { %6382 = vst [vmem:[#allocation35_spill] sm:$0xff] %v5170_v48  ;;  %vm5184_vm13 = vcmp.ge.s32.totalorder %v411_v34, 1  ;;  %vm509_vm15 = vcmp.lt.s32.totalorder %v411_v34, 7 }
 0x15e   : > { %591 = vadd.xlane.f32.xlu1 %v578_v37  ;;  %593 = vadd.xlane.f32.xlu0 %v579_v38  ;;  %v5143_v37 = vadd.s32 32, %v5071_v60  ;;  %vm5180_vm12 = vcmp.ge.s32.totalorder %v404_v25, 1  ;;  %vm5188_vm14 = vcmp.lt.s32.totalorder %v404_v25, 7  ;;  %v5219_v25 = vsel %vm5184_vm13, 1.0, %v6279_v40 }
 0x15f   : > { %6396 = vst [vmem:[#allocation41_spill] sm:$0xff] %v5219_v25  ;;  %v5241_v44 = vsel %vm509_vm15, 1.0, %v6279_v40 }
 0x160   : > { %6375 = vst [vmem:[#allocation30_spill] sm:$0xff] %v5143_v37  ;;  %v418_v55 = vand.u32 7, %v5143_v37  ;;  %6402 = vst [vmem:[#allocation43_spill] sm:$0xff] %v5241_v44 }
 0x162   : > { %595 = vadd.xlane.f32.xlu1 %v580_v39  ;;  %vm5226_vm0 = vcmp.ge.s32.totalorder %v418_v55, 1  ;;  %vm510_vm2 = vcmp.lt.s32.totalorder %v418_v55, 7 }
 0x163   : > { %v5254_v52 = vsel %vm5226_vm0, 1.0, %v6279_v40  ;;  %v5264_v54 = vsel %vm510_vm2, 1.0, %v6279_v40 }
 0x164   : > { %6405 = vst [vmem:[#allocation46_spill] sm:$0xff] %v5254_v52  ;;  %6407 = vst [vmem:[#allocation48_spill] sm:$0xff] %v5264_v54 }
 0x1df   : > { %v582_v0 = vpop.xlane.xlu0 %581 }
 0x1e0   : > { %v597_v2 = vmul.f32 0.0078125, %v582_v0  ;;  %v425_v0 = vand.u32 7, %v5146_v41 }
 0x1e2   : > { %v605_v8 = vadd.f32 1e-05, %v597_v2  ;;  %v5197_v2 = vsel %vm5158_vm10, 1.0, %v6279_v40  ;;  %vm5230_vm1 = vcmp.ge.s32.totalorder %v425_v0, 1  ;;  %vm511_vm3 = vcmp.lt.s32.totalorder %v425_v0, 7 }
 0x1e3   : > { %v584_v10 = vpop.xlane.xlu1 %583  ;;  %v586_v14 = vpop.xlane.xlu0 %585  ;;  %6391 = vst [vmem:[#allocation36_spill] sm:$0xff] %v5197_v2  ;;  %v5259_v53 = vsel %vm5230_vm1, 1.0, %v6279_v40  ;;  %vm1490_vm10 = vcmask 523264  }
 0x1e4   : > { %4252 = vrsqrt.f32 %v605_v8  ;;  %v598_v18 = vmul.f32 0.0078125, %v584_v10  ;;  %v599_v21 = vmul.f32 0.0078125, %v586_v14  ;;  %v5208_v14 = vsel %vm5176_vm11, 1.0, %v6279_v40  ;;  %6406 = vst [vmem:[#allocation47_spill] sm:$0xff] %v5259_v53 }
 0x1e5   : > { %6394 = vst [vmem:[#allocation39_spill] sm:$0xff] %v5208_v14 }
 0x1e6   : > { %v606_v26 = vadd.f32 1e-05, %v598_v18  ;;  %v607_v29 = vadd.f32 1e-05, %v599_v21  ;;  %v5213_v18 = vsel %vm5180_vm12, 1.0, %v6279_v40 }
 0x1e7   : > { %v588_v32 = vpop.xlane.xlu1 %587  ;;  %v590_v33 = vpop.xlane.xlu0 %589  ;;  %6395 = vst [vmem:[#allocation40_spill] sm:$0xff] %v5213_v18 }
 0x1e8   : > { %4254 = vrsqrt.f32 %v606_v26  ;;  %v600_v38 = vmul.f32 0.0078125, %v588_v32  ;;  %v601_v39 = vmul.f32 0.0078125, %v590_v33  ;;  %v5224_v26 = vsel %vm5188_vm14, 1.0, %v6279_v40 }
 0x1e9   : > { %4256 = vrsqrt.f32 %v607_v29  ;;  %6397 = vst [vmem:[#allocation42_spill] sm:$0xff] %v5224_v26  ;;  %v432_v32 = vand.u32 7, %v5200_v4  ;;  %v439_v33 = vand.u32 7, %v5203_v5 }
 0x1ea   : > { %v608_v45 = vadd.f32 1e-05, %v600_v38  ;;  %v609_v46 = vadd.f32 1e-05, %v601_v39  ;;  %v5238_v39 = vmul.f32 0.0, %v5120_v22 }
 0x1eb   : > { %v592_v49 = vpop.xlane.xlu1 %591  ;;  %v594_v50 = vpop.xlane.xlu0 %593  ;;  %vm488_vm4 = vcmp.ge.s32.totalorder %v432_v32, 1  ;;  %vm489_vm5 = vcmp.ge.s32.totalorder %v439_v33, 1  ;;  %vm512_vm6 = vcmp.lt.s32.totalorder %v432_v32, 7  ;;  %vm513_vm7 = vcmp.lt.s32.totalorder %v439_v33, 7 }
 0x1ec   : > { %4258 = vrsqrt.f32 %v608_v45  ;;  %v602_v56 = vmul.f32 0.0078125, %v592_v49  ;;  %v603_v58 = vmul.f32 0.0078125, %v594_v50  ;;  %v5248_v50 = vsub.f32 1.0, %v5086_v3 }
 0x1ed   : > { %4260 = vrsqrt.f32 %v609_v46 }
 0x1ee   : > { %v4253_v8 = vpop.eup %4252  ;;  %v610_v9 = vadd.f32 1e-05, %v602_v56  ;;  %v611_v10 = vadd.f32 1e-05, %v603_v58  ;;  %6404 = vst [vmem:[#allocation45_spill] sm:$0xff] %v5248_v50  ;;  %v5268_v56 = vsel %vm511_vm3, 1.0, %v6279_v40 }
 0x1ef   : > { %v621_v21 = vmul.f32 %v4253_v8, %v5032_v12  ;;  %v596_v24 = vpop.xlane.xlu1 %595  ;;  %6408 = vst [vmem:[#allocation49_spill] sm:$0xff] %v5268_v56  ;;  %v5302_v12 = vsel %vm513_vm7, 1.0, %v6279_v40 }
 0x1f0   : > { %4262 = vrsqrt.f32 %v610_v9  ;;  %v604_v29 = vmul.f32 0.0078125, %v596_v24  ;;  %v5276_v9 = vrot.slane %v5248_v50, %v5074_v61  ;;  %6414 = vst [vmem:[#allocation55_spill] sm:$0xff] %v5302_v12 }
 0x1f1   : > { %v633_v31 = vmul.f32 %v5098_v7, %v621_v21  ;;  %4264 = vrsqrt.f32 %v611_v10  ;;  %v5280_v10 = vrot.slane %v5248_v50, %v5084_v1  ;;  %v5299_v1 = vsel %vm512_vm6, 1.0, %v6279_v40 }
 0x1f2   : > { %v4255_v34 = vpop.eup %4254  ;;  %v612_v38 = vadd.f32 1e-05, %v604_v29  ;;  %v5287_v29 = vsel %vm488_vm4, 1.0, %v6279_v40  ;;  %6413 = vst [vmem:[#allocation54_spill] sm:$0xff] %v5299_v1 }
 0x1f3   : > { %v4257_v45 = vpop.eup %4256  ;;  %v622_v46 = vmul.f32 %v4255_v34, %v5038_v19  ;;  %v5245_v49 = vadd.f32 %v5104_v11, %v633_v31  ;;  %6411 = vst [vmem:[#allocation52_spill] sm:$0xff] %v5287_v29 }
 0x1f4   : > { %v623_v51 = vmul.f32 %v4257_v45, %v5034_v13  ;;  %4266 = vrsqrt.f32 %v612_v38 }
 0x1f5   : > { %6403 = vst [vmem:[#allocation44_spill] sm:$0xff] %v5245_v49  ;;  %v634_v19 = vmul.f32 %v5098_v7, %v622_v46  ;;  %653 = vst [vmem:[#allocation2 + $0x8] sm:$0xff] %v5245_v49  ;;  %v5296_v61 = vmul.f32 %v5120_v22, %v5245_v49  ;;  %v5307_v32 = vmul.f32 0.0, %v5245_v49  ;;  %v5311_v33 = vmul.f32 %v5108_v15, %v5245_v49 }
 0x1f6   : > { %v4259_v13 = vpop.eup %4258  ;;  %v635_v55 = vmul.f32 %v5098_v7, %v623_v51  ;;  %v5315_v34 = vmul.f32 %v5112_v16, %v5245_v49 }
 0x1f7   : > { %v4261_v58 = vpop.eup %4260  ;;  %v624_v0 = vmul.f32 %v4259_v13, %v5040_v20  ;;  %v5272_v8 = vadd.f32 %v5104_v11, %v634_v19  ;;  %v5290_v20 = vsel %vm489_vm5, 1.0, %v6279_v40 }
 0x1f8   : > { %v5283_v21 = vadd.f32 %v5104_v11, %v635_v55  ;;  %v625_v24 = vmul.f32 %v4261_v58, %v5046_v27  ;;  %6412 = vst [vmem:[#allocation53_spill] sm:$0xff] %v5290_v20 }
 0x1f9   : > { %6409 = vst [vmem:[#allocation50_spill] sm:$0xff] %v5272_v8  ;;  %v636_v30 = vmul.f32 %v5098_v7, %v624_v0  ;;  %654 = vst [vmem:[#allocation2 + $0x10] sm:$0xff] %v5272_v8  ;;  %v5323_v51 = vmul.f32 %v5124_v23, %v5272_v8  ;;  %v5326_v19 = vmul.f32 0.0, %v5272_v8 }
 0x1fa   : > { %6410 = vst [vmem:[#allocation51_spill] sm:$0xff] %v5283_v21  ;;  %v4263_v27 = vpop.eup %4262  ;;  %655 = vst [vmem:[#allocation2 + $0x18] sm:$0xff] %v5283_v21  ;;  %v637_v31 = vmul.f32 %v5098_v7, %v625_v24  ;;  %v5334_v0 = vmul.f32 %v5124_v23, %v5283_v21  ;;  %v5362_v59 = vmul.f32 %v5108_v15, %v5283_v21 }
 0x1fb   : > { %v4265_v38 = vpop.eup %4264  ;;  %v5318_v45 = vadd.f32 %v5104_v11, %v636_v30  ;;  %v626_v46 = vmul.f32 %v4263_v27, %v5048_v28  ;;  %v5338_v28 = vmul.f32 %v5108_v15, %v5272_v8  ;;  %v5344_v30 = vmul.f32 %v5112_v16, %v5272_v8 }
 0x1fc   : > { %v5329_v13 = vadd.f32 %v5104_v11, %v637_v31  ;;  %v627_v55 = vmul.f32 %v4265_v38, %v5054_v35  ;;  %v661_v58 = vld [vmem:[#allocation2 + $0x7] sm:$0xff]  ;;  %v5348_v35 = vmul.f32 %v5120_v22, %v5272_v8  ;;  %v5352_v27 = vmul.f32 %v5120_v22, %v5283_v21 }
 0x1fd   : > { %6415 = vst [vmem:[#allocation56_spill] sm:$0xff] %v5318_v45  ;;  %656 = vst [vmem:[#allocation2 + $0x20] sm:$0xff] %v5318_v45  ;;  %v638_v24 = vmul.f32 %v5098_v7, %v626_v46  ;;  %v693_v40 = vmul.f32 %v5156_v43, %v661_v58  ;;  %v5358_v46 = vmul.f32 0.0, %v5283_v21  ;;  %v5370_v17 = vmul.f32 %v5124_v23, %v5318_v45 }
 0x1fe   : > { %v4267_v31 = vpop.eup %4266  ;;  %657 = vst [vmem:[#allocation2 + $0x28] sm:$0xff] %v5329_v13  ;;  %v639_v38 = vmul.f32 %v5098_v7, %v627_v55  ;;  %v5374_v55 = vmul.f32 %v5112_v16, %v5283_v21  ;;  %v5381_v62 = vmul.f32 %v5124_v23, %v5329_v13  ;;  %v5396_v21 = vmul.f32 %v5112_v16, %v5318_v45 }
 0x1ff   : > { %v5365_v5 = vadd.f32 %v5104_v11, %v638_v24  ;;  %v628_v4 = vmul.f32 %v4267_v31, %v5056_v36  ;;  %v5384_v24 = vmul.f32 0.0, %v5318_v45  ;;  %v5388_v36 = vmul.f32 %v5108_v15, %v5318_v45 }
 0x200   : > { %v5377_v58 = vadd.f32 %v5104_v11, %v639_v38  ;;  %v662_v43 = vld [vmem:[#allocation2 + $0xf] sm:$0xff]  ;;  %v701_v8 = vmul.f32 %v5151_v42, %v693_v40  ;;  %v737_v3 = vmul.f32 %v5120_v22, %v5318_v45  ;;  %v5417_v45 = vmul.f32 0.0, %v5329_v13 }
 0x201   : > { %v669_v6 = vld [vmem:[#allocation2 + $0x9] sm:$0xff]  ;;  %658 = vst [vmem:[#allocation2 + $0x30] sm:$0xff] %v5365_v5  ;;  %v640_v31 = vmul.f32 %v5098_v7, %v628_v4  ;;  %v670_v37 = vld [vmem:[#allocation2 + $0x11] sm:$0xff]  ;;  %v694_v38 = vmul.f32 %v5165_v47, %v662_v43  ;;  %v5405_v7 = vmul.f32 %v5120_v22, %v5329_v13  ;;  %v5431_v60 = vmul.f32 0.0, %v5365_v5 }
 0x202   : > { %v709_v41 = vmul.f32 %v5170_v48, %v669_v6  ;;  %v663_v63 = vld [vmem:[#allocation2 + $0x17] sm:$0xff]  ;;  %659 = vst [vmem:[#allocation2 + $0x38] sm:$0xff] %v5377_v58  ;;  %v710_v49 = vmul.f32 %v5197_v2, %v670_v37  ;;  %v753_v2 = vmul.f32 %v5124_v23, %v5365_v5 }
 0x203   : > { %v5408_v6 = vadd.f32 %v5104_v11, %v640_v31  ;;  %v702_v43 = vmul.f32 %v5151_v42, %v694_v38  ;;  %v695_v48 = vmul.f32 %v5213_v18, %v663_v63  ;;  %v5421_v11 = vmul.f32 %v5108_v15, %v5329_v13 }
 0x204   : > { %v717_v4 = vmul.f32 %v5208_v14, %v709_v41  ;;  %v718_v40 = vmul.f32 %v5208_v14, %v710_v49  ;;  %v664_v47 = vld [vmem:[#allocation2 + $0x1f] sm:$0xff]  ;;  %v754_v18 = vmul.f32 %v5124_v23, %v5377_v58 }
 0x205   : > { %6416 = vst [vmem:[#allocation57_spill] sm:$0xff] %v5408_v6  ;;  %v671_v37 = vld [vmem:[#allocation2 + $0x19] sm:$0xff]  ;;  %660 = vst [vmem:[#allocation2 + $0x40] sm:$0xff] %v5408_v6  ;;  %v672_v41 = vld [vmem:[#allocation2 + $0x21] sm:$0xff]  ;;  %v696_v63 = vmul.f32 %v5219_v25, %v664_v47 }
 0x206   : > { %v725_v31 = vadd.f32 %v717_v4, %v701_v8  ;;  %v711_v49 = vmul.f32 %v5224_v26, %v671_v37  ;;  %v665_v38 = vld [vmem:[#allocation2 + $0x27] sm:$0xff]  ;;  %v726_v50 = vadd.f32 %v718_v40, %v702_v43  ;;  %v712_v22 = vmul.f32 %v5241_v44, %v672_v41 }
 0x207   : > { %v697_v57 = vmul.f32 %v5254_v52, %v665_v38  ;;  %v703_v8 = vmul.f32 %v5151_v42, %v695_v48  ;;  %v704_v47 = vmul.f32 %v5151_v42, %v696_v63  ;;  %v5441_v41 = vmul.f32 %v5108_v15, %v5365_v5 }
 0x208   : > { %v741_v6 = vadd.f32 %v5238_v39, %v725_v31  ;;  %v719_v4 = vmul.f32 %v5208_v14, %v711_v49  ;;  %v742_v37 = vadd.f32 %v5296_v61, %v726_v50  ;;  %v720_v25 = vmul.f32 %v5208_v14, %v712_v22  ;;  %v666_v43 = vld [vmem:[#allocation2 + $0x2f] sm:$0xff] }
 0x209   : > { %v673_v40 = vld [vmem:[#allocation2 + $0x29] sm:$0xff]  ;;  %v5445_v38 = vmul.f32 %v5112_v16, %v5329_v13  ;;  %v674_v31 = vld [vmem:[#allocation2 + $0x31] sm:$0xff]  ;;  %v698_v63 = vmul.f32 %v5259_v53, %v666_v43  ;;  %v705_v49 = vmul.f32 %v5151_v42, %v697_v57  ;;  %v823_v57 = vmul.f32 %v5112_v16, %v5365_v5 }
 0x20a   : > { %v757_v48 = vadd.f32 %v5323_v51, %v741_v6  ;;  %v727_v39 = vadd.f32 %v719_v4, %v703_v8  ;;  %v713_v50 = vmul.f32 %v5264_v54, %v673_v40  ;;  %v758_v22 = vadd.f32 %v5334_v0, %v742_v37 }
 0x20b   : > { %v728_v61 = vadd.f32 %v720_v25, %v704_v47  ;;  %v714_v52 = vmul.f32 %v5268_v56, %v674_v31  ;;  %v706_v51 = vmul.f32 %v5151_v42, %v698_v63 }
 0x20c   : > { %v5454_v44 = vadd.f32 %v5307_v32, %v757_v48  ;;  %v743_v26 = vadd.f32 %v5348_v35, %v727_v39  ;;  %v721_v6 = vmul.f32 %v5208_v14, %v713_v50  ;;  %v5460_v8 = vadd.f32 %v5326_v19, %v758_v22  ;;  %v668_v43 = vld [vmem:[#allocation2 + $0x3f] sm:$0xff]  ;;  %v667_v22 = vld [vmem:[#allocation2 + $0x37] sm:$0xff] }
 0x20d   : > { %v744_v4 = vadd.f32 %v5352_v27, %v728_v61  ;;  %v722_v25 = vmul.f32 %v5208_v14, %v714_v52 }
 0x20e   : > { %v798_v32 = vmul.f32 %v5276_v9, %v5454_v44  ;;  %v830_v0 = vmul.f32 %v5280_v10, %v5454_v44  ;;  %v759_v35 = vadd.f32 %v5370_v17, %v743_v26  ;;  %v729_v47 = vadd.f32 %v721_v6, %v705_v49 }
 0x20f   : > { %v799_v19 = vmul.f32 %v5276_v9, %v5460_v8  ;;  %v831_v27 = vmul.f32 %v5280_v10, %v5460_v8  ;;  %v760_v52 = vadd.f32 %v5381_v62, %v744_v4  ;;  %v730_v37 = vadd.f32 %v722_v25, %v706_v51 }
 0x210   : > { %v806_v40 = vadd.f32 %v798_v32, %v5311_v33  ;;  %v838_v48 = vadd.f32 %v830_v0, %v5315_v34  ;;  %v5479_v39 = vadd.f32 %v5358_v46, %v759_v35  ;;  %v745_v31 = vadd.f32 %v737_v3, %v729_v47  ;;  %v4149_v47 = vld [vmem:[#allocation8 + $0x88] sm:$0xff]  }
 0x211   : > { %v807_v17 = vadd.f32 %v799_v19, %v5338_v28  ;;  %v839_v26 = vadd.f32 %v831_v27, %v5344_v30  ;;  %v5484_v63 = vadd.f32 %v5384_v24, %v760_v52  ;;  %v746_v50 = vadd.f32 %v5405_v7, %v730_v37  ;;  %v675_v24 = vld [vmem:[#allocation2 + $0x39] sm:$0xff] }
 0x212   : > { %v800_v62 = vmul.f32 %v5276_v9, %v5479_v39  ;;  %v832_v33 = vmul.f32 %v5280_v10, %v5479_v39  ;;  %v761_v34 = vadd.f32 %v753_v2, %v745_v31  ;;  %v700_v46 = vmul.f32 %v5290_v20, %v668_v43  ;;  %v676_v2 = vld [vmem:[#allocation2 + $0x41] sm:$0xff] }
 0x213   : > { %v894_v3 = vpack.c.bf16 %v807_v17, %v806_v40  ;;  %v1028_v61 = vpack.c.bf16 %v839_v26, %v838_v48  ;;  %v801_v28 = vmul.f32 %v5276_v9, %v5484_v63  ;;  %v833_v30 = vmul.f32 %v5280_v10, %v5484_v63  ;;  %v6417_v48 = vld [vmem:[#allocation22_spill] sm:$0xff]  ;;  %v6419_v17 = vld [vmem:[#allocation20_spill] sm:$0xff] }
 0x214   : > { %v808_v7 = vadd.f32 %v800_v62, %v5362_v59  ;;  %v840_v49 = vadd.f32 %v832_v33, %v5374_v55  ;;  %v762_v51 = vadd.f32 %v754_v18, %v746_v50  ;;  %v5499_v6 = vadd.f32 %v5417_v45, %v761_v34  ;;  %v6420_v33 = vld [vmem:[#allocation28_spill] sm:$0xff] }
 0x215   : > { %3873 = vmatprep.mubr.bf16.mxu0 %v894_v3  ;;  %3897 = vmatprep.mubr.bf16.mxu1 %v1028_v61  ;;  %v809_v4 = vadd.f32 %v801_v28, %v5388_v36  ;;  %v841_v25 = vadd.f32 %v833_v30, %v5396_v21  ;;  %v699_v32 = vmul.f32 %v5287_v29, %v667_v22  ;;  %v5524_v31 = vsub.s32 2, %v6417_v48  ;;  %v4150_v61 = vld [vmem:[#allocation8 + $0x90] sm:$0xff]   ;;  %v6421_v28 = vld [vmem:[#allocation45_spill] sm:$0xff] }
 0x216   : > { %v5505_v0 = vadd.f32 %v5431_v60, %v762_v51  ;;  %v802_v59 = vmul.f32 %v5276_v9, %v5499_v6  ;;  %v834_v18 = vmul.f32 %v5280_v10, %v5499_v6  ;;  %v715_v45 = vmul.f32 %v5299_v1, %v675_v24  ;;  %v6422_v24 = vld [vmem:[#allocation57_spill] sm:$0xff] }
 0x217   : > { %v895_v55 = vpack.c.bf16 %v809_v4, %v808_v7  ;;  %v1029_v35 = vpack.c.bf16 %v841_v25, %v840_v49  ;;  %v708_v36 = vmul.f32 %v5151_v42, %v700_v46  ;;  %v716_v21 = vmul.f32 %v5302_v12, %v676_v2  ;;  %6418 = vst [vmem:[#allocation22_spill] sm:$0xff] %v5524_v31  ;;  %v6423_v49 = vld [vmem:[#allocation25_spill] sm:$0xff] }
 0x218   : > { %v803_v19 = vmul.f32 %v5276_v9, %v5505_v0  ;;  %v810_v60 = vadd.f32 %v802_v59, %v5421_v11  ;;  %v835_v27 = vmul.f32 %v5280_v10, %v5505_v0  ;;  %v842_v52 = vadd.f32 %v834_v18, %v5445_v38 }
 0x219   : > { %3874 = vmatmul.mubr.bf16.vlgmr.msra.gmra.mrb[0].mxu0 %v895_v55  ;;  %3898 = vmatmul.mubr.bf16.vlgmr.msra.gmra.mrb[0].mxu1 %v1029_v35  ;;  %v707_v37 = vmul.f32 %v5151_v42, %v699_v32  ;;  %v723_v43 = vmul.f32 %v5208_v14, %v715_v45  ;;  %v724_v40 = vmul.f32 %v5208_v14, %v716_v21  ;;  %v756_v50 = vmul.f32 0.0, %v5124_v23  ;;  %v4151_v45 = vld [vmem:[#allocation8 + $0x98] sm:$0xff]  }
 0x21a   : > { %3906 = vmatpush3.bf16.msra.mxu0 %v6419_v17  ;;  %v811_v11 = vadd.f32 %v803_v19, %v5441_v41  ;;  %v843_v26 = vadd.f32 %v835_v27, %v823_v57  ;;  %v739_v34 = vmul.f32 %v6420_v33, %v5365_v5  ;;  %v740_v22 = vmul.f32 %v6420_v33, %v5377_v58  ;;  %v6425_v27 = vld [vmem:[#allocation50_spill] sm:$0xff] }
 0x21b   : > { %3907 = vmatprep.subr.bf16.mxu0 %v4149_v47  ;;  %v731_v38 = vadd.f32 %v723_v43, %v707_v37  ;;  %v732_v62 = vadd.f32 %v724_v40, %v708_v36  ;;  %v5535_v30 = vrot.slane %v6421_v28, %v5524_v31  ;;  %v755_v7 = vmul.f32 %v5124_v23, %v6422_v24 }
 0x21c   : > { %v896_v46 = vpack.c.bf16 %v811_v11, %v810_v60  ;;  %v1030_v3 = vpack.c.bf16 %v843_v26, %v842_v52  ;;  %v5541_v51 = vrot.slane %v6423_v49, %v5524_v31  ;;  %v771_v25 = vmul.f32 0.0, %v5377_v58  ;;  %v4152_v11 = vld [vmem:[#allocation8 + $0xa0] sm:$0xff]  }
 0x21d   : > { %v747_v41 = vadd.f32 %v739_v34, %v731_v38  ;;  %v748_v57 = vadd.f32 %v740_v22, %v732_v62  ;;  %v772_v32 = vmul.f32 0.0, %v6422_v24  ;;  %v862_v59 = vmul.f32 %v5535_v30, %v5454_v44 }
 0x21e   : > { %3877 = vmatprep.mubr.bf16.mxu0 %v896_v46  ;;  %3901 = vmatprep.mubr.bf16.mxu1 %v1030_v3  ;;  %v863_v18 = vmul.f32 %v5535_v30, %v5460_v8  ;;  %v791_v36 = vmul.f32 %v5108_v15, %v5377_v58  ;;  %v792_v19 = vmul.f32 %v5108_v15, %v6422_v24  ;;  %v4153_v46 = vld [vmem:[#allocation8 + $0xa8] sm:$0xff]   ;;  %v4155_v3 = vld [vmem:[#allocation8 + $0xb8] sm:$0xff]  }
 0x21f   : > { %3908 = vmatpush3.bf16.msra.mxu0 %v4149_v47  ;;  %v763_v2 = vadd.f32 %v755_v7, %v747_v41  ;;  %v764_v4 = vadd.f32 %v756_v50, %v748_v57  ;;  %v6424_v47 = vld [vmem:[#allocation44_spill] sm:$0xff]  ;;  %v824_v60 = vmul.f32 %v5112_v16, %v5377_v58  ;;  %v825_v44 = vmul.f32 %v5112_v16, %v6422_v24  ;;  %v6427_v7 = vld [vmem:[#allocation51_spill] sm:$0xff] }
 0x220   : > { %3909 = vmatprep.subr.bf16.mxu0 %v4150_v61  ;;  %v850_v21 = vmul.f32 %v5541_v51, %v6424_v47  ;;  %v851_v8 = vmul.f32 %v5541_v51, %v6425_v27  ;;  %v865_v28 = vmul.f32 %v5535_v30, %v5484_v63  ;;  %v866_v41 = vmul.f32 %v5535_v30, %v5499_v6 }
 0x221   : > { %v779_v55 = vadd.f32 %v771_v25, %v763_v2  ;;  %v780_v35 = vadd.f32 %v772_v32, %v764_v4  ;;  %v867_v57 = vmul.f32 %v5535_v30, %v5505_v0  ;;  %v852_v49 = vmul.f32 %v5541_v51, %v6427_v7  ;;  %v6428_v2 = vld [vmem:[#allocation56_spill] sm:$0xff] }
 0x222   : > { %v870_v17 = vadd.f32 %v862_v59, %v850_v21  ;;  %v871_v15 = vadd.f32 %v863_v18, %v851_v8  ;;  %v853_v4 = vmul.f32 %v5541_v51, %v6428_v2  ;;  %v854_v25 = vmul.f32 %v5541_v51, %v5329_v13 }
 0x223   : > { %v804_v52 = vmul.f32 %v5276_v9, %v779_v55  ;;  %v805_v37 = vmul.f32 %v5276_v9, %v780_v35  ;;  %v836_v43 = vmul.f32 %v5280_v10, %v779_v55  ;;  %v837_v40 = vmul.f32 %v5280_v10, %v780_v35  ;;  %3910 = vmatpush3.bf16.msra.mxu0 %v4150_v61  ;;  %v4154_v10 = vld [vmem:[#allocation8 + $0xb0] sm:$0xff]  }
 0x224   : > { %3911 = vmatprep.subr.bf16.mxu0 %v4151_v45  ;;  %v1162_v22 = vpack.c.bf16 %v871_v15, %v870_v17  ;;  %v6426_v9 = vmov 0.0   ;;  %v864_v61 = vmul.f32 %v5535_v30, %v5479_v39  ;;  %v855_v39 = vmul.f32 %v5541_v51, %v5365_v5 }
 0x225   : > { %v812_v26 = vadd.f32 %v804_v52, %v791_v36  ;;  %v813_v50 = vadd.f32 %v805_v37, %v792_v19  ;;  %v844_v38 = vadd.f32 %v836_v43, %v824_v60  ;;  %v845_v16 = vadd.f32 %v837_v40, %v825_v44 }
 0x226   : > { %v872_v63 = vadd.f32 %v864_v61, %v852_v49  ;;  %v873_v32 = vadd.f32 %v865_v28, %v853_v4  ;;  %v874_v6 = vadd.f32 %v866_v41, %v854_v25  ;;  %v875_v59 = vadd.f32 %v867_v57, %v855_v39  ;;  %v6430_v61 = vld [vmem:[#allocation31_spill] sm:$0xff]  ;;  %v6431_v57 = vld [vmem:[#allocation30_spill] sm:$0xff] }
 0x227   : > { %v897_v62 = vpack.c.bf16 %v813_v50, %v812_v26  ;;  %v1031_v34 = vpack.c.bf16 %v845_v16, %v844_v38  ;;  %3912 = vmatpush3.bf16.msra.mxu0 %v4151_v45  ;;  %v868_v18 = vmul.f32 %v5535_v30, %v779_v55  ;;  %v869_v45 = vmul.f32 %v5535_v30, %v780_v35 }
 0x228   : > { %3913 = vmatprep.subr.bf16.mxu0 %v4152_v11  ;;  %v1163_v0 = vpack.c.bf16 %v873_v32, %v872_v63  ;;  %v1164_v36 = vpack.c.bf16 %v875_v59, %v874_v6  ;;  %v856_v47 = vmul.f32 %v5541_v51, %v5377_v58  ;;  %v857_v13 = vmul.f32 %v5541_v51, %v6422_v24 }
 0x229   : > { %3878 = vmatmul.mubr.bf16.gmra.mrb[4].mxu0 %v897_v62  ;;  %3902 = vmatmul.mubr.bf16.gmra.mrb[4].mxu1 %v1031_v34  ;;  %v6429_v34 = vld [vmem:[#allocation24_spill] sm:$0xff]  ;;  %v5614_v28 = vcvt.s32.f32 %v6430_v61  ;;  %v5619_v7 = vcvt.s32.f32 %v6431_v57  ;;  %v1839_v25 = vsub.s32 7, %v6417_v48 }
 0x22a   : > { %3921 = vmatprep.mubr.bf16.mxu0 %v1162_v22  ;;  %1579 = vmatprep.mubr.f32.mxu1 %v6426_v9  ;;  %v876_v5 = vadd.f32 %v868_v18, %v856_v47  ;;  %v877_v21 = vadd.f32 %v869_v45, %v857_v13  ;;  %v1328_v22 = vmul.f32 0.015625, %v6429_v34 }
 0x22b   : > { %3914 = vmatpush3.bf16.msra.mxu0 %v4152_v11 }
 0x22c   : > { %3915 = vmatprep.subr.bf16.mxu0 %v4153_v46  ;;  %v1165_v19 = vpack.c.bf16 %v877_v21, %v876_v5  ;;  %v5632_v45 = vrot.slane %v1328_v22, %v1839_v25  ;;  %v6436_v25 = vld [vmem:[#allocation27_spill] sm:$0xff] }
 0x22f   : > { %3916 = vmatpush3.bf16.msra.mxu0 %v4153_v46 }
 0x230   : > { %3917 = vmatprep.subr.bf16.mxu0 %v4154_v10 }
 0x233   : > { %3918 = vmatpush3.bf16.msra.mxu0 %v4154_v10 }
 0x234   : > { %3919 = vmatprep.subr.bf16.mxu0 %v4155_v3 }
 0x237   : > { %3920 = vmatpush3.bf16.msra.mxu0 %v4155_v3 }
 0x23a   : > { %3922 = vmatmul.mubr.bf16.vlgmr.msra.gmra.mrb[8].mxu0 %v1163_v0 }
 0x23b   : > { %3925 = vmatprep.mubr.bf16.mxu0 %v1164_v36 }
 0x242   : > { %3926 = vmatmul.mubr.bf16.gmra.mrb[12].mxu0 %v1165_v19  ;;  %v5637_v19 = vcvt.s32.f32 %v6417_v48 }
 0x243   : > { %1716 = vmatprep.mubr.f32.mxu0 %v6426_v9  ;;  %v1360_v9 = vsub.s32 6, %v6417_v48 }
 0x245   : > { %v5616_v41 = vrot.slane %v1328_v22, %v1360_v9 }
 0x247   : > { %v1367_v4 = vmul.f32 %v5616_v41, %v5614_v28  ;;  %v1366_v39 = vmul.f32 %v5616_v41, %v5619_v7 }
 0x249   : > { %v1399_v18 = vsub.f32 0.0, %v1367_v4  ;;  %v1398_v47 = vsub.f32 0.0, %v1366_v39 }
 0x2ec   : > { %v3875_v60 = vpop.f32.mrb[0].mxu0  ;;  %v5589_v44 = vpop.f32.mrb[0].mxu1 }
 0x2ed   : > { %v980_v55 = vpop.f32.mrb[1].mxu0  ;;  %v5591_v30 = vpop.f32.mrb[1].mxu1 }
 0x2ee   : > { %v3876_v35 = vpop.f32.mrb[2].mxu0  ;;  %v5593_v27 = vpop.f32.mrb[2].mxu1 }
 0x2ef   : > { %v983_v58 = vpop.f32.mrb[3].mxu0  ;;  %v5595_v8 = vpop.f32.mrb[3].mxu1 }
 0x2fc   : > { %v5597_v24 = vpop.f32.mrb[4].mxu0  ;;  %v5599_v51 = vpop.f32.mrb[4].mxu1 }
 0x2fd   : > { %v1331_v52 = vmax.f32 %v3875_v60, %v5597_v24  ;;  %v996_v37 = vpop.f32.mrb[5].mxu0  ;;  %v5602_v43 = vpop.f32.mrb[5].mxu1 }
 0x2fe   : > { %v1329_v40 = vmax.f32 %v980_v55, %v996_v37  ;;  %v5604_v17 = vpop.f32.mrb[6].mxu0  ;;  %v5606_v15 = vpop.f32.mrb[6].mxu1 }
 0x2ff   : > { %v1332_v11 = vmax.f32 %v3876_v35, %v5604_v17  ;;  %v999_v26 = vpop.f32.mrb[7].mxu0  ;;  %v5609_v50 = vpop.f32.mrb[7].mxu1 }
 0x300   : > { %v1330_v38 = vmax.f32 %v983_v58, %v999_v26 }
 0x301   : > { %v1334_v16 = vmax.f32 %v1331_v52, %v1332_v11 }
 0x302   : > { %v1333_v62 = vmax.f32 %v1329_v40, %v1330_v38  ;;  %v6432_v40 = vld [vmem:[#allocation23_spill] sm:$0xff] }
 0x303   : > { %v5640_v11 = vcvt.s32.f32 %v6432_v40 }
 0x304   : > { %v1335_v46 = vmax.f32 %v1333_v62, %v1334_v16 }
 0x306   : > { %v1336_v10 = vrot.slane %v1335_v46, 4 }
 0x308   : > { %v1337_v3 = vmax.f32 %v1335_v46, %v1336_v10 }
 0x30a   : > { %v1338_v49 = vrot.slane %v1337_v3, 2 }
 0x30c   : > { %v1339_v2 = vmax.f32 %v1337_v3, %v1338_v49 }
 0x30d   : > { %v5626_v63 = vpop.f32.mrb[8].mxu0 }
 0x30e   : > { %v1340_v32 = vrot.slane %v1339_v2, 1  ;;  %v5628_v6 = vpop.f32.mrb[9].mxu0 }
 0x30f   : > { %v5630_v59 = vpop.f32.mrb[10].mxu0 }
 0x310   : > { %v1341_v0 = vmax.f32 %v1339_v2, %v1340_v32  ;;  %v5634_v36 = vpop.f32.mrb[11].mxu0 }
 0x312   : > { %v1347_v13 = vsub.f32 %v999_v26, %v1341_v0  ;;  %v1346_v5 = vsub.f32 %v996_v37, %v1341_v0  ;;  %v1342_v21 = vsub.f32 %v980_v55, %v1341_v0  ;;  %v1343_v52 = vsub.f32 %v983_v58, %v1341_v0  ;;  %v6434_v26 = vld [vmem:[#allocation26_spill] sm:$0xff] }
 0x313   : > { %v1344_v38 = vsub.f32 %v3875_v60, %v1341_v0  ;;  %v1345_v16 = vsub.f32 %v3876_v35, %v1341_v0  ;;  %v5646_v37 = vcvt.s32.f32 %v6434_v26  ;;  %v1362_v58 = vmul.f32 %v5616_v41, %v5637_v19 }
 0x314   : > { %v1375_v62 = vadd.f32 %v1367_v4, %v1347_v13  ;;  %v1407_v34 = vadd.f32 %v1399_v18, %v1347_v13  ;;  %v1846_v22 = vadd.f32 %v5632_v45, %v1347_v13  ;;  %v1374_v46 = vadd.f32 %v1366_v39, %v1346_v5 }
 0x315   : > { %v1406_v9 = vadd.f32 %v1398_v47, %v1346_v5  ;;  %v5643_v10 = vpop.f32.mrb[12].mxu0  ;;  %v1363_v60 = vmul.f32 %v5616_v41, %v5640_v11  ;;  %v5655_v39 = vcvt.s32.f32 %v6436_v25  ;;  %v1364_v18 = vmul.f32 %v5616_v41, %v5646_v37  ;;  %v6438_v47 = vld [vmem:[#allocation37_spill] sm:$0xff] }
 0x316   : > { %6433 = vst [vmem:[#allocation20_spill] sm:$0xff] %v5643_v10  ;;  %v1388_v55 = vmul.f32 1.442695, %v1375_v62  ;;  %v1420_v3 = vmul.f32 1.442695, %v1407_v34  ;;  %v5652_v4 = vpop.f32.mrb[13].mxu0  ;;  %v5662_v13 = vcvt.s32.f32 %v6438_v47  ;;  %v1348_v1 = vsub.f32 %v5597_v24, %v1341_v0 }
 0x317   : > { %v1859_v49 = vmul.f32 1.442695, %v1846_v22  ;;  %v1386_v2 = vmul.f32 1.442695, %v1374_v46  ;;  %v1418_v35 = vmul.f32 1.442695, %v1406_v9  ;;  %v1365_v46 = vmul.f32 %v5616_v41, %v5655_v39 }
 0x318   : > { %4268 = vpow2.f32 %v1388_v55  ;;  %6435 = vst [vmem:[#allocation45_spill] sm:$0xff] %v5652_v4  ;;  %v5657_v32 = vpop.f32.mrb[14].mxu0  ;;  %6439 = vst [vmem:[#allocation25_spill] sm:$0xff] %v5662_v13  ;;  %v1394_v34 = vsub.f32 0.0, %v1362_v58  ;;  %v1395_v22 = vsub.f32 0.0, %v1363_v60  ;;  %v6441_v9 = vld [vmem:[#allocation38_spill] sm:$0xff]  ;;  %v1368_v20 = vmul.f32 %v5616_v41, %v5662_v13 }
 0x319   : > { %4270 = vpow2.f32 %v1420_v3  ;;  %6437 = vst [vmem:[#allocation57_spill] sm:$0xff] %v5657_v32  ;;  %v5664_v62 = vpop.f32.mrb[15].mxu0  ;;  %v5669_v55 = vcvt.s32.f32 %v6441_v9  ;;  %v1370_v3 = vadd.f32 %v1362_v58, %v1342_v21  ;;  %v1396_v12 = vsub.f32 0.0, %v1364_v18 }
 0x31a   : > { %4272 = vpow2.f32 %v1859_v49  ;;  %6440 = vst [vmem:[#allocation44_spill] sm:$0xff] %v5664_v62  ;;  %v1371_v49 = vadd.f32 %v1363_v60, %v1343_v52  ;;  %v1402_v29 = vadd.f32 %v1394_v34, %v1342_v21  ;;  %v1349_v56 = vsub.f32 %v5604_v17, %v1341_v0 }
 0x31b   : > { %4274 = vpow2.f32 %v1386_v2  ;;  %6442 = vst [vmem:[#allocation50_spill] sm:$0xff] %v5669_v55  ;;  %v1841_v2 = vadd.f32 %v5632_v45, %v1342_v21  ;;  %v1842_v54 = vadd.f32 %v5632_v45, %v1343_v52  ;;  %v1372_v53 = vadd.f32 %v1364_v18, %v1344_v38 }
 0x31c   : > { %4276 = vpow2.f32 %v1418_v35  ;;  %v1403_v35 = vadd.f32 %v1395_v22, %v1343_v52  ;;  %v1397_v23 = vsub.f32 0.0, %v1365_v46  ;;  %v1378_v33 = vmul.f32 1.442695, %v1370_v3 }
 0x31d   : > { %v1373_v14 = vadd.f32 %v1365_v46, %v1345_v16  ;;  %v1369_v58 = vmul.f32 %v5616_v41, %v5669_v55  ;;  %v1400_v24 = vsub.f32 0.0, %v1368_v20  ;;  %v1380_v31 = vmul.f32 1.442695, %v1371_v49 }
 0x31e   : > { %v1410_v60 = vmul.f32 1.442695, %v1402_v29  ;;  %v1404_v34 = vadd.f32 %v1396_v12, %v1344_v38  ;;  %v1843_v17 = vadd.f32 %v5632_v45, %v1344_v38  ;;  %v1412_v52 = vmul.f32 1.442695, %v1403_v35 }
 0x31f   : > { %v1844_v18 = vadd.f32 %v5632_v45, %v1345_v16  ;;  %v1845_v22 = vadd.f32 %v5632_v45, %v1346_v5  ;;  %v1382_v29 = vmul.f32 1.442695, %v1372_v53  ;;  %v1405_v12 = vadd.f32 %v1397_v23, %v1345_v16 }
 0x320   : > { %v5697_v38 = vadd.f32 %v5632_v45, %v1348_v1  ;;  %4278 = vpow2.f32 %v1378_v33  ;;  %v1384_v32 = vmul.f32 1.442695, %v1373_v14  ;;  %v1376_v5 = vadd.f32 %v1368_v20, %v1348_v1 }
 0x321   : > { %4280 = vpow2.f32 %v1380_v31  ;;  %v1414_v23 = vmul.f32 1.442695, %v1404_v34  ;;  %v1848_v20 = vadd.f32 %v5632_v45, %v1349_v56  ;;  %v1401_v31 = vsub.f32 0.0, %v1369_v58 }
 0x322   : > { %v5679_v42 = vpop.eup %4268  ;;  %4282 = vpow2.f32 %v1410_v60  ;;  %v1390_v53 = vmul.f32 1.442695, %v1376_v5  ;;  %v1408_v60 = vadd.f32 %v1400_v24, %v1348_v1  ;;  %v1851_v1 = vmul.f32 1.442695, %v1842_v54 }
 0x323   : > { %v5682_v0 = vpop.eup %4270  ;;  %v5686_v21 = vmul.f32 %v5679_v42, %v5609_v50  ;;  %4284 = vpow2.f32 %v1412_v52 }
 0x324   : > { %v5690_v46 = vpop.eup %4272  ;;  %v5694_v3 = vmul.f32 %v5682_v0, %v5609_v50  ;;  %4286 = vpow2.f32 %v1382_v29  ;;  %v1422_v4 = vmul.f32 1.442695, %v1408_v60  ;;  %v1849_v29 = vmul.f32 1.442695, %v1841_v2 }
 0x325   : > { %6443 = vst [vmem:[#allocation51_spill] sm:$0xff] %v5690_v46  ;;  %v5699_v49 = vpop.eup %4274  ;;  %v5703_v35 = vmul.f32 %v5690_v46, %v5609_v50  ;;  %v1416_v50 = vmul.f32 1.442695, %v1405_v12  ;;  %4288 = vpow2.f32 %v1384_v32  ;;  %v1377_v46 = vadd.f32 %v1369_v58, %v1349_v56 }
 0x326   : > { %v5705_v10 = vpop.eup %4276  ;;  %v5709_v62 = vmul.f32 %v5699_v49, %v5602_v43  ;;  %4290 = vpow2.f32 %v1414_v23  ;;  %v1853_v58 = vmul.f32 1.442695, %v1843_v17 }
 0x327   : > { %6444 = vst [vmem:[#allocation56_spill] sm:$0xff] %v5703_v35  ;;  %v5715_v16 = vmul.f32 %v5705_v10, %v5602_v43  ;;  %4292 = vpow2.f32 %v1416_v50  ;;  %v1409_v35 = vadd.f32 %v1401_v31, %v1349_v56  ;;  %v1392_v14 = vmul.f32 1.442695, %v1377_v46 }
 0x328   : > { %4294 = vpow2.f32 %v1390_v53  ;;  %v1855_v50 = vmul.f32 1.442695, %v1844_v18 }
 0x329   : > { %v1424_v12 = vmul.f32 1.442695, %v1409_v35  ;;  %4296 = vpow2.f32 %v1392_v14 }
 0x32a   : > { %v4279_v45 = vpop.eup %4278  ;;  %4298 = vpow2.f32 %v1422_v4  ;;  %v1861_v4 = vmul.f32 1.442695, %v5697_v38 }
 0x32b   : > { %v4281_v55 = vpop.eup %4280  ;;  %v1474_v52 = vmul.f32 %v4279_v45, %v5591_v30  ;;  %4300 = vpow2.f32 %v1424_v12  ;;  %v6445_v12 = vpack.c.bf16 %v5679_v42, %v5699_v49  ;;  %v6448_v49 = vld [vmem:[#allocation21_spill] sm:$0xff] }
 0x32c   : > { %v4283_v33 = vpop.eup %4282  ;;  %v3977_v13 = vpack.c.bf16 %v4281_v55, %v4279_v45  ;;  %v1475_v34 = vmul.f32 %v4281_v55, %v5595_v8  ;;  %v1857_v55 = vmul.f32 1.442695, %v1845_v22  ;;  %4302 = vpow2.f32 %v1849_v29 }
 0x32d   : > { %v4285_v5 = vpop.eup %4284  ;;  %v1482_v32 = vmul.f32 %v4283_v33, %v5591_v30  ;;  %4304 = vpow2.f32 %v1851_v1  ;;  %vm1426_vm8 = vcmp.lt.s32.totalorder %v6448_v49, %v6417_v48  ;;  %vm1450_vm9 = vcmp.gt.s32.totalorder %v6448_v49, %v6417_v48 }
 0x32e   : > { %v4287_v56 = vpop.eup %4286  ;;  %3978 = vmatprep.subr.bf16.mxu1 %v3977_v13  ;;  %v3993_v24 = vpack.c.bf16 %v4285_v5, %v4283_v33  ;;  %v3979_v46 = vpack.c.bf16 %v1475_v34, %v1474_v52  ;;  %v1483_v23 = vmul.f32 %v4285_v5, %v5595_v8  ;;  %v1863_v33 = vmul.f32 1.442695, %v1848_v20 }
 0x32f   : > { %v4289_v53 = vpop.eup %4288  ;;  %v1476_v35 = vmul.f32 %v4287_v56, %v5589_v44  ;;  %4306 = vpow2.f32 %v1853_v58  ;;  %v6446_v20 = vpack.c.bf16 %v5682_v0, %v5705_v10  ;;  %v6447_v5 = vpack.c.bf16 %v5686_v21, %v5709_v62 }
 0x330   : > { %v4291_v2 = vpop.eup %4290  ;;  %3994 = vmatprep.subr.bf16.mxu0 %v3993_v24  ;;  %3980 = vmatpush1.bf16.msra.mxu1 %v3979_v46  ;;  %v3995_v31 = vpack.c.bf16 %v1483_v23, %v1482_v32  ;;  %v3981_v14 = vpack.c.bf16 %v4289_v53, %v4287_v56  ;;  %v1477_v54 = vmul.f32 %v4289_v53, %v5593_v27  ;;  %4308 = vpow2.f32 %v1855_v50 }
 0x331   : > { %v4293_v13 = vpop.eup %4292  ;;  %v1484_v17 = vmul.f32 %v4291_v2, %v5589_v44  ;;  %4310 = vpow2.f32 %v1857_v55  ;;  %v6449_v10 = vpack.c.bf16 %v5694_v3, %v5715_v16  ;;  %v5763_v16 = vld [vmem:[#allocation2] sm:$0xff]  ;;  %vm1427_vm11 = vcmp.lt.s32.totalorder %v6448_v49, %v6432_v40 }
 0x332   : > { %v4295_v34 = vpop.eup %4294  ;;  %3996 = vmatpush1.bf16.msra.mxu0 %v3995_v31  ;;  %3982 = vmatprep.subr.bf16.mxu1 %v3981_v14  ;;  %v3997_v18 = vpack.c.bf16 %v4293_v13, %v4291_v2  ;;  %v3983_v22 = vpack.c.bf16 %v1477_v54, %v1476_v35  ;;  %v1485_v60 = vmul.f32 %v4293_v13, %v5593_v27  ;;  %4312 = vpow2.f32 %v1861_v4 }
 0x333   : > { %v1480_v45 = vmul.f32 %v4295_v34, %v5599_v51  ;;  %4314 = vpow2.f32 %v1863_v33  ;;  %v4297_v38 = vpop.eup %4296  ;;  %v3582_v53 = vsel %vm1426_vm8, 1.0, %v5763_v16  ;;  %v3590_v2 = vsel %vm1450_vm9, 1.0, %v5763_v16 }
 0x334   : > { %3998 = vmatprep.subr.bf16.mxu0 %v3997_v18  ;;  %3984 = vmatpush1.bf16.msra.mxu1 %v3983_v22  ;;  %v3999_v52 = vpack.c.bf16 %v1485_v60, %v1484_v17  ;;  %v4299_v29 = vpop.eup %4298  ;;  %v3989_v32 = vpack.c.bf16 %v4297_v38, %v4295_v34  ;;  %v1481_v1 = vmul.f32 %v4297_v38, %v5606_v15  ;;  %v3583_v54 = vsel %vm1427_vm11, 1.0, %v5763_v16  ;;  %v4156_v18 = vld [vmem:[#allocation8 + $0xc0] sm:$0xff]   ;;  %v4157_v22 = vld [vmem:[#allocation8 + $0xc8] sm:$0xff]   ;;  %v4159_v60 = vld [vmem:[#allocation8 + $0xd8] sm:$0xff]  }
 0x335   : > { %3986 = vmatprep.subr.bf16.mxu1 %v6445_v12  ;;  %v4301_v58 = vpop.eup %4300  ;;  %v1488_v42 = vmul.f32 %v4299_v29, %v5599_v51  ;;  %vm1451_vm12 = vcmp.gt.s32.totalorder %v6448_v49, %v6432_v40  ;;  %vm1428_vm13 = vcmp.lt.s32.totalorder %v6448_v49, %v6434_v26  ;;  %vm1452_vm14 = vcmp.gt.s32.totalorder %v6448_v49, %v6434_v26  ;;  %v4162_v12 = vld [vmem:[#allocation8 + $0xf0] sm:$0xff]   ;;  %v4163_v38 = vld [vmem:[#allocation8 + $0xf8] sm:$0xff]  }
 0x336   : > { %4000 = vmatpush1.bf16.msra.mxu0 %v3999_v52  ;;  %v5747_v56 = vpop.eup %4302  ;;  %v4005_v0 = vpack.c.bf16 %v4301_v58, %v4299_v29  ;;  %v3991_v24 = vpack.c.bf16 %v1481_v1, %v1480_v45  ;;  %v1489_v62 = vmul.f32 %v4301_v58, %v5606_v15  ;;  %vm1429_vm15 = vcmp.lt.s32.totalorder %v6448_v49, %v6436_v25  ;;  %v4160_v45 = vld [vmem:[#allocation8 + $0xe0] sm:$0xff]   ;;  %v4161_v52 = vld [vmem:[#allocation8 + $0xe8] sm:$0xff]  }
 0x337   : > { %4002 = vmatprep.subr.bf16.mxu0 %v6446_v20  ;;  %v5753_v21 = vpop.eup %4304  ;;  %v5759_v46 = vmul.f32 %v5747_v56, %v5591_v30  ;;  %vm1453_vm0 = vcmp.gt.s32.totalorder %v6448_v49, %v6436_v25  ;;  %v3585_v26 = vsel %vm1429_vm15, 1.0, %v5763_v16  ;;  %vm1430_vm1 = vcmp.lt.s32.totalorder %v6448_v49, %v6431_v57 }
 0x338   : > { %3988 = vmatpush1.bf16.msra.mxu1 %v6447_v5  ;;  %v4007_v3 = vpack.c.bf16 %v1489_v62, %v1488_v42  ;;  %v5768_v35 = vmul.f32 %v5753_v21, %v5595_v8  ;;  %v3593_v13 = vsel %vm1453_vm0, 1.0, %v5763_v16  ;;  %vm1454_vm2 = vcmp.gt.s32.totalorder %v6448_v49, %v6431_v57 }
 0x339   : > { %3990 = vmatprep.subr.bf16.mxu1 %v3989_v32  ;;  %v5761_v23 = vpop.eup %4306  ;;  %v3586_v25 = vsel %vm1430_vm1, 1.0, %v5763_v16  ;;  %vm1431_vm3 = vcmp.lt.s32.totalorder %v6448_v49, %v6430_v61  ;;  %v3594_v17 = vsel %vm1454_vm2, 1.0, %v5763_v16  ;;  %vm1455_vm4 = vcmp.gt.s32.totalorder %v6448_v49, %v6430_v61 }
 0x33a   : > { %4004 = vmatpush1.bf16.msra.mxu0 %v6449_v10  ;;  %v5770_v50 = vpop.eup %4308  ;;  %v5776_v30 = vmul.f32 %v5761_v23, %v5589_v44  ;;  %v3587_v57 = vsel %vm1431_vm3, 1.0, %v5763_v16  ;;  %vm1432_vm5 = vcmp.lt.s32.totalorder %v6448_v49, %v6438_v47  ;;  %v3595_v4 = vsel %vm1455_vm4, 1.0, %v5763_v16 }
 0x33b   : > { %4006 = vmatprep.subr.bf16.mxu0 %v4005_v0  ;;  %v5778_v55 = vpop.eup %4310  ;;  %v5783_v31 = vmul.f32 %v5770_v50, %v5593_v27  ;;  %vm1456_vm6 = vcmp.gt.s32.totalorder %v6448_v49, %v6438_v47  ;;  %v3588_v61 = vsel %vm1432_vm5, 1.0, %v5763_v16  ;;  %vm1433_vm7 = vcmp.lt.s32.totalorder %v6448_v49, %v6441_v9 }
 0x33c   : > { %3992 = vmatpush1.bf16.msra.mxu1 %v3991_v24  ;;  %v5785_v8 = vpop.eup %4312  ;;  %v5792_v44 = vmul.f32 %v5778_v55, %v5602_v43  ;;  %v3591_v43 = vsel %vm1451_vm12, 1.0, %v5763_v16  ;;  %v3596_v33 = vsel %vm1456_vm6, 1.0, %v5763_v16  ;;  %vm1457_vm8 = vcmp.gt.s32.totalorder %v6448_v49, %v6441_v9  ;;  %v4158_v9 = vld [vmem:[#allocation8 + $0xd0] sm:$0xff]  }
 0x33d   : > { %v5794_v14 = vpop.eup %4314  ;;  %v5800_v27 = vmul.f32 %v5785_v8, %v5599_v51  ;;  %v3584_v51 = vsel %vm1428_vm13, 1.0, %v5763_v16  ;;  %v3589_v47 = vsel %vm1433_vm7, 1.0, %v5763_v16  ;;  %v3597_v34 = vsel %vm1457_vm8, 1.0, %v5763_v16  ;;  %3929 = vmatprep.subr.bf16.mxu1 %v4156_v18 }
 0x33e   : > { %4008 = vmatpush1.bf16.msra.mxu0 %v4007_v3  ;;  %v5807_v40 = vmul.f32 %v5794_v14, %v5606_v15  ;;  %v3592_v15 = vsel %vm1452_vm14, 1.0, %v5763_v16  ;;  %v3614_v20 = vadd.f32 -1.0, %v5637_v19  ;;  %v3615_v5 = vadd.f32 -1.0, %v5640_v11 }
 0x33f   : > { %3598 = vmatmul.mubr.msk.f32.vlgmr.msra.gmra.mrb[8].mxu1 %vm1490_vm10, %v3582_v53  ;;  %v1805_v32 = vadd.f32 1.0, %v5637_v19  ;;  %v3574_v1 = vmul.f32 -1.442695, %v5628_v6  ;;  %v3575_v58 = vmul.f32 -1.442695, %v5634_v36  ;;  %v3616_v10 = vadd.f32 -1.0, %v5646_v37 }
 0x340   : > { %1585 = vmatprep.mubr.f32.mxu1 %v5763_v16  ;;  %3930 = vmatpush3.bf16.msra.mxu1 %v4156_v18  ;;  %v1773_v29 = vsub.f32 0.0, %v3614_v20  ;;  %v1774_v49 = vsub.f32 0.0, %v3615_v5  ;;  %v1806_v24 = vadd.f32 1.0, %v5640_v11  ;;  %v3617_v19 = vadd.f32 -1.0, %v5655_v39 }
 0x341   : > { %3606 = vmatmul.mubr.msk.f32.vlgmr.msra.gmra.mrb[16].mxu0 %vm1490_vm10, %v3590_v2  ;;  %3931 = vmatprep.subr.bf16.mxu1 %v4157_v22  ;;  %v1813_v0 = vmul.f32 %v1805_v32, %v5616_v41  ;;  %4316 = vpow2.f32 %v3574_v1  ;;  %v1807_v53 = vadd.f32 1.0, %v5646_v37  ;;  %v3618_v2 = vadd.f32 -1.0, %v5619_v7 }
 0x342   : > { %1722 = vmatprep.mubr.f32.mxu0 %v5763_v16  ;;  %v1781_v42 = vmul.f32 %v1773_v29, %v5616_v41  ;;  %4318 = vpow2.f32 %v3575_v58  ;;  %v1782_v3 = vmul.f32 %v1774_v49, %v5616_v41  ;;  %v1814_v36 = vmul.f32 %v1806_v24, %v5616_v41 }
 0x343   : > { %3599 = vmatmul.mubr.msk.f32.gmra.mrb[10].mxu1 %vm1490_vm10, %v3583_v54  ;;  %v1821_v6 = vmul.f32 1.442695, %v1813_v0 }
 0x344   : > { %1591 = vmatprep.mubr.f32.mxu1 %v5763_v16  ;;  %3932 = vmatpush3.bf16.msra.mxu1 %v4157_v22  ;;  %v1789_v62 = vmul.f32 1.442695, %v1781_v42  ;;  %v1791_v54 = vmul.f32 1.442695, %v1782_v3  ;;  %v1823_v11 = vmul.f32 1.442695, %v1814_v36 }
 0x345   : > { %3607 = vmatmul.mubr.msk.f32.gmra.mrb[18].mxu0 %vm1490_vm10, %v3591_v43  ;;  %3933 = vmatprep.subr.bf16.mxu1 %v4158_v9  ;;  %v6451_v42 = vld [vmem:[#allocation50_spill] sm:$0xff] }
 0x346   : > { %1728 = vmatprep.mubr.f32.mxu0 %v5763_v16  ;;  %4320 = vpow2.f32 %v1789_v62  ;;  %v3621_v49 = vadd.f32 -1.0, %v6451_v42 }
 0x347   : > { %3600 = vmatmul.mubr.msk.f32.gmra.mrb[12].mxu1 %vm1490_vm10, %v3584_v51  ;;  %v1776_v51 = vsub.f32 0.0, %v3617_v19  ;;  %4322 = vpow2.f32 %v1821_v6 }
 0x348   : > { %1597 = vmatprep.mubr.f32.mxu1 %v5763_v16  ;;  %3934 = vmatpush3.bf16.msra.mxu1 %v4158_v9  ;;  %4324 = vpow2.f32 %v1791_v54  ;;  %v1810_v9 = vadd.f32 1.0, %v5614_v28 }
 0x349   : > { %3608 = vmatmul.mubr.msk.f32.gmra.mrb[20].mxu0 %vm1490_vm10, %v3592_v15  ;;  %3935 = vmatprep.subr.bf16.mxu1 %v4159_v60  ;;  %v1815_v15 = vmul.f32 %v1807_v53, %v5616_v41  ;;  %4326 = vpow2.f32 %v1823_v11  ;;  %v1780_v11 = vsub.f32 0.0, %v3621_v49 }
 0x34a   : > { %1734 = vmatprep.mubr.f32.mxu0 %v5763_v16  ;;  %v1818_v32 = vmul.f32 %v1810_v9, %v5616_v41 }
 0x34b   : > { %3601 = vmatmul.mubr.msk.f32.gmra.mrb[14].mxu1 %vm1490_vm10, %v3585_v26  ;;  %v1808_v26 = vadd.f32 1.0, %v5655_v39 }
 0x34c   : > { %1603 = vmatprep.mubr.f32.mxu1 %v5763_v16  ;;  %3936 = vmatpush3.bf16.msra.mxu1 %v4159_v60  ;;  %v1831_v53 = vmul.f32 1.442695, %v1818_v32 }
 0x34d   : > { %3609 = vmatmul.mubr.msk.f32.gmra.mrb[22].mxu0 %vm1490_vm10, %v3593_v13  ;;  %3937 = vmatprep.subr.bf16.mxu1 %v4160_v45  ;;  %v3619_v13 = vadd.f32 -1.0, %v5614_v28  ;;  %v1816_v18 = vmul.f32 %v1808_v26, %v5616_v41 }
 0x34e   : > { %1740 = vmatprep.mubr.f32.mxu0 %v5763_v16 }
 0x34f   : > { %3602 = vmatmul.mubr.msk.f32.gmra.mrb[16].mxu1 %vm1490_vm10, %v3586_v25  ;;  %v3576_v25 = vmul.f32 -1.442695, %v5626_v63  ;;  %v1778_v39 = vsub.f32 0.0, %v3619_v13 }
 0x350   : > { %1609 = vmatprep.mubr.f32.mxu1 %v5763_v16  ;;  %3938 = vmatpush3.bf16.msra.mxu1 %v4160_v45 }
 0x351   : > { %3610 = vmatmul.mubr.msk.f32.gmra.mrb[24].mxu0 %vm1490_vm10, %v3594_v17  ;;  %3939 = vmatprep.subr.bf16.mxu1 %v4161_v52  ;;  %v1777_v17 = vsub.f32 0.0, %v3618_v2  ;;  %4328 = vpow2.f32 %v3576_v25  ;;  %v1786_v20 = vmul.f32 %v1778_v39, %v5616_v41 }
 0x352   : > { %1746 = vmatprep.mubr.f32.mxu0 %v5763_v16 }
 0x353   : > { %3603 = vmatmul.mubr.msk.f32.gmra.mrb[18].mxu1 %vm1490_vm10, %v3587_v57  ;;  %v4317_v57 = vpop.eup %4316  ;;  %v1785_v63 = vmul.f32 %v1777_v17, %v5616_v41  ;;  %v1799_v19 = vmul.f32 1.442695, %v1786_v20 }
 0x354   : > { %1615 = vmatprep.mubr.f32.mxu1 %v5763_v16  ;;  %3940 = vmatpush3.bf16.msra.mxu1 %v4161_v52  ;;  %v1303_v22 = vadd.f32 1.0, %v4317_v57  ;;  %v6450_v52 = vld [vmem:[#allocation25_spill] sm:$0xff]  ;;  %v1812_v57 = vadd.f32 1.0, %v6451_v42 }
 0x355   : > { %3611 = vmatmul.mubr.msk.f32.gmra.mrb[26].mxu0 %vm1490_vm10, %v3595_v4  ;;  %3941 = vmatprep.subr.bf16.mxu1 %v4162_v12  ;;  %v1784_v4 = vmul.f32 %v1776_v51, %v5616_v41  ;;  %v1797_v5 = vmul.f32 1.442695, %v1785_v63  ;;  %v1811_v24 = vadd.f32 1.0, %v6450_v52 }
 0x356   : > { %1752 = vmatprep.mubr.f32.mxu0 %v5763_v16 }
 0x357   : > { %3604 = vmatmul.mubr.msk.f32.gmra.mrb[20].mxu1 %vm1490_vm10, %v3588_v61  ;;  %v1809_v61 = vadd.f32 1.0, %v5619_v7  ;;  %v1795_v60 = vmul.f32 1.442695, %v1784_v4  ;;  %v3620_v7 = vadd.f32 -1.0, %v6450_v52  ;;  %v1819_v17 = vmul.f32 %v1811_v24, %v5616_v41 }
 0x358   : > { %1621 = vmatprep.mubr.f32.mxu1 %v5763_v16  ;;  %3942 = vmatpush3.bf16.msra.mxu1 %v4162_v12 }
 0x359   : > { %3612 = vmatmul.mubr.msk.f32.gmra.mrb[28].mxu0 %vm1490_vm10, %v3596_v33  ;;  %3943 = vmatprep.subr.bf16.mxu1 %v4163_v38  ;;  %v4319_v33 = vpop.eup %4318  ;;  %v1817_v45 = vmul.f32 %v1809_v61, %v5616_v41  ;;  %v1779_v58 = vsub.f32 0.0, %v3620_v7 }
 0x35a   : > { %1758 = vmatprep.mubr.f32.mxu0 %v5763_v16  ;;  %v1775_v16 = vsub.f32 0.0, %v3616_v10  ;;  %v1304_v12 = vadd.f32 1.0, %v4319_v33 }
 0x35b   : > { %3605 = vmatmul.mubr.msk.f32.gmra.mrb[22].mxu1 %vm1490_vm10, %v3589_v47  ;;  %v3577_v47 = vmul.f32 -1.442695, %v5630_v59  ;;  %v4321_v59 = vpop.eup %4320  ;;  %v1829_v28 = vmul.f32 1.442695, %v1817_v45  ;;  %v1787_v51 = vmul.f32 %v1779_v58, %v5616_v41 }
 0x35c   : > { %3944 = vmatpush3.bf16.msra.mxu1 %v4163_v38  ;;  %v1783_v43 = vmul.f32 %v1775_v16, %v5616_v41  ;;  %v1827_v38 = vmul.f32 1.442695, %v1816_v18  ;;  %v4323_v29 = vpop.eup %4322 }
 0x35d   : > { %3613 = vmatmul.mubr.msk.f32.gmra.mrb[30].mxu0 %vm1490_vm10, %v3597_v34  ;;  %v1825_v34 = vmul.f32 1.442695, %v1815_v15  ;;  %v4325_v62 = vpop.eup %4324  ;;  %v1801_v7 = vmul.f32 1.442695, %v1787_v51 }
 0x35e   : > { %v1793_v37 = vmul.f32 1.442695, %v1783_v43  ;;  %v4327_v2 = vpop.eup %4326 }
 0x35f   : > { %v4329_v15 = vpop.eup %4328 }
 0x360   : > { %4330 = vpow2.f32 %v1793_v37 }
 0x361   : > { %4332 = vpow2.f32 %v3577_v47 }
 0x362   : > { %4334 = vpow2.f32 %v1825_v34  ;;  %v6452_v34 = vld [vmem:[#allocation45_spill] sm:$0xff] }
 0x363   : > { %4336 = vrcp.f32 %v1303_v22  ;;  %v3578_v18 = vmul.f32 -1.442695, %v6452_v34 }
 0x364   : > { %4338 = vpow2.f32 %v1795_v60 }
 0x365   : > { %4340 = vrcp.f32 %v1304_v12  ;;  %v1788_v12 = vmul.f32 %v1780_v11, %v5616_v41 }
 0x366   : > { %4342 = vpow2.f32 %v1827_v38 }
 0x367   : > { %4344 = vpow2.f32 %v1797_v5  ;;  %v1833_v5 = vmul.f32 1.442695, %v1819_v17 }
 0x368   : > { %4346 = vpow2.f32 %v1829_v28 }
 0x369   : > { %4348 = vpow2.f32 %v1799_v19  ;;  %v1803_v19 = vmul.f32 1.442695, %v1788_v12 }
 0x36a   : > { %v4331_v37 = vpop.eup %4330  ;;  %4350 = vpow2.f32 %v1831_v53 }
 0x36b   : > { %v5905_v47 = vpop.eup %4332 }
 0x36c   : > { %v4335_v9 = vpop.eup %4334 }
 0x412   : > { %v1581_v1 = vpop.f32.mrb[8].mxu1 }
 0x413   : > { %v1865_v10 = vmul.f32 %v4321_v59, %v1581_v1  ;;  %v1583_v0 = vpop.f32.mrb[9].mxu1 }
 0x414   : > { %v1718_v3 = vpop.f32.mrb[16].mxu0  ;;  %v1905_v16 = vmul.f32 %v4321_v59, %v1583_v0  ;;  %v5913_v59 = vpop.eup %4336 }
 0x415   : > { %v1873_v6 = vmul.f32 %v4323_v29, %v1718_v3  ;;  %v1720_v36 = vpop.f32.mrb[17].mxu0  ;;  %v4339_v32 = vpop.eup %4338 }
 0x416   : > { %v1913_v54 = vmul.f32 %v4323_v29, %v1720_v36  ;;  %v1587_v43 = vpop.f32.mrb[10].mxu1  ;;  %v5916_v42 = vpop.eup %4340 }
 0x417   : > { %v1881_v26 = vadd.f32 %v1873_v6, %v1865_v10  ;;  %v1866_v13 = vmul.f32 %v4325_v62, %v1587_v43  ;;  %v1589_v25 = vpop.f32.mrb[11].mxu1 }
 0x418   : > { %v1921_v4 = vadd.f32 %v1913_v54, %v1905_v16  ;;  %v1724_v61 = vpop.f32.mrb[18].mxu0  ;;  %v1906_v33 = vmul.f32 %v4325_v62, %v1589_v25  ;;  %v4343_v62 = vpop.eup %4342 }
 0x419   : > { %v5909_v39 = vadd.f32 %v5759_v46, %v1881_v26  ;;  %v1874_v22 = vmul.f32 %v4327_v2, %v1724_v61  ;;  %v1726_v63 = vpop.f32.mrb[19].mxu0  ;;  %v1820_v46 = vmul.f32 %v1812_v57, %v5616_v41  ;;  %v4345_v6 = vpop.eup %4344  ;;  %v6454_v26 = vld [vmem:[#allocation20_spill] sm:$0xff] }
 0x41a   : > { %v1929_v60 = vadd.f32 %v5747_v56, %v1921_v4  ;;  %v1914_v45 = vmul.f32 %v4327_v2, %v1726_v63  ;;  %v1593_v52 = vpop.f32.mrb[12].mxu1  ;;  %v6453_v56 = vld [vmem:[#allocation44_spill] sm:$0xff]  ;;  %v4347_v43 = vpop.eup %4346 }
 0x41b   : > { %v1882_v38 = vadd.f32 %v1874_v22, %v1866_v13  ;;  %v1867_v20 = vmul.f32 %v4331_v37, %v1593_v52  ;;  %v1595_v29 = vpop.f32.mrb[13].mxu1  ;;  %v3579_v49 = vmul.f32 -1.442695, %v6453_v56  ;;  %v1835_v54 = vmul.f32 1.442695, %v1820_v46  ;;  %v4349_v57 = vpop.eup %4348 }
 0x41c   : > { %4352 = vrcp.f32 %v1929_v60  ;;  %v1922_v1 = vadd.f32 %v1914_v45, %v1906_v33  ;;  %v1730_v28 = vpop.f32.mrb[20].mxu0  ;;  %v1907_v58 = vmul.f32 %v4331_v37, %v1595_v29  ;;  %v3580_v13 = vmul.f32 -1.442695, %v6454_v26  ;;  %v4351_v34 = vpop.eup %4350 }
 0x41d   : > { %4354 = vpow2.f32 %v3578_v18  ;;  %v5920_v10 = vadd.f32 %v5768_v35, %v1882_v38  ;;  %v1875_v0 = vmul.f32 %v4335_v9, %v1730_v28  ;;  %v1732_v24 = vpop.f32.mrb[21].mxu0  ;;  %v1305_v37 = vadd.f32 1.0, %v4329_v15 }
 0x41e   : > { %v1930_v3 = vadd.f32 %v5753_v21, %v1922_v1  ;;  %v1915_v16 = vmul.f32 %v4335_v9, %v1732_v24  ;;  %v1599_v41 = vpop.f32.mrb[14].mxu1  ;;  %4356 = vpow2.f32 %v1801_v7  ;;  %v1306_v38 = vadd.f32 1.0, %v5905_v47 }
 0x41f   : > { %v1883_v36 = vadd.f32 %v1875_v0, %v1867_v20  ;;  %v1868_v53 = vmul.f32 %v4339_v32, %v1599_v41  ;;  %v1601_v2 = vpop.f32.mrb[15].mxu1  ;;  %4358 = vpow2.f32 %v1833_v5 }
 0x420   : > { %4360 = vrcp.f32 %v1930_v3  ;;  %v1923_v51 = vadd.f32 %v1915_v16, %v1907_v58  ;;  %v1736_v35 = vpop.f32.mrb[22].mxu0  ;;  %v1908_v11 = vmul.f32 %v4339_v32, %v1601_v2 }
 0x421   : > { %4362 = vpow2.f32 %v3579_v49  ;;  %v5925_v21 = vadd.f32 %v5776_v30, %v1883_v36  ;;  %v1876_v25 = vmul.f32 %v4343_v62, %v1736_v35  ;;  %v1738_v17 = vpop.f32.mrb[23].mxu0  ;;  %v6455_v30 = vld [vmem:[#allocation57_spill] sm:$0xff] }
 0x422   : > { %v1931_v4 = vadd.f32 %v5761_v23, %v1923_v51  ;;  %v1916_v61 = vmul.f32 %v4343_v62, %v1738_v17  ;;  %v1605_v33 = vpop.f32.mrb[16].mxu1  ;;  %4364 = vpow2.f32 %v1803_v19  ;;  %v3581_v52 = vmul.f32 -1.442695, %v6455_v30 }
 0x423   : > { %v1884_v18 = vadd.f32 %v1876_v25, %v1868_v53  ;;  %v1869_v22 = vmul.f32 %v4345_v6, %v1605_v33  ;;  %v1607_v63 = vpop.f32.mrb[17].mxu1  ;;  %4366 = vpow2.f32 %v1835_v54 }
 0x424   : > { %4368 = vrcp.f32 %v1931_v4  ;;  %v1924_v9 = vadd.f32 %v1916_v61, %v1908_v11  ;;  %v1742_v60 = vpop.f32.mrb[24].mxu0  ;;  %v1909_v45 = vmul.f32 %v4345_v6, %v1607_v63  ;;  %v6457_v4 = vld [vmem:[#allocation51_spill] sm:$0xff] }
 0x425   : > { %4370 = vpow2.f32 %v3580_v13  ;;  %v5930_v7 = vadd.f32 %v5783_v31, %v1884_v18  ;;  %v1877_v15 = vmul.f32 %v4347_v43, %v1742_v60  ;;  %v1744_v23 = vpop.f32.mrb[25].mxu0 }
 0x426   : > { %v4353_v12 = vpop.eup %4352  ;;  %4372 = vrcp.f32 %v1305_v37  ;;  %v1932_v20 = vadd.f32 %v5770_v50, %v1924_v9  ;;  %v1917_v29 = vmul.f32 %v4347_v43, %v1744_v23  ;;  %v1611_v5 = vpop.f32.mrb[18].mxu1 }
 0x427   : > { %v4355_v46 = vpop.eup %4354  ;;  %v1885_v32 = vadd.f32 %v1877_v15, %v1869_v22  ;;  %v1870_v1 = vmul.f32 %v4349_v57, %v1611_v5  ;;  %v1613_v28 = vpop.f32.mrb[19].mxu1  ;;  %v1938_v58 = vmul.f32 %v4353_v12, %v5909_v39 }
 0x428   : > { %v4357_v56 = vpop.eup %4356  ;;  %4374 = vrcp.f32 %v1932_v20  ;;  %v1925_v31 = vadd.f32 %v1917_v29, %v1909_v45  ;;  %v1748_v49 = vpop.f32.mrb[26].mxu0  ;;  %v1910_v0 = vmul.f32 %v4349_v57, %v1613_v28  ;;  %v1307_v41 = vadd.f32 1.0, %v4355_v46 }
 0x429   : > { %v4359_v24 = vpop.eup %4358  ;;  %4376 = vpow2.f32 %v3581_v52  ;;  %v5936_v62 = vadd.f32 %v5792_v44, %v1885_v32  ;;  %v1878_v47 = vmul.f32 %v4351_v34, %v1748_v49  ;;  %v1750_v50 = vpop.f32.mrb[27].mxu0  ;;  %v1953_v3 = vmul.f32 %v5913_v59, %v1938_v58  ;;  %v6456_v59 = vld [vmem:[#allocation56_spill] sm:$0xff] }
 0x42a   : > { %v4361_v16 = vpop.eup %4360  ;;  %4378 = vrcp.f32 %v1306_v38  ;;  %v1933_v19 = vadd.f32 %v5778_v55, %v1925_v31  ;;  %v1918_v39 = vmul.f32 %v4351_v34, %v1750_v50  ;;  %v1617_v6 = vpop.f32.mrb[20].mxu1 }
 0x42b   : > { %v4363_v36 = vpop.eup %4362  ;;  %v1886_v53 = vadd.f32 %v1878_v47, %v1870_v1  ;;  %v1871_v2 = vmul.f32 %v4357_v56, %v1617_v6  ;;  %v1619_v54 = vpop.f32.mrb[21].mxu1  ;;  %v1940_v43 = vmul.f32 %v4361_v16, %v5920_v10 }
 0x42c   : > { %v4365_v51 = vpop.eup %4364  ;;  %4380 = vrcp.f32 %v1933_v19  ;;  %v1926_v44 = vadd.f32 %v1918_v39, %v1910_v0  ;;  %v1754_v35 = vpop.f32.mrb[28].mxu0  ;;  %v1911_v11 = vmul.f32 %v4357_v56, %v1619_v54  ;;  %v1308_v37 = vadd.f32 1.0, %v4363_v36 }
 0x42d   : > { %v4367_v26 = vpop.eup %4366  ;;  %v1902_v13 = vadd.f32 %v6456_v59, %v1886_v53  ;;  %v1879_v25 = vmul.f32 %v4359_v24, %v1754_v35  ;;  %v1756_v17 = vpop.f32.mrb[29].mxu0  ;;  %v1954_v55 = vmul.f32 %v5916_v42, %v1940_v43  ;;  %4382 = vrcp.f32 %v1307_v41 }
 0x42e   : > { %v4369_v57 = vpop.eup %4368  ;;  %v1934_v61 = vadd.f32 %v6457_v4, %v1926_v44  ;;  %v1919_v33 = vmul.f32 %v4359_v24, %v1756_v17  ;;  %v1623_v34 = vpop.f32.mrb[22].mxu1  ;;  %v2097_v43 = vsub.s32 4, %v6417_v48  ;;  %v4446_v17 = vld [vmem:[%s5006_s8] sm:$0xff]  ;;  %v4447_v4 = vld [vmem:[%s5006_s8 + $0x8] sm:$0xff] }
 0x42f   : > { %v4371_v10 = vpop.eup %4370  ;;  %v1887_v18 = vadd.f32 %v1879_v25, %v1871_v2  ;;  %v1872_v22 = vmul.f32 %v4365_v51, %v1623_v34  ;;  %v1625_v63 = vpop.f32.mrb[23].mxu1  ;;  %v1978_v9 = vpack.c.bf16 %v1954_v55, %v1953_v3  ;;  %v1942_v60 = vmul.f32 %v4369_v57, %v5925_v21 }
 0x430   : > { %v4373_v45 = vpop.eup %4372  ;;  %4384 = vrcp.f32 %v1934_v61  ;;  %v1927_v30 = vadd.f32 %v1919_v33, %v1911_v11  ;;  %v1760_v52 = vpop.f32.mrb[30].mxu0  ;;  %v1912_v15 = vmul.f32 %v4365_v51, %v1625_v63  ;;  %v1309_v29 = vadd.f32 1.0, %v4371_v10  ;;  %v5952_v51 = vld [vmem:[#allocation6] sm:$0xff]  ;;  %v4448_v33 = vld [vmem:[%s5006_s8 + $0x10] sm:$0xff]  ;;  %v4449_v10 = vld [vmem:[%s5006_s8 + $0x18] sm:$0xff] }
 0x431   : > { %v1903_v42 = vadd.f32 %v5800_v27, %v1887_v18  ;;  %v1880_v23 = vmul.f32 %v4367_v26, %v1760_v52  ;;  %v1762_v12 = vpop.f32.mrb[31].mxu0  ;;  %3945 = vmatprep.mubr.bf16.mxu1 %v1978_v9  ;;  %v1955_v38 = vmul.f32 %v4373_v45, %v1942_v60  ;;  %4386 = vrcp.f32 %v1308_v37  ;;  %v4450_v52 = vld [vmem:[%s5006_s8 + $0x20] sm:$0xff] }
 0x432   : > { %v4375_v20 = vpop.eup %4374  ;;  %v1935_v5 = vadd.f32 %v5785_v8, %v1927_v30  ;;  %v1920_v46 = vmul.f32 %v4367_v26, %v1762_v12  ;;  %v2098_v44 = vrot.slane %v5952_v51, %v2097_v43  ;;  %v4451_v12 = vld [vmem:[%s5006_s8 + $0x28] sm:$0xff] }
 0x433   : > { %v4377_v32 = vpop.eup %4376  ;;  %v1888_v1 = vadd.f32 %v1880_v23, %v1872_v22  ;;  %v1944_v21 = vmul.f32 %v4375_v20, %v5930_v7  ;;  %v4452_v20 = vld [vmem:[%s5006_s8 + $0x30] sm:$0xff] }
 0x434   : > { %v4379_v28 = vpop.eup %4378  ;;  %4388 = vrcp.f32 %v1935_v5  ;;  %v1928_v58 = vadd.f32 %v1920_v46, %v1912_v15  ;;  %v1310_v49 = vadd.f32 1.0, %v4377_v32  ;;  %v4453_v5 = vld [vmem:[%s5006_s8 + $0x38] sm:$0xff] }
 0x435   : > { %v1904_v56 = vadd.f32 %v5807_v40, %v1888_v1  ;;  %v1956_v27 = vmul.f32 %v4379_v28, %v1944_v21  ;;  %4390 = vrcp.f32 %v1309_v29 }
 0x436   : > { %v4381_v31 = vpop.eup %4380  ;;  %v1936_v0 = vadd.f32 %v5794_v14, %v1928_v58 }
 0x437   : > { %v1979_v24 = vpack.c.bf16 %v1956_v27, %v1955_v38  ;;  %v1946_v47 = vmul.f32 %v4381_v31, %v5936_v62  ;;  %v4383_v8 = vpop.eup %4382 }
 0x438   : > { %4392 = vrcp.f32 %v1936_v0 }
 0x439   : > { %3946 = vmatmul.mubr.bf16.vlgmr.msra.gmra.mrb[24].mxu1 %v1979_v24  ;;  %v1957_v50 = vmul.f32 %v4383_v8, %v1946_v47  ;;  %4394 = vrcp.f32 %v1310_v49 }
 0x43a   : > { %v4385_v3 = vpop.eup %4384 }
 0x43b   : > { %v1948_v7 = vmul.f32 %v4385_v3, %v1902_v13  ;;  %v4387_v16 = vpop.eup %4386 }
 0x43d   : > { %v1958_v41 = vmul.f32 %v4387_v16, %v1948_v7 }
 0x43e   : > { %v4389_v19 = vpop.eup %4388 }
 0x43f   : > { %v1980_v40 = vpack.c.bf16 %v1958_v41, %v1957_v50  ;;  %v1950_v39 = vmul.f32 %v4389_v19, %v1903_v42  ;;  %v4391_v6 = vpop.eup %4390 }
 0x441   : > { %3949 = vmatprep.mubr.bf16.mxu1 %v1980_v40  ;;  %v1959_v36 = vmul.f32 %v4391_v6, %v1950_v39 }
 0x442   : > { %v4393_v14 = vpop.eup %4392 }
 0x443   : > { %v1952_v53 = vmul.f32 %v4393_v14, %v1904_v56  ;;  %v4395_v2 = vpop.eup %4394 }
 0x445   : > { %v1960_v62 = vmul.f32 %v4395_v2, %v1952_v53 }
 0x447   : > { %v1981_v54 = vpack.c.bf16 %v1960_v62, %v1959_v36 }
 0x449   : > { %3950 = vmatmul.mubr.bf16.gmra.mrb[28].mxu1 %v1981_v54 }
 0x50c   : > { %v3947_v35 = vpop.f32.mrb[24].mxu1 }
 0x50d   : > { %v2064_v11 = vpop.f32.mrb[25].mxu1  ;;  %v2101_v25 = vmul.f32 %v3947_v35, %v2098_v44 }
 0x50e   : > { %v2099_v26 = vmul.f32 %v2098_v44, %v2064_v11  ;;  %v3948_v59 = vpop.f32.mrb[26].mxu1 }
 0x50f   : > { %v2067_v13 = vpop.f32.mrb[27].mxu1  ;;  %v2102_v37 = vmul.f32 %v3948_v59, %v2098_v44  ;;  %v5963_v34 = vadd.f32 %v4448_v33, %v2101_v25  ;;  %v4166_v59 = vld [vmem:[#allocation9 + $0x4] ss:$16 sps:$4 sm:$0xff]   ;;  %v4169_v25 = vld [vmem:[#allocation9 + $0xc] ss:$16 sps:$4 sm:$0xff]  }
 0x510   : > { %v5956_v55 = vadd.f32 %v4446_v17, %v2099_v26  ;;  %v2100_v57 = vmul.f32 %v2098_v44, %v2067_v13  ;;  %v4164_v26 = vld [vmem:[#allocation9] ss:$16 sps:$4 sm:$0xff]   ;;  %v4167_v13 = vld [vmem:[#allocation9 + $0x8] ss:$16 sps:$4 sm:$0xff]   ;;  %2551 = vmatprep.subr.bf16.mxu0 %v4166_v59  ;;  %2624 = vmatprep.subr.bf16.mxu1 %v4169_v25  ;;  %v4172_v17 = vld [vmem:[#allocation9 + $0x24] ss:$16 sps:$4 sm:$0xff]  }
 0x511   : > { %v5967_v18 = vadd.f32 %v4449_v10, %v2102_v37  ;;  %2552 = vmatpush1.bf16.msra.mxu0 %v4164_v26  ;;  %2625 = vmatpush1.bf16.msra.mxu1 %v4167_v13  ;;  %v4170_v37 = vld [vmem:[#allocation9 + $0x20] ss:$16 sps:$4 sm:$0xff]   ;;  %v4178_v33 = vld [vmem:[#allocation9 + $0x44] ss:$16 sps:$4 sm:$0xff]   ;;  %v4181_v10 = vld [vmem:[#allocation9 + $0x4c] ss:$16 sps:$4 sm:$0xff]  }
 0x512   : > { %v5959_v61 = vadd.f32 %v4447_v4, %v2100_v57  ;;  %2115 = vadd.xlane.f32.xlu0 %v5956_v55  ;;  %v4175_v57 = vld [vmem:[#allocation9 + $0x2c] ss:$16 sps:$4 sm:$0xff]   ;;  %v4173_v4 = vld [vmem:[#allocation9 + $0x28] ss:$16 sps:$4 sm:$0xff]   ;;  %2553 = vmatprep.subr.bf16.mxu0 %v4172_v17  ;;  %v2217_v59 = vsub.s32 3, %v6417_v48  ;;  %v6458_v13 = vld [vmem:[#allocation22_spill] sm:$0xff] }
 0x513   : > { %2626 = vmatprep.subr.bf16.mxu1 %v4175_v57  ;;  %v6032_v25 = vrot.slane %v5952_v51, %v6458_v13  ;;  %v6463_v13 = vld [vmem:[#allocation32_spill] sm:$0xff] }
 0x514   : > { %2117 = vadd.xlane.f32.xlu1 %v5959_v61  ;;  %v6035_v57 = vrot.slane %v5952_v51, %v2217_v59 }
 0x515   : > { %2554 = vmatpush1.bf16.msra.mxu0 %v4170_v37  ;;  %2627 = vmatpush1.bf16.msra.mxu1 %v4173_v4 }
 0x516   : > { %2119 = vadd.xlane.f32.xlu0 %v5963_v34  ;;  %2555 = vmatprep.subr.bf16.mxu0 %v4178_v33 }
 0x517   : > { %2628 = vmatprep.subr.bf16.mxu1 %v4181_v10 }
 0x518   : > { %2121 = vadd.xlane.f32.xlu1 %v5967_v18 }
 0x51c   : > { %v3951_v22 = vpop.f32.mrb[28].mxu1 }
 0x51d   : > { %v2080_v63 = vpop.f32.mrb[29].mxu1  ;;  %v2105_v30 = vmul.f32 %v3951_v22, %v2098_v44  ;;  %v4176_v22 = vld [vmem:[#allocation9 + $0x40] ss:$16 sps:$4 sm:$0xff]  }
 0x51e   : > { %v2103_v9 = vmul.f32 %v2098_v44, %v2080_v63  ;;  %v3952_v60 = vpop.f32.mrb[30].mxu1  ;;  %v4179_v63 = vld [vmem:[#allocation9 + $0x48] ss:$16 sps:$4 sm:$0xff]   ;;  %2556 = vmatpush1.bf16.msra.mxu0 %v4176_v22 }
 0x51f   : > { %v2083_v45 = vpop.f32.mrb[31].mxu1  ;;  %v2106_v23 = vmul.f32 %v3952_v60, %v2098_v44  ;;  %v5979_v29 = vadd.f32 %v4452_v20, %v2105_v30  ;;  %v4187_v60 = vld [vmem:[#allocation9 + $0x6c] ss:$16 sps:$4 sm:$0xff]   ;;  %2629 = vmatpush1.bf16.msra.mxu1 %v4179_v63  ;;  %v4185_v30 = vld [vmem:[#allocation9 + $0x68] ss:$16 sps:$4 sm:$0xff]  }
 0x520   : > { %v5972_v15 = vadd.f32 %v4450_v52, %v2103_v9  ;;  %v2104_v42 = vmul.f32 %v2098_v44, %v2083_v45  ;;  %v4184_v9 = vld [vmem:[#allocation9 + $0x64] ss:$16 sps:$4 sm:$0xff]   ;;  %v4182_v45 = vld [vmem:[#allocation9 + $0x60] ss:$16 sps:$4 sm:$0xff]   ;;  %2630 = vmatprep.subr.bf16.mxu1 %v4187_v60 }
 0x521   : > { %v5983_v46 = vadd.f32 %v4453_v5, %v2106_v23  ;;  %2557 = vmatprep.subr.bf16.mxu0 %v4184_v9  ;;  %v4190_v52 = vld [vmem:[#allocation9 + $0x84] ss:$16 sps:$4 sm:$0xff]   ;;  %v4188_v23 = vld [vmem:[#allocation9 + $0x80] ss:$16 sps:$4 sm:$0xff]   ;;  %v4199_v5 = vld [vmem:[#allocation9 + $0xac] ss:$16 sps:$4 sm:$0xff]  }
 0x522   : > { %v5975_v38 = vadd.f32 %v4451_v12, %v2104_v42  ;;  %2123 = vadd.xlane.f32.xlu0 %v5972_v15  ;;  %v4193_v42 = vld [vmem:[#allocation9 + $0x8c] ss:$16 sps:$4 sm:$0xff]   ;;  %2558 = vmatpush1.bf16.msra.mxu0 %v4182_v45  ;;  %v4191_v12 = vld [vmem:[#allocation9 + $0x88] ss:$16 sps:$4 sm:$0xff]   ;;  %v4196_v20 = vld [vmem:[#allocation9 + $0xa4] ss:$16 sps:$4 sm:$0xff]  }
 0x523   : > { %2631 = vmatpush1.bf16.msra.mxu1 %v4185_v30  ;;  %2559 = vmatprep.subr.bf16.mxu0 %v4190_v52 }
 0x524   : > { %2125 = vadd.xlane.f32.xlu1 %v5975_v38  ;;  %2632 = vmatprep.subr.bf16.mxu1 %v4193_v42 }
 0x526   : > { %2127 = vadd.xlane.f32.xlu0 %v5979_v29  ;;  %2560 = vmatpush1.bf16.msra.mxu0 %v4188_v23 }
 0x527   : > { %2633 = vmatpush1.bf16.msra.mxu1 %v4191_v12  ;;  %2561 = vmatprep.subr.bf16.mxu0 %v4196_v20 }
 0x528   : > { %2129 = vadd.xlane.f32.xlu1 %v5983_v46  ;;  %2634 = vmatprep.subr.bf16.mxu1 %v4199_v5 }
 0x59f   : > { %v2116_v32 = vpop.xlane.xlu0 %2115 }
 0x5a0   : > { %v2131_v1 = vmul.f32 0.0078125, %v2116_v32  ;;  %v4719_v32 = vmov 0  }
 0x5a1   : > { %v2118_v21 = vpop.xlane.xlu1 %2117  ;;  %2583 = vmatprep.mubr.bf16.mxu0 %v4719_v32  ;;  %2656 = vmatprep.mubr.bf16.mxu1 %v4719_v32 }
 0x5a2   : > { %v5988_v28 = vsub.f32 %v5956_v55, %v2131_v1  ;;  %v2132_v58 = vmul.f32 0.0078125, %v2118_v21  ;;  %v4194_v1 = vld [vmem:[#allocation9 + $0xa0] ss:$16 sps:$4 sm:$0xff]   ;;  %v4197_v21 = vld [vmem:[#allocation9 + $0xa8] ss:$16 sps:$4 sm:$0xff]  }
 0x5a3   : > { %v2120_v56 = vpop.xlane.xlu0 %2119  ;;  %2562 = vmatpush1.bf16.msra.mxu0 %v4194_v1  ;;  %2635 = vmatpush1.bf16.msra.mxu1 %v4197_v21 }
 0x5a4   : > { %v5991_v27 = vsub.f32 %v5959_v61, %v2132_v58  ;;  %v2133_v31 = vmul.f32 0.0078125, %v2120_v56  ;;  %v2147_v49 = vmul.f32 %v5988_v28, %v5988_v28  ;;  %v4202_v58 = vld [vmem:[#allocation9 + $0xc4] ss:$16 sps:$4 sm:$0xff]   ;;  %v4205_v56 = vld [vmem:[#allocation9 + $0xcc] ss:$16 sps:$4 sm:$0xff]  }
 0x5a5   : > { %v2122_v0 = vpop.xlane.xlu1 %2121  ;;  %2563 = vmatprep.subr.bf16.mxu0 %v4202_v58  ;;  %2636 = vmatprep.subr.bf16.mxu1 %v4205_v56 }
 0x5a6   : > { %v5996_v24 = vsub.f32 %v5963_v34, %v2133_v31  ;;  %v2134_v47 = vmul.f32 0.0078125, %v2122_v0  ;;  %2155 = vadd.xlane.f32.xlu0 %v2147_v49  ;;  %v2148_v8 = vmul.f32 %v5991_v27, %v5991_v27  ;;  %v4200_v31 = vld [vmem:[#allocation9 + $0xc0] ss:$16 sps:$4 sm:$0xff]   ;;  %v4203_v49 = vld [vmem:[#allocation9 + $0xc8] ss:$16 sps:$4 sm:$0xff]  }
 0x5a7   : > { %v4208_v0 = vld [vmem:[#allocation9 + $0xe4] ss:$16 sps:$4 sm:$0xff]   ;;  %2564 = vmatpush1.bf16.msra.mxu0 %v4200_v31  ;;  %2637 = vmatpush1.bf16.msra.mxu1 %v4203_v49 }
 0x5a8   : > { %v6001_v50 = vsub.f32 %v5967_v18, %v2134_v47  ;;  %2157 = vadd.xlane.f32.xlu1 %v2148_v8  ;;  %v2149_v3 = vmul.f32 %v5996_v24, %v5996_v24  ;;  %v4211_v47 = vld [vmem:[#allocation9 + $0xec] ss:$16 sps:$4 sm:$0xff]   ;;  %v4206_v8 = vld [vmem:[#allocation9 + $0xe0] ss:$16 sps:$4 sm:$0xff]   ;;  %2565 = vmatprep.subr.bf16.mxu0 %v4208_v0 }
 0x5a9   : > { %2638 = vmatprep.subr.bf16.mxu1 %v4211_v47 }
 0x5aa   : > { %2159 = vadd.xlane.f32.xlu0 %v2149_v3  ;;  %v2150_v7 = vmul.f32 %v6001_v50, %v6001_v50  ;;  %v4209_v3 = vld [vmem:[#allocation9 + $0xe8] ss:$16 sps:$4 sm:$0xff]  }
 0x5ab   : > { %2566 = vmatpush1.bf16.msra.mxu0 %v4206_v8  ;;  %2639 = vmatpush1.bf16.msra.mxu1 %v4209_v3 }
 0x5ac   : > { %2161 = vadd.xlane.f32.xlu1 %v2150_v7  ;;  %v4212_v7 = vld [vmem:[#allocation11 + $0x40] sm:$0xff]  }
 0x5ad   : > { %3765 = vmatprep.subr.bf16.mxu0 %v4212_v7  ;;  %v6459_v7 = vld [vmem:[#allocation33_spill] sm:$0xff] }
 0x5af   : > { %v2124_v16 = vpop.xlane.xlu0 %2123 }
 0x5b0   : > { %v2135_v41 = vmul.f32 0.0078125, %v2124_v16  ;;  %v4213_v16 = vld [vmem:[#allocation11 + $0xc0] sm:$0xff]  }
 0x5b1   : > { %v2126_v19 = vpop.xlane.xlu1 %2125  ;;  %3805 = vmatprep.subr.bf16.mxu1 %v4213_v16 }
 0x5b2   : > { %v6008_v40 = vsub.f32 %v5972_v15, %v2135_v41  ;;  %v2136_v39 = vmul.f32 0.0078125, %v2126_v19 }
 0x5b3   : > { %v2128_v6 = vpop.xlane.xlu0 %2127 }
 0x5b4   : > { %v6011_v36 = vsub.f32 %v5975_v38, %v2136_v39  ;;  %v2137_v14 = vmul.f32 0.0078125, %v2128_v6  ;;  %v2151_v53 = vmul.f32 %v6008_v40, %v6008_v40 }
 0x5b5   : > { %v2130_v2 = vpop.xlane.xlu1 %2129 }
 0x5b6   : > { %v6016_v62 = vsub.f32 %v5979_v29, %v2137_v14  ;;  %v2138_v54 = vmul.f32 0.0078125, %v2130_v2  ;;  %2163 = vadd.xlane.f32.xlu0 %v2151_v53  ;;  %v2152_v43 = vmul.f32 %v6011_v36, %v6011_v36 }
 0x5b8   : > { %v6021_v44 = vsub.f32 %v5983_v46, %v2138_v54  ;;  %2165 = vadd.xlane.f32.xlu1 %v2152_v43  ;;  %v2153_v35 = vmul.f32 %v6016_v62, %v6016_v62 }
 0x5ba   : > { %2167 = vadd.xlane.f32.xlu0 %v2153_v35  ;;  %v2154_v11 = vmul.f32 %v6021_v44, %v6021_v44 }
 0x5bc   : > { %2169 = vadd.xlane.f32.xlu1 %v2154_v11 }
 0x633   : > { %v2156_v41 = vpop.xlane.xlu0 %2155 }
 0x634   : > { %v2171_v19 = vmul.f32 0.0078125, %v2156_v41 }
 0x635   : > { %v2158_v39 = vpop.xlane.xlu1 %2157 }
 0x636   : > { %v2179_v6 = vadd.f32 1e-05, %v2171_v19  ;;  %v2172_v14 = vmul.f32 0.0078125, %v2158_v39  ;;  %v6460_v19 = vld [vmem:[#allocation34_spill] sm:$0xff] }
 0x637   : > { %v2160_v53 = vpop.xlane.xlu0 %2159 }
 0x638   : > { %4396 = vrsqrt.f32 %v2179_v6  ;;  %v2180_v2 = vadd.f32 1e-05, %v2172_v14  ;;  %v2173_v54 = vmul.f32 0.0078125, %v2160_v53  ;;  %v6461_v6 = vld [vmem:[#allocation35_spill] sm:$0xff] }
 0x639   : > { %v2162_v43 = vpop.xlane.xlu1 %2161 }
 0x63a   : > { %4398 = vrsqrt.f32 %v2180_v2  ;;  %v2181_v35 = vadd.f32 1e-05, %v2173_v54  ;;  %v2174_v11 = vmul.f32 0.0078125, %v2162_v43 }
 0x63c   : > { %4400 = vrsqrt.f32 %v2181_v35  ;;  %v2182_v26 = vadd.f32 1e-05, %v2174_v11  ;;  %v6462_v11 = vld [vmem:[#allocation36_spill] sm:$0xff] }
 0x63e   : > { %4402 = vrsqrt.f32 %v2182_v26 }
 0x642   : > { %v4397_v17 = vpop.eup %4396 }
 0x643   : > { %v2195_v37 = vmul.f32 %v4397_v17, %v5988_v28  ;;  %v2164_v4 = vpop.xlane.xlu0 %2163 }
 0x644   : > { %v4399_v33 = vpop.eup %4398  ;;  %v2175_v10 = vmul.f32 0.0078125, %v2164_v4 }
 0x645   : > { %v2207_v22 = vmul.f32 %v6032_v25, %v2195_v37  ;;  %v2196_v63 = vmul.f32 %v4399_v33, %v5991_v27  ;;  %v2166_v9 = vpop.xlane.xlu1 %2165  ;;  %v6464_v37 = vld [vmem:[#allocation39_spill] sm:$0xff]  ;;  %v6070_v33 = vld [vmem:[#allocation2] sm:$0xff] }
 0x646   : > { %v4401_v60 = vpop.eup %4400  ;;  %v2183_v45 = vadd.f32 1e-05, %v2175_v10  ;;  %v2176_v30 = vmul.f32 0.0078125, %v2166_v9 }
 0x647   : > { %v6041_v52 = vadd.f32 %v6035_v57, %v2207_v22  ;;  %v2208_v42 = vmul.f32 %v6032_v25, %v2196_v63  ;;  %v2197_v51 = vmul.f32 %v4401_v60, %v5996_v24  ;;  %v2168_v23 = vpop.xlane.xlu0 %2167  ;;  %v6466_v63 = vld [vmem:[#allocation40_spill] sm:$0xff] }
 0x648   : > { %v4403_v28 = vpop.eup %4402  ;;  %4404 = vrsqrt.f32 %v2183_v45  ;;  %v2184_v12 = vadd.f32 1e-05, %v2176_v30  ;;  %v2177_v20 = vmul.f32 0.0078125, %v2168_v23 }
 0x649   : > { %2227 = vst [vmem:[#allocation2 + $0x8] sm:$0xff] %v6041_v52  ;;  %v6047_v27 = vadd.f32 %v6035_v57, %v2208_v42  ;;  %v2209_v5 = vmul.f32 %v6032_v25, %v2197_v51  ;;  %v2198_v1 = vmul.f32 %v4403_v28, %v6001_v50  ;;  %v2170_v21 = vpop.xlane.xlu1 %2169  ;;  %v6467_v28 = vld [vmem:[#allocation42_spill] sm:$0xff] }
 0x64a   : > { %4406 = vrsqrt.f32 %v2184_v12  ;;  %v2185_v58 = vadd.f32 1e-05, %v2177_v20  ;;  %v2178_v56 = vmul.f32 0.0078125, %v2170_v21  ;;  %v6468_v21 = vld [vmem:[#allocation29_spill] sm:$0xff] }
 0x64b   : > { %2228 = vst [vmem:[#allocation2 + $0x10] sm:$0xff] %v6047_v27  ;;  %v6053_v24 = vadd.f32 %v6035_v57, %v2209_v5  ;;  %v2210_v31 = vmul.f32 %v6032_v25, %v2198_v1 }
 0x64c   : > { %4408 = vrsqrt.f32 %v2185_v58  ;;  %v2186_v49 = vadd.f32 1e-05, %v2178_v56  ;;  %v2323_v58 = vmul.f32 %v6468_v21, %v6047_v27 }
 0x64d   : > { %2229 = vst [vmem:[#allocation2 + $0x18] sm:$0xff] %v6053_v24  ;;  %v6058_v0 = vadd.f32 %v6035_v57, %v2210_v31 }
 0x64e   : > { %4410 = vrsqrt.f32 %v2186_v49 }
 0x64f   : > { %2230 = vst [vmem:[#allocation2 + $0x20] sm:$0xff] %v6058_v0 }
 0x650   : > { %v2235_v50 = vld [vmem:[#allocation2 + $0x7] sm:$0xff] }
 0x651   : > { %v2267_v16 = vmul.f32 %v6459_v7, %v2235_v50 }
 0x652   : > { %v4405_v47 = vpop.eup %4404  ;;  %v2236_v8 = vld [vmem:[#allocation2 + $0xf] sm:$0xff] }
 0x653   : > { %v2243_v3 = vld [vmem:[#allocation2 + $0x9] sm:$0xff]  ;;  %v2199_v41 = vmul.f32 %v4405_v47, %v6008_v40  ;;  %v2268_v39 = vmul.f32 %v6460_v19, %v2236_v8  ;;  %v2275_v17 = vmul.f32 %v6463_v13, %v2267_v16  ;;  %v6465_v40 = vld [vmem:[#allocation28_spill] sm:$0xff]  ;;  %v2339_v19 = vmul.f32 0.0, %v6041_v52 }
 0x654   : > { %v2283_v14 = vmul.f32 %v6461_v6, %v2243_v3  ;;  %v4407_v53 = vpop.eup %4406  ;;  %v2244_v2 = vld [vmem:[#allocation2 + $0x11] sm:$0xff]  ;;  %v2307_v10 = vmul.f32 %v6070_v33, %v6465_v40  ;;  %v2308_v23 = vmul.f32 %v6465_v40, %v6041_v52  ;;  %v2324_v3 = vmul.f32 %v6468_v21, %v6053_v24 }
 0x655   : > { %v2237_v54 = vld [vmem:[#allocation2 + $0x17] sm:$0xff]  ;;  %v2211_v43 = vmul.f32 %v6032_v25, %v2199_v41  ;;  %v2200_v35 = vmul.f32 %v4407_v53, %v6011_v36  ;;  %v2284_v26 = vmul.f32 %v6462_v11, %v2244_v2  ;;  %v2276_v45 = vmul.f32 %v6463_v13, %v2268_v39 }
 0x656   : > { %v4409_v59 = vpop.eup %4408  ;;  %v2291_v4 = vmul.f32 %v6464_v37, %v2283_v14  ;;  %v2245_v22 = vld [vmem:[#allocation2 + $0x19] sm:$0xff]  ;;  %v2269_v9 = vmul.f32 %v6466_v63, %v2237_v54  ;;  %v2340_v39 = vmul.f32 0.0, %v6047_v27  ;;  %v2309_v14 = vmul.f32 %v6465_v40, %v6047_v27  ;;  %v6469_v54 = vld [vmem:[#allocation41_spill] sm:$0xff] }
 0x657   : > { %v6076_v60 = vadd.f32 %v6035_v57, %v2211_v43  ;;  %v2201_v36 = vmul.f32 %v4409_v59, %v6016_v62  ;;  %v2292_v30 = vmul.f32 %v6464_v37, %v2284_v26  ;;  %v2285_v12 = vmul.f32 %v6467_v28, %v2245_v22  ;;  %v2238_v7 = vld [vmem:[#allocation2 + $0x1f] sm:$0xff]  ;;  %v6471_v22 = vld [vmem:[#allocation46_spill] sm:$0xff] }
 0x658   : > { %v4411_v42 = vpop.eup %4410  ;;  %v2299_v51 = vadd.f32 %v2291_v4, %v2275_v17  ;;  %v2212_v20 = vmul.f32 %v6032_v25, %v2200_v35  ;;  %v2277_v31 = vmul.f32 %v6463_v13, %v2269_v9  ;;  %v2270_v43 = vmul.f32 %v6469_v54, %v2238_v7  ;;  %v6470_v52 = vld [vmem:[#allocation43_spill] sm:$0xff]  ;;  %v4216_v9 = vld [vmem:[#allocation11 + $0x48] sm:$0xff]   ;;  %v4221_v54 = vld [vmem:[#allocation11 + $0xd0] sm:$0xff]  }
 0x659   : > { %2231 = vst [vmem:[#allocation2 + $0x28] sm:$0xff] %v6076_v60  ;;  %v2213_v5 = vmul.f32 %v6032_v25, %v2201_v36  ;;  %v2202_v1 = vmul.f32 %v4411_v42, %v6021_v44  ;;  %v2300_v62 = vadd.f32 %v2292_v30, %v2276_v45  ;;  %v2293_v49 = vmul.f32 %v6464_v37, %v2285_v12  ;;  %v4217_v36 = vld [vmem:[#allocation11 + $0xc8] sm:$0xff]   ;;  %v6472_v12 = vld [vmem:[#allocation47_spill] sm:$0xff] }
 0x65a   : > { %v2315_v56 = vadd.f32 %v2307_v10, %v2299_v51  ;;  %v6093_v50 = vadd.f32 %v6035_v57, %v2212_v20  ;;  %v4215_v10 = vld [vmem:[#allocation11 + $0x80] sm:$0xff]   ;;  %v2325_v27 = vmul.f32 %v6468_v21, %v6058_v0  ;;  %v2310_v30 = vmul.f32 %v6465_v40, %v6053_v24 }
 0x65b   : > { %v6096_v47 = vadd.f32 %v6035_v57, %v2213_v5  ;;  %v2316_v8 = vadd.f32 %v2308_v23, %v2300_v62  ;;  %v2301_v16 = vadd.f32 %v2293_v49, %v2277_v31  ;;  %v2214_v6 = vmul.f32 %v6032_v25, %v2202_v1  ;;  %v4214_v25 = vld [vmem:[#allocation11] sm:$0xff]   ;;  %v6474_v31 = vld [vmem:[#allocation49_spill] sm:$0xff] }
 0x65c   : > { %v2331_v44 = vadd.f32 %v2323_v58, %v2315_v56  ;;  %2232 = vst [vmem:[#allocation2 + $0x30] sm:$0xff] %v6093_v50  ;;  %v6473_v5 = vld [vmem:[#allocation48_spill] sm:$0xff]  ;;  %v2341_v56 = vmul.f32 0.0, %v6053_v24  ;;  %v4220_v24 = vld [vmem:[#allocation11 + $0x50] sm:$0xff]  }
 0x65d   : > { %2233 = vst [vmem:[#allocation2 + $0x38] sm:$0xff] %v6096_v47  ;;  %v2332_v41 = vadd.f32 %v2324_v3, %v2316_v8  ;;  %v6109_v35 = vadd.f32 %v6035_v57, %v2214_v6  ;;  %v2317_v26 = vadd.f32 %v2309_v14, %v2301_v16  ;;  %v2278_v57 = vmul.f32 %v6463_v13, %v2270_v43  ;;  %v4218_v3 = vld [vmem:[#allocation11 + $0x8] sm:$0xff]  }
 0x65e   : > { %v2347_v53 = vadd.f32 %v2339_v19, %v2331_v44  ;;  %v2311_v8 = vmul.f32 %v6465_v40, %v6058_v0  ;;  %v2342_v44 = vmul.f32 0.0, %v6058_v0  ;;  %v2326_v14 = vmul.f32 %v6468_v21, %v6076_v60 }
 0x65f   : > { %v2348_v2 = vadd.f32 %v2340_v39, %v2332_v41  ;;  %2234 = vst [vmem:[#allocation2 + $0x40] sm:$0xff] %v6109_v35  ;;  %v2333_v23 = vadd.f32 %v2325_v27, %v2317_v26  ;;  %v6475_v41 = vld [vmem:[#allocation52_spill] sm:$0xff]  ;;  %v4219_v39 = vld [vmem:[#allocation11 + $0x88] sm:$0xff]   ;;  %v2328_v26 = vmul.f32 %v6468_v21, %v6096_v47 }
 0x660   : > { %v2246_v11 = vld [vmem:[#allocation2 + $0x21] sm:$0xff] }
 0x661   : > { %v2239_v59 = vld [vmem:[#allocation2 + $0x27] sm:$0xff]  ;;  %v6111_v17 = vpack.c.bf16 %v2348_v2, %v2347_v53  ;;  %v2286_v4 = vmul.f32 %v6470_v52, %v2246_v11  ;;  %v2349_v0 = vadd.f32 %v2341_v56, %v2333_v23  ;;  %v2312_v11 = vmul.f32 %v6465_v40, %v6076_v60  ;;  %v4224_v23 = vld [vmem:[#allocation11 + $0x58] sm:$0xff]  }
 0x662   : > { %v2271_v63 = vmul.f32 %v6471_v22, %v2239_v59  ;;  %v6476_v27 = vld [vmem:[#allocation53_spill] sm:$0xff] }
 0x663   : > { %2584 = vmatmul.mubr.bf16.vlgmr.msra.gmra.mrb[32].mxu0 %v6111_v17  ;;  %2657 = vmatmul.mubr.bf16.vlgmr.msra.gmra.mrb[32].mxu1 %v6111_v17  ;;  %v2294_v45 = vmul.f32 %v6464_v37, %v2286_v4  ;;  %v2240_v42 = vld [vmem:[#allocation2 + $0x2f] sm:$0xff] }
 0x664   : > { %v2247_v51 = vld [vmem:[#allocation2 + $0x29] sm:$0xff]  ;;  %2593 = vmatprep.mubr.bf16.mxu0 %v4719_v32  ;;  %2666 = vmatprep.mubr.bf16.mxu1 %v4719_v32  ;;  %v2248_v28 = vld [vmem:[#allocation2 + $0x31] sm:$0xff]  ;;  %v2272_v20 = vmul.f32 %v6472_v12, %v2240_v42  ;;  %v2279_v7 = vmul.f32 %v6463_v13, %v2271_v63 }
 0x665   : > { %v2287_v1 = vmul.f32 %v6473_v5, %v2247_v51  ;;  %v2241_v62 = vld [vmem:[#allocation2 + $0x37] sm:$0xff]  ;;  %v2302_v58 = vadd.f32 %v2294_v45, %v2278_v57  ;;  %v2288_v49 = vmul.f32 %v6474_v31, %v2248_v28  ;;  %3766 = vmatpush3.bf16.msra.mxu0 %v4214_v25  ;;  %3806 = vmatpush3.bf16.msra.mxu1 %v4215_v10 }
 0x666   : > { %v2273_v19 = vmul.f32 %v6475_v41, %v2241_v62  ;;  %3767 = vmatprep.subr.bf16.mxu0 %v4216_v9  ;;  %3807 = vmatprep.subr.bf16.mxu1 %v4217_v36  ;;  %v2280_v53 = vmul.f32 %v6463_v13, %v2272_v20  ;;  %v2242_v59 = vld [vmem:[#allocation2 + $0x3f] sm:$0xff]  ;;  %v6477_v63 = vld [vmem:[#allocation54_spill] sm:$0xff]  ;;  %v2314_v41 = vmul.f32 %v6465_v40, %v6096_v47 }
 0x667   : > { %v2295_v16 = vmul.f32 %v6464_v37, %v2287_v1  ;;  %v2318_v6 = vadd.f32 %v2310_v30, %v2302_v58  ;;  %v2296_v2 = vmul.f32 %v6464_v37, %v2288_v49  ;;  %v2249_v52 = vld [vmem:[#allocation2 + $0x39] sm:$0xff]  ;;  %v2250_v4 = vld [vmem:[#allocation2 + $0x41] sm:$0xff]  ;;  %v2274_v22 = vmul.f32 %v6476_v27, %v2242_v59  ;;  %v4222_v36 = vld [vmem:[#allocation11 + $0x10] sm:$0xff]  }
 0x668   : > { %v2289_v9 = vmul.f32 %v6477_v63, %v2249_v52  ;;  %v2281_v45 = vmul.f32 %v6463_v13, %v2273_v19  ;;  %v6478_v30 = vld [vmem:[#allocation55_spill] sm:$0xff]  ;;  %v4223_v51 = vld [vmem:[#allocation11 + $0x90] sm:$0xff]   ;;  %v2327_v58 = vmul.f32 %v6468_v21, %v6093_v50  ;;  %v4229_v19 = vld [vmem:[#allocation11 + $0xe0] sm:$0xff]   ;;  %v2346_v59 = vmul.f32 0.0, %v6109_v35 }
 0x669   : > { %v2303_v43 = vadd.f32 %v2295_v16, %v2279_v7  ;;  %v2334_v25 = vadd.f32 %v2326_v14, %v2318_v6  ;;  %v2304_v10 = vadd.f32 %v2296_v2, %v2280_v53  ;;  %3768 = vmatpush3.bf16.msra.mxu0 %v4218_v3  ;;  %v2290_v42 = vmul.f32 %v6478_v30, %v2250_v4  ;;  %v4225_v49 = vld [vmem:[#allocation11 + $0xd8] sm:$0xff]   ;;  %v4230_v2 = vld [vmem:[#allocation11 + $0x20] sm:$0xff]   ;;  %v4237_v27 = vld [vmem:[#allocation11 + $0xf0] sm:$0xff]  }
 0x66a   : > { %3808 = vmatpush3.bf16.msra.mxu1 %v4219_v39  ;;  %3769 = vmatprep.subr.bf16.mxu0 %v4220_v24  ;;  %v2282_v20 = vmul.f32 %v6463_v13, %v2274_v22  ;;  %v2297_v5 = vmul.f32 %v6464_v37, %v2289_v9  ;;  %v4228_v13 = vld [vmem:[#allocation11 + $0x60] sm:$0xff]   ;;  %v2344_v7 = vmul.f32 0.0, %v6093_v50  ;;  %v2313_v16 = vmul.f32 %v6465_v40, %v6093_v50  ;;  %v4232_v40 = vld [vmem:[#allocation11 + $0x68] sm:$0xff]   ;;  %v4239_v22 = vld [vmem:[#allocation11 + $0xb0] sm:$0xff]  }
 0x66b   : > { %v2319_v57 = vadd.f32 %v2311_v8, %v2303_v43  ;;  %v2350_v28 = vadd.f32 %v2342_v44, %v2334_v25  ;;  %v2320_v12 = vadd.f32 %v2312_v11, %v2304_v10  ;;  %3809 = vmatprep.subr.bf16.mxu1 %v4221_v54  ;;  %v2298_v1 = vmul.f32 %v6464_v37, %v2290_v42  ;;  %v4226_v8 = vld [vmem:[#allocation11 + $0x18] sm:$0xff]   ;;  %v4231_v50 = vld [vmem:[#allocation11 + $0xa0] sm:$0xff]   ;;  %v4234_v25 = vld [vmem:[#allocation11 + $0x28] sm:$0xff]  }
 0x66c   : > { %v2305_v31 = vadd.f32 %v2297_v5, %v2281_v45  ;;  %v4227_v44 = vld [vmem:[#allocation11 + $0x98] sm:$0xff]   ;;  %v2330_v39 = vmul.f32 %v6070_v33, %v6468_v21  ;;  %v2343_v24 = vmul.f32 0.0, %v6076_v60  ;;  %v4233_v60 = vld [vmem:[#allocation11 + $0xe8] sm:$0xff]  }
 0x66d   : > { %v6151_v62 = vpack.c.bf16 %v2350_v28, %v2349_v0  ;;  %v2336_v56 = vadd.f32 %v2328_v26, %v2320_v12  ;;  %3770 = vmatpush3.bf16.msra.mxu0 %v4222_v36  ;;  %v2306_v3 = vadd.f32 %v2298_v1, %v2282_v20  ;;  %v2335_v37 = vadd.f32 %v2327_v58, %v2319_v57  ;;  %v4235_v10 = vld [vmem:[#allocation11 + $0xa8] sm:$0xff]   ;;  %v4240_v63 = vld [vmem:[#allocation11 + $0x78] sm:$0xff]   ;;  %v4244_v57 = vld [vmem:[#allocation12] sm:$0xff]  }
 0x66e   : > { %3810 = vmatpush3.bf16.msra.mxu1 %v4223_v51  ;;  %3771 = vmatprep.subr.bf16.mxu0 %v4224_v23  ;;  %v2321_v14 = vadd.f32 %v2313_v16, %v2305_v31  ;;  %v2329_v0 = vmul.f32 %v6468_v21, %v6109_v35  ;;  %v2345_v26 = vmul.f32 0.0, %v6096_v47  ;;  %v4236_v47 = vld [vmem:[#allocation11 + $0x70] sm:$0xff]   ;;  %v4241_v9 = vld [vmem:[#allocation11 + $0xf8] sm:$0xff]  }
 0x66f   : > { %2594 = vmatmul.mubr.bf16.gmra.mrb[36].mxu0 %v6151_v62  ;;  %2667 = vmatmul.mubr.bf16.gmra.mrb[36].mxu1 %v6151_v62  ;;  %v2352_v6 = vadd.f32 %v2344_v7, %v2336_v56  ;;  %v2322_v53 = vadd.f32 %v2314_v41, %v2306_v3  ;;  %v2351_v54 = vadd.f32 %v2343_v24, %v2335_v37  ;;  %v4238_v35 = vld [vmem:[#allocation11 + $0x30] sm:$0xff]   ;;  %v4243_v36 = vld [vmem:[#allocation11 + $0xb8] sm:$0xff]  }
 0x670   : > { %2603 = vmatprep.mubr.bf16.mxu0 %v4719_v32  ;;  %2676 = vmatprep.mubr.bf16.mxu1 %v4719_v32  ;;  %v2337_v33 = vadd.f32 %v2329_v0, %v2321_v14 }
 0x671   : > { %3811 = vmatprep.subr.bf16.mxu1 %v4225_v49  ;;  %3772 = vmatpush3.bf16.msra.mxu0 %v4226_v8  ;;  %v6169_v43 = vpack.c.bf16 %v2352_v6, %v2351_v54  ;;  %v2338_v11 = vadd.f32 %v2330_v39, %v2322_v53 }
 0x672   : > { %3812 = vmatpush3.bf16.msra.mxu1 %v4227_v44  ;;  %3773 = vmatprep.subr.bf16.mxu0 %v4228_v13  ;;  %v2353_v21 = vadd.f32 %v2345_v26, %v2337_v33 }
 0x673   : > { %3813 = vmatprep.subr.bf16.mxu1 %v4229_v19  ;;  %v2354_v52 = vadd.f32 %v2346_v59, %v2338_v11 }
 0x675   : > { %3774 = vmatpush3.bf16.msra.mxu0 %v4230_v2  ;;  %v6177_v4 = vpack.c.bf16 %v2354_v52, %v2353_v21  ;;  %v4245_v2 = vld [vmem:[#allocation12 + $0x8] sm:$0xff]  }
 0x676   : > { %3814 = vmatpush3.bf16.msra.mxu1 %v4231_v50  ;;  %3775 = vmatprep.subr.bf16.mxu0 %v4232_v40 }
 0x677   : > { %2604 = vmatmul.mubr.bf16.gmra.mrb[40].mxu0 %v6169_v43  ;;  %2677 = vmatmul.mubr.bf16.gmra.mrb[40].mxu1 %v6169_v43 }
 0x678   : > { %2613 = vmatprep.mubr.bf16.mxu0 %v4719_v32  ;;  %2686 = vmatprep.mubr.bf16.mxu1 %v4719_v32  ;;  %v4242_v32 = vld [vmem:[#allocation11 + $0x38] sm:$0xff]  }
 0x679   : > { %3815 = vmatprep.subr.bf16.mxu1 %v4233_v60  ;;  %3776 = vmatpush3.bf16.msra.mxu0 %v4234_v25  ;;  %v4246_v60 = vld [vmem:[#allocation12 + $0x10] sm:$0xff]  }
 0x67a   : > { %3816 = vmatpush3.bf16.msra.mxu1 %v4235_v10  ;;  %3777 = vmatprep.subr.bf16.mxu0 %v4236_v47 }
 0x67b   : > { %3817 = vmatprep.subr.bf16.mxu1 %v4237_v27 }
 0x67d   : > { %3778 = vmatpush3.bf16.msra.mxu0 %v4238_v35 }
 0x67e   : > { %3818 = vmatpush3.bf16.msra.mxu1 %v4239_v22  ;;  %3779 = vmatprep.subr.bf16.mxu0 %v4240_v63 }
 0x67f   : > { %2614 = vmatmul.mubr.bf16.gmra.mrb[44].mxu0 %v6177_v4  ;;  %2687 = vmatmul.mubr.bf16.gmra.mrb[44].mxu1 %v6177_v4 }
 0x680   : > { %3819 = vmatprep.subr.bf16.mxu1 %v4241_v9 }
 0x681   : > { %3780 = vmatpush3.bf16.msra.mxu0 %v4242_v32 }
 0x682   : > { %3820 = vmatpush3.bf16.msra.mxu1 %v4243_v36  ;;  %3953 = vmatprep.subr.bf16.mxu0 %v4244_v57 }
 0x683   : > { %4009 = vmatprep.subr.bf16.mxu1 %v4244_v57 }
 0x736   : > { %v2585_v45 = vpop.f32.mrb[32].mxu0  ;;  %v2658_v30 = vpop.f32.mrb[32].mxu1 }
 0x737   : > { %v2697_v42 = vmax.f32 %v2585_v45, 0.0  ;;  %v2699_v51 = vmax.f32 %v2658_v30, 0.0  ;;  %v2587_v23 = vpop.f32.mrb[33].mxu0  ;;  %v2660_v28 = vpop.f32.mrb[33].mxu1 }
 0x738   : > { %v2698_v12 = vmax.f32 %v2587_v23, 0.0  ;;  %v2700_v20 = vmax.f32 %v2660_v28, 0.0  ;;  %v2589_v5 = vpop.f32.mrb[34].mxu0  ;;  %v2662_v1 = vpop.f32.mrb[34].mxu1 }
 0x739   : > { %v2701_v58 = vmax.f32 %v2589_v5, 0.0  ;;  %v2703_v56 = vmax.f32 %v2662_v1, 0.0  ;;  %v2591_v31 = vpop.f32.mrb[35].mxu0  ;;  %v2664_v49 = vpop.f32.mrb[35].mxu1  ;;  %v2729_v44 = vmul.f32 %v2697_v42, %v2697_v42  ;;  %v2731_v13 = vmul.f32 %v2699_v51, %v2699_v51 }
 0x73a   : > { %v2702_v8 = vmax.f32 %v2591_v31, 0.0  ;;  %v2704_v3 = vmax.f32 %v2664_v49, 0.0  ;;  %v2730_v16 = vmul.f32 %v2698_v12, %v2698_v12  ;;  %v2732_v41 = vmul.f32 %v2700_v20, %v2700_v20 }
 0x73b   : > { %v2733_v37 = vmul.f32 %v2701_v58, %v2701_v58  ;;  %v2735_v7 = vmul.f32 %v2703_v56, %v2703_v56 }
 0x73c   : > { %v2734_v19 = vmul.f32 %v2702_v8, %v2702_v8  ;;  %v2736_v39 = vmul.f32 %v2704_v3, %v2704_v3  ;;  %v4248_v8 = vld [vmem:[#allocation12 + $0x20] sm:$0xff]  }
 0x73d   : > { %v2825_v24 = vpack.c.bf16 %v2733_v37, %v2729_v44  ;;  %v2827_v6 = vpack.c.bf16 %v2735_v7, %v2731_v13 }
 0x73e   : > { %v2826_v14 = vpack.c.bf16 %v2734_v19, %v2730_v16  ;;  %v2828_v53 = vpack.c.bf16 %v2736_v39, %v2732_v41 }
 0x740   : > { %3065 = vmatprep.mubr.bf16.mxu0 %v2826_v14  ;;  %3130 = vmatprep.mubr.bf16.mxu1 %v2828_v53 }
 0x741   : > { %3066 = vmatmul.mubr.bf16.vlgmr.msra.gmra.mrb[48].mxu0 %v2825_v24  ;;  %3131 = vmatmul.mubr.bf16.vlgmr.msra.gmra.mrb[48].mxu1 %v2827_v6 }
 0x742   : > { %v2595_v50 = vpop.f32.mrb[36].mxu0  ;;  %v2668_v40 = vpop.f32.mrb[36].mxu1  ;;  %3954 = vmatpush3.bf16.msra.mxu0 %v4244_v57  ;;  %4017 = vmatpush3.bf16.msra.mxu1 %v4244_v57  ;;  %v4247_v57 = vld [vmem:[#allocation12 + $0x18] sm:$0xff]  }
 0x743   : > { %v2705_v54 = vmax.f32 %v2595_v50, 0.0  ;;  %v2707_v0 = vmax.f32 %v2668_v40, 0.0  ;;  %v2597_v33 = vpop.f32.mrb[37].mxu0  ;;  %v2670_v11 = vpop.f32.mrb[37].mxu1  ;;  %3955 = vmatprep.subr.bf16.mxu0 %v4245_v2  ;;  %4010 = vmatprep.subr.bf16.mxu1 %v4245_v2  ;;  %v4249_v50 = vld [vmem:[#allocation12 + $0x28] sm:$0xff]  }
 0x744   : > { %v2706_v26 = vmax.f32 %v2597_v33, 0.0  ;;  %v2708_v59 = vmax.f32 %v2670_v11, 0.0  ;;  %v2599_v21 = vpop.f32.mrb[38].mxu0  ;;  %v2672_v52 = vpop.f32.mrb[38].mxu1 }
 0x745   : > { %v2709_v25 = vmax.f32 %v2599_v21, 0.0  ;;  %v2711_v10 = vmax.f32 %v2672_v52, 0.0  ;;  %v2601_v47 = vpop.f32.mrb[39].mxu0  ;;  %v2674_v27 = vpop.f32.mrb[39].mxu1  ;;  %v2737_v35 = vmul.f32 %v2705_v54, %v2705_v54  ;;  %v2739_v9 = vmul.f32 %v2707_v0, %v2707_v0 }
 0x746   : > { %v2710_v22 = vmax.f32 %v2601_v47, 0.0  ;;  %v2712_v63 = vmax.f32 %v2674_v27, 0.0  ;;  %3956 = vmatpush3.bf16.msra.mxu0 %v4245_v2  ;;  %4018 = vmatpush3.bf16.msra.mxu1 %v4245_v2  ;;  %v2738_v45 = vmul.f32 %v2706_v26, %v2706_v26  ;;  %v2740_v30 = vmul.f32 %v2708_v59, %v2708_v59 }
 0x747   : > { %v2741_v32 = vmul.f32 %v2709_v25, %v2709_v25  ;;  %v2743_v36 = vmul.f32 %v2711_v10, %v2711_v10  ;;  %3957 = vmatprep.subr.bf16.mxu0 %v4246_v60  ;;  %4011 = vmatprep.subr.bf16.mxu1 %v4246_v60 }
 0x748   : > { %v2742_v42 = vmul.f32 %v2710_v22, %v2710_v22  ;;  %v2744_v51 = vmul.f32 %v2712_v63, %v2712_v63 }
 0x749   : > { %v2829_v23 = vpack.c.bf16 %v2741_v32, %v2737_v35  ;;  %v2831_v28 = vpack.c.bf16 %v2743_v36, %v2739_v9  ;;  %v4250_v35 = vld [vmem:[#allocation12 + $0x30] sm:$0xff]  }
 0x74a   : > { %v2830_v12 = vpack.c.bf16 %v2742_v42, %v2738_v45  ;;  %v2832_v20 = vpack.c.bf16 %v2744_v51, %v2740_v30  ;;  %v2605_v5 = vpop.f32.mrb[40].mxu0  ;;  %v2678_v1 = vpop.f32.mrb[40].mxu1  ;;  %3958 = vmatpush3.bf16.msra.mxu0 %v4246_v60  ;;  %4019 = vmatpush3.bf16.msra.mxu1 %v4246_v60 }
 0x74b   : > { %v2713_v58 = vmax.f32 %v2605_v5, 0.0  ;;  %v2715_v56 = vmax.f32 %v2678_v1, 0.0  ;;  %v2607_v31 = vpop.f32.mrb[41].mxu0  ;;  %v2680_v49 = vpop.f32.mrb[41].mxu1  ;;  %3959 = vmatprep.subr.bf16.mxu0 %v4247_v57  ;;  %4012 = vmatprep.subr.bf16.mxu1 %v4247_v57  ;;  %v4251_v5 = vld [vmem:[#allocation12 + $0x38] sm:$0xff]  }
 0x74c   : > { %v2714_v3 = vmax.f32 %v2607_v31, 0.0  ;;  %v2716_v44 = vmax.f32 %v2680_v49, 0.0  ;;  %v2609_v13 = vpop.f32.mrb[42].mxu0  ;;  %v2682_v37 = vpop.f32.mrb[42].mxu1  ;;  %3073 = vmatprep.mubr.bf16.mxu0 %v2830_v12  ;;  %3138 = vmatprep.mubr.bf16.mxu1 %v2832_v20 }
 0x74d   : > { %v2717_v7 = vmax.f32 %v2609_v13, 0.0  ;;  %v2719_v16 = vmax.f32 %v2682_v37, 0.0  ;;  %v2611_v41 = vpop.f32.mrb[43].mxu0  ;;  %v2684_v19 = vpop.f32.mrb[43].mxu1  ;;  %3074 = vmatmul.mubr.bf16.gmra.mrb[52].mxu0 %v2829_v23  ;;  %3139 = vmatmul.mubr.bf16.gmra.mrb[52].mxu1 %v2831_v28  ;;  %v2745_v39 = vmul.f32 %v2713_v58, %v2713_v58  ;;  %v2747_v14 = vmul.f32 %v2715_v56, %v2715_v56 }
 0x74e   : > { %v2718_v24 = vmax.f32 %v2611_v41, 0.0  ;;  %v2720_v6 = vmax.f32 %v2684_v19, 0.0  ;;  %3960 = vmatpush3.bf16.msra.mxu0 %v4247_v57  ;;  %4020 = vmatpush3.bf16.msra.mxu1 %v4247_v57  ;;  %v2746_v40 = vmul.f32 %v2714_v3, %v2714_v3  ;;  %v2748_v54 = vmul.f32 %v2716_v44, %v2716_v44 }
 0x74f   : > { %v2749_v53 = vmul.f32 %v2717_v7, %v2717_v7  ;;  %v2751_v2 = vmul.f32 %v2719_v16, %v2719_v16  ;;  %3961 = vmatprep.subr.bf16.mxu0 %v4248_v8  ;;  %4013 = vmatprep.subr.bf16.mxu1 %v4248_v8 }
 0x750   : > { %v2750_v0 = vmul.f32 %v2718_v24, %v2718_v24  ;;  %v2752_v33 = vmul.f32 %v2720_v6, %v2720_v6 }
 0x751   : > { %v2833_v11 = vpack.c.bf16 %v2749_v53, %v2745_v39  ;;  %v2835_v60 = vpack.c.bf16 %v2751_v2, %v2747_v14 }
 0x752   : > { %v2834_v26 = vpack.c.bf16 %v2750_v0, %v2746_v40  ;;  %v2836_v59 = vpack.c.bf16 %v2752_v33, %v2748_v54  ;;  %v2615_v21 = vpop.f32.mrb[44].mxu0  ;;  %v2688_v52 = vpop.f32.mrb[44].mxu1  ;;  %3962 = vmatpush3.bf16.msra.mxu0 %v4248_v8  ;;  %4021 = vmatpush3.bf16.msra.mxu1 %v4248_v8 }
 0x753   : > { %v2721_v25 = vmax.f32 %v2615_v21, 0.0  ;;  %v2723_v10 = vmax.f32 %v2688_v52, 0.0  ;;  %v2617_v47 = vpop.f32.mrb[45].mxu0  ;;  %v2690_v27 = vpop.f32.mrb[45].mxu1  ;;  %3963 = vmatprep.subr.bf16.mxu0 %v4249_v50  ;;  %4014 = vmatprep.subr.bf16.mxu1 %v4249_v50 }
 0x754   : > { %v2722_v22 = vmax.f32 %v2617_v47, 0.0  ;;  %v2724_v63 = vmax.f32 %v2690_v27, 0.0  ;;  %v2619_v9 = vpop.f32.mrb[46].mxu0  ;;  %v2692_v32 = vpop.f32.mrb[46].mxu1  ;;  %3081 = vmatprep.mubr.bf16.mxu0 %v2834_v26  ;;  %3146 = vmatprep.mubr.bf16.mxu1 %v2836_v59 }
 0x755   : > { %v2725_v36 = vmax.f32 %v2619_v9, 0.0  ;;  %v2727_v57 = vmax.f32 %v2692_v32, 0.0  ;;  %v2621_v45 = vpop.f32.mrb[47].mxu0  ;;  %v2694_v30 = vpop.f32.mrb[47].mxu1  ;;  %3082 = vmatmul.mubr.bf16.gmra.mrb[56].mxu0 %v2833_v11  ;;  %3147 = vmatmul.mubr.bf16.gmra.mrb[56].mxu1 %v2835_v60  ;;  %v2753_v42 = vmul.f32 %v2721_v25, %v2721_v25  ;;  %v2755_v28 = vmul.f32 %v2723_v10, %v2723_v10 }
 0x756   : > { %v2726_v51 = vmax.f32 %v2621_v45, 0.0  ;;  %v2728_v23 = vmax.f32 %v2694_v30, 0.0  ;;  %3964 = vmatpush3.bf16.msra.mxu0 %v4249_v50  ;;  %4022 = vmatpush3.bf16.msra.mxu1 %v4249_v50  ;;  %v2754_v1 = vmul.f32 %v2722_v22, %v2722_v22  ;;  %v2756_v58 = vmul.f32 %v2724_v63, %v2724_v63 }
 0x757   : > { %v2757_v12 = vmul.f32 %v2725_v36, %v2725_v36  ;;  %v2759_v20 = vmul.f32 %v2727_v57, %v2727_v57  ;;  %3965 = vmatprep.subr.bf16.mxu0 %v4250_v35  ;;  %4015 = vmatprep.subr.bf16.mxu1 %v4250_v35 }
 0x758   : > { %v2758_v56 = vmul.f32 %v2726_v51, %v2726_v51  ;;  %v2760_v31 = vmul.f32 %v2728_v23, %v2728_v23 }
 0x759   : > { %v2837_v49 = vpack.c.bf16 %v2757_v12, %v2753_v42  ;;  %v2839_v8 = vpack.c.bf16 %v2759_v20, %v2755_v28 }
 0x75a   : > { %v2838_v3 = vpack.c.bf16 %v2758_v56, %v2754_v1  ;;  %v2840_v44 = vpack.c.bf16 %v2760_v31, %v2756_v58  ;;  %3966 = vmatpush3.bf16.msra.mxu0 %v4250_v35  ;;  %4023 = vmatpush3.bf16.msra.mxu1 %v4250_v35 }
 0x75b   : > { %3967 = vmatprep.subr.bf16.mxu0 %v4251_v5  ;;  %4016 = vmatprep.subr.bf16.mxu1 %v4251_v5 }
 0x75c   : > { %3089 = vmatprep.mubr.bf16.mxu0 %v2838_v3  ;;  %3154 = vmatprep.mubr.bf16.mxu1 %v2840_v44 }
 0x75d   : > { %3090 = vmatmul.mubr.bf16.gmra.mrb[60].mxu0 %v2837_v49  ;;  %3155 = vmatmul.mubr.bf16.gmra.mrb[60].mxu1 %v2839_v8 }
 0x75e   : > { %3969 = vmatprep.mubr.bf16.mxu0 %v6111_v17  ;;  %3973 = vmatprep.mubr.bf16.mxu1 %v6169_v43 }
 0x75f   : > { %3968 = vmatpush3.bf16.msra.mxu0 %v4251_v5  ;;  %4024 = vmatpush3.bf16.msra.mxu1 %v4251_v5 }
 0x765   : > { %3970 = vmatmul.mubr.bf16.vlgmr.msra.gmra.mrb[64].mxu0 %v6151_v62  ;;  %3974 = vmatmul.mubr.bf16.vlgmr.msra.gmra.mrb[64].mxu1 %v6177_v4 }
 0x814   : > { %v3781_v13 = vpop.f32.mrb[48].mxu0  ;;  %v3821_v37 = vpop.f32.mrb[48].mxu1 }
 0x815   : > { %v3782_v7 = vpop.f32.mrb[49].mxu0  ;;  %v3822_v16 = vpop.f32.mrb[49].mxu1 }
 0x816   : > { %v3783_v41 = vadd.f32 %v3782_v7, %v3781_v13  ;;  %v3823_v19 = vadd.f32 %v3822_v16, %v3821_v37  ;;  %v3784_v39 = vpop.f32.mrb[50].mxu0  ;;  %v3824_v24 = vpop.f32.mrb[50].mxu1 }
 0x817   : > { %v3785_v6 = vpop.f32.mrb[51].mxu0  ;;  %v3825_v14 = vpop.f32.mrb[51].mxu1 }
 0x818   : > { %v6185_v53 = vadd.f32 %v3823_v19, %v3783_v41  ;;  %v3786_v17 = vadd.f32 %v3785_v6, %v3784_v39  ;;  %v3826_v43 = vadd.f32 %v3825_v14, %v3824_v24 }
 0x81a   : > { %v6187_v2 = vadd.f32 %v3826_v43, %v3786_v17 }
 0x820   : > { %v3787_v50 = vpop.f32.mrb[52].mxu0  ;;  %v3827_v62 = vpop.f32.mrb[52].mxu1 }
 0x821   : > { %v3788_v40 = vpop.f32.mrb[53].mxu0  ;;  %v3828_v4 = vpop.f32.mrb[53].mxu1 }
 0x822   : > { %v3789_v54 = vadd.f32 %v3788_v40, %v3787_v50  ;;  %v3829_v0 = vadd.f32 %v3828_v4, %v3827_v62  ;;  %v3790_v33 = vpop.f32.mrb[54].mxu0  ;;  %v3830_v11 = vpop.f32.mrb[54].mxu1 }
 0x823   : > { %v3791_v60 = vpop.f32.mrb[55].mxu0  ;;  %v3831_v26 = vpop.f32.mrb[55].mxu1 }
 0x824   : > { %v6189_v59 = vadd.f32 %v3829_v0, %v3789_v54  ;;  %v3792_v21 = vadd.f32 %v3791_v60, %v3790_v33  ;;  %v3832_v52 = vadd.f32 %v3831_v26, %v3830_v11 }
 0x826   : > { %v6191_v25 = vadd.f32 %v3832_v52, %v3792_v21 }
 0x828   : > { %v3793_v10 = vpop.f32.mrb[56].mxu0  ;;  %v3833_v47 = vpop.f32.mrb[56].mxu1 }
 0x829   : > { %v3794_v27 = vpop.f32.mrb[57].mxu0  ;;  %v3834_v35 = vpop.f32.mrb[57].mxu1 }
 0x82a   : > { %v3795_v22 = vadd.f32 %v3794_v27, %v3793_v10  ;;  %v3835_v63 = vadd.f32 %v3834_v35, %v3833_v47  ;;  %v3796_v9 = vpop.f32.mrb[58].mxu0  ;;  %v3836_v32 = vpop.f32.mrb[58].mxu1 }
 0x82b   : > { %v3797_v36 = vpop.f32.mrb[59].mxu0  ;;  %v3837_v57 = vpop.f32.mrb[59].mxu1 }
 0x82c   : > { %v6193_v45 = vadd.f32 %v3835_v63, %v3795_v22  ;;  %v3798_v30 = vadd.f32 %v3797_v36, %v3796_v9  ;;  %v3838_v42 = vadd.f32 %v3837_v57, %v3836_v32  ;;  %v3350_v36 = vsub.s32 5, %v6417_v48 }
 0x82e   : > { %v6195_v51 = vadd.f32 %v3838_v42, %v3798_v30  ;;  %v4455_v30 = vld [vmem:[#allocation6] sm:$0xff] }
 0x82f   : > { %v3351_v42 = vrot.slane %v4455_v30, %v3350_v36 }
 0x830   : > { %v3799_v23 = vpop.f32.mrb[60].mxu0  ;;  %v3839_v28 = vpop.f32.mrb[60].mxu1 }
 0x831   : > { %v3800_v12 = vpop.f32.mrb[61].mxu0  ;;  %v3840_v20 = vpop.f32.mrb[61].mxu1 }
 0x832   : > { %v3801_v5 = vadd.f32 %v3800_v12, %v3799_v23  ;;  %v3841_v1 = vadd.f32 %v3840_v20, %v3839_v28  ;;  %v3802_v58 = vpop.f32.mrb[62].mxu0  ;;  %v3842_v56 = vpop.f32.mrb[62].mxu1 }
 0x833   : > { %v3803_v31 = vpop.f32.mrb[63].mxu0  ;;  %v3843_v49 = vpop.f32.mrb[63].mxu1 }
 0x834   : > { %v3157_v8 = vadd.f32 %v3841_v1, %v3801_v5  ;;  %v3804_v3 = vadd.f32 %v3803_v31, %v3802_v58  ;;  %v3844_v44 = vadd.f32 %v3843_v49, %v3842_v56 }
 0x836   : > { %v6197_v13 = vadd.f32 %v3844_v44, %v3804_v3 }
 0x838   : > { %v3971_v37 = vpop.f32.mrb[64].mxu0  ;;  %v3975_v7 = vpop.f32.mrb[64].mxu1 }
 0x839   : > { %v3704_v16 = vmul.f32 -1.442695, %v3971_v37  ;;  %v3708_v41 = vmul.f32 -1.442695, %v3975_v7  ;;  %v3261_v19 = vpop.f32.mrb[65].mxu0  ;;  %v3277_v39 = vpop.f32.mrb[65].mxu1 }
 0x83a   : > { %v3702_v24 = vmul.f32 -1.442695, %v3261_v19  ;;  %v3706_v6 = vmul.f32 -1.442695, %v3277_v39  ;;  %v3972_v14 = vpop.f32.mrb[66].mxu0  ;;  %v3976_v17 = vpop.f32.mrb[66].mxu1 }
 0x83b   : > { %4412 = vpow2.f32 %v3704_v16  ;;  %v3705_v43 = vmul.f32 -1.442695, %v3972_v14  ;;  %v3264_v50 = vpop.f32.mrb[67].mxu0  ;;  %v3280_v62 = vpop.f32.mrb[67].mxu1  ;;  %v3709_v40 = vmul.f32 -1.442695, %v3976_v17 }
 0x83c   : > { %4414 = vpow2.f32 %v3708_v41  ;;  %v3703_v4 = vmul.f32 -1.442695, %v3264_v50  ;;  %v3707_v54 = vmul.f32 -1.442695, %v3280_v62 }
 0x83d   : > { %4416 = vpow2.f32 %v3702_v24 }
 0x83e   : > { %4418 = vpow2.f32 %v3706_v6 }
 0x83f   : > { %4420 = vpow2.f32 %v3705_v43 }
 0x840   : > { %4422 = vpow2.f32 %v3709_v40 }
 0x841   : > { %4424 = vpow2.f32 %v3703_v4 }
 0x842   : > { %4426 = vpow2.f32 %v3707_v54 }
 0x845   : > { %v4413_v0 = vpop.eup %4412 }
 0x846   : > { %v4415_v33 = vpop.eup %4414  ;;  %v3318_v11 = vadd.f32 1.0, %v4413_v0 }
 0x847   : > { %v4417_v60 = vpop.eup %4416  ;;  %v3322_v26 = vadd.f32 1.0, %v4415_v33 }
 0x848   : > { %v4419_v21 = vpop.eup %4418  ;;  %4428 = vrcp.f32 %v3318_v11  ;;  %v3316_v52 = vadd.f32 1.0, %v4417_v60 }
 0x849   : > { %v4421_v10 = vpop.eup %4420  ;;  %4430 = vrcp.f32 %v3322_v26  ;;  %v3320_v47 = vadd.f32 1.0, %v4419_v21 }
 0x84a   : > { %v4423_v27 = vpop.eup %4422  ;;  %4432 = vrcp.f32 %v3316_v52  ;;  %v3319_v35 = vadd.f32 1.0, %v4421_v10 }
 0x84b   : > { %v4425_v22 = vpop.eup %4424  ;;  %4434 = vrcp.f32 %v3320_v47  ;;  %v3323_v63 = vadd.f32 1.0, %v4423_v27 }
 0x84c   : > { %v4427_v9 = vpop.eup %4426  ;;  %4436 = vrcp.f32 %v3319_v35  ;;  %v3317_v32 = vadd.f32 1.0, %v4425_v22 }
 0x84d   : > { %4438 = vrcp.f32 %v3323_v63  ;;  %v3321_v57 = vadd.f32 1.0, %v4427_v9 }
 0x84e   : > { %4440 = vrcp.f32 %v3317_v32 }
 0x84f   : > { %4442 = vrcp.f32 %v3321_v57 }
 0x852   : > { %v4429_v23 = vpop.eup %4428 }
 0x853   : > { %v4431_v28 = vpop.eup %4430  ;;  %v3342_v12 = vmul.f32 %v4429_v23, %v6189_v59 }
 0x854   : > { %v4433_v20 = vpop.eup %4432  ;;  %v3346_v5 = vmul.f32 %v4431_v28, %v3157_v8 }
 0x855   : > { %v4435_v1 = vpop.eup %4434  ;;  %v3354_v58 = vmul.f32 %v3351_v42, %v3342_v12  ;;  %v3340_v56 = vmul.f32 %v4433_v20, %v6185_v53 }
 0x856   : > { %v4437_v31 = vpop.eup %4436  ;;  %v3358_v49 = vmul.f32 %v3351_v42, %v3346_v5  ;;  %v3344_v48 = vmul.f32 %v4435_v1, %v6193_v45 }
 0x857   : > { %v4439_v3 = vpop.eup %4438  ;;  %v3362_v44 = vadd.f32 %v3354_v58, %v5963_v34  ;;  %v3352_v37 = vmul.f32 %v3351_v42, %v3340_v56  ;;  %v3343_v7 = vmul.f32 %v4437_v31, %v6191_v25 }
 0x858   : > { %v4441_v16 = vpop.eup %4440  ;;  %v3366_v59 = vadd.f32 %v3358_v49, %v5979_v29  ;;  %v3356_v8 = vmul.f32 %v3351_v42, %v3344_v48  ;;  %v3347_v41 = vmul.f32 %v4439_v3, %v6197_v13 }
 0x859   : > { %v4443_v19 = vpop.eup %4442  ;;  %3370 = vst [vmem:[%s342_s28 + $0x10] sm:$0xff] %v3362_v44  ;;  %v3360_v53 = vadd.f32 %v3352_v37, %v5956_v55  ;;  %v3355_v45 = vmul.f32 %v3351_v42, %v3343_v7  ;;  %v3341_v39 = vmul.f32 %v4441_v16, %v6187_v2 }
 0x85a   : > { %3374 = vst [vmem:[%s342_s28 + $0x30] sm:$0xff] %v3366_v59  ;;  %v3364_v34 = vadd.f32 %v3356_v8, %v5972_v15  ;;  %v3359_v24 = vmul.f32 %v3351_v42, %v3347_v41  ;;  %v3345_v25 = vmul.f32 %v4443_v19, %v6195_v51 }
 0x85b   : > { %3368 = vst [vmem:[%s342_s28] sm:$0xff] %v3360_v53  ;;  %v3363_v29 = vadd.f32 %v3355_v45, %v5967_v18  ;;  %v3353_v13 = vmul.f32 %v3351_v42, %v3341_v39 }
 0x85c   : > { %3372 = vst [vmem:[%s342_s28 + $0x20] sm:$0xff] %v3364_v34  ;;  %v3367_v55 = vadd.f32 %v3359_v24, %v5983_v46  ;;  %v3357_v6 = vmul.f32 %v3351_v42, %v3345_v25 }
 0x85d   : > { %3371 = vst [vmem:[%s342_s28 + $0x18] sm:$0xff] %v3363_v29  ;;  %v3361_v2 = vadd.f32 %v3353_v13, %v5959_v61 }
 0x85e   : > { %3375 = vst [vmem:[%s342_s28 + $0x38] sm:$0xff] %v3367_v55  ;;  %v3365_v18 = vadd.f32 %v3357_v6, %v5975_v38 }
 0x85f   : > { %3369 = vst [vmem:[%s342_s28 + $0x8] sm:$0xff] %v3361_v2 }
 0x860   : > { %3373 = vst [vmem:[%s342_s28 + $0x28] sm:$0xff] %v3365_v18 }
 0x861   : > { %4639 = shalt.err (!%p4636_p8)
}
 0x862   : > { %s4640_s19 = scalar_lea.hbm %s6220_s17, 1024  ;;  %s4644_s8 = scalar_lea.hbm %s6273_s6, 2048 }
 0x863   : > { %p4641_p6 = scmp.ne.s32.totalorder %s6220_s17, %s4640_s19  ;;  %p4645_p3 = scmp.lt.u32.totalorder %s6220_s17, %s6273_s6 }
 0x864   : > { %p4646_p0 = scmp.lt.u32.totalorder %s4644_s8, %s4640_s19  ;;  %p4648_p2 = scmp.lt.u32.totalorder %s4640_s19, %s6220_s17 }
 0x865   : > { %p4642_p9 = pnand %p4641_p6, %p6479_p7 }
 0x866   : > { %p4647_p5 = por %p4646_p0, %p4645_p3 }
 0x867   : > { %p4643_p4 = pneg %p4642_p9 }
 0x868   : > { %p4649_p10 = por %p4648_p2, %p4647_p5 }
 0x86a   : > { %p4650_p1 = pnand %p4649_p10, %p4643_p4 }
 0x86c   : > { %4653 = shalt.err (!%p4650_p1)
}
 0x86d   : > { %s4721_s16 = smov 128   ;;  %s4722_s26 = smov 8  }
 0x86e   : > { %4047 = dma.vmem_to_hbm [thread:$0]  (%p6479_p7), %s6222_s13, 1024, %s6220_s17, %s3377_s27, %s4721_s16, %s4721_s16, %s4722_s26  }
 0x86f PF: > { %s3405_s12 = sand.u32 1, %s4692_s21   ;;  %p6480_p11 = scmp.ne.s32.totalorder %s6346_s11, 0 }
 0x870   : > { %p6481_p12 = scmp.ge.s32.totalorder %s4704_s24, 2  ;;  %s3406_s14 = scalar_lea.sflag [#allocation5], %s3405_s12 }
 0x872   : > { %p4070_p13 = pnand %p6481_p12, %p6480_p11 }
 0x874   : > { %4687 = dma.done.wait (!%p4070_p13), %s3406_s14, 1024  }
 0x875   : > { %4689 = vsyncadd (!%p4070_p13), %s3406_s14, 4294966272  ;;  %p22_p8 = scmp.ge.s32.totalorder %s4924_s15, 4   ;;  %s6482_s21 = smov %s4696_s22 }
 0x876   : > { %s6483_s22 = smov %s4700_s23  ;;  %s6484_s23 = smov %s4936_s20 }
 0x877   : > { %s6485_s24 = smov %s4924_s15  ;;  %24 = sbr.rel (!%p22_p8) target bundleno = 8 (0x8), region = 112 }
 0x87e   :  { %3411 = vsyncpa [#allocation4], 1 }
 0x87f   :  { %3413 = vsyncpa [#allocation4 + $0x1], 1 }
 0x880   :  { %3414 = vsyncpa [#allocation7], 1 }
 0x881   :  { %3415 = vsyncpa [#allocation10], 1 }
 0x882   :  { %3416 = vsyncpa [#allocation13], 1 }
 0x883   :  { %3417 = vsyncpa [#allocation5], 1 }
 0x884   :  { %3419 = vsyncpa [#allocation5 + $0x1], 1 }

</bundles_post_ra>
